<compile_context>
chip_gen: v7x
topology: tpu7x:2x2x1
jax: 0.10.0
libtpu: 0.0.40
codegen_flags: <defaults>
</compile_context>

<pallas_src>
import functools

import jax
import jax.numpy as jnp
from jax import lax
from jax.experimental import pallas as pl
from jax.experimental.pallas import tpu as pltpu


# ----------------------------- Pallas kernel --------------------------------
def basic_res_block_kernel(x_ref, w1_ref, w2_ref, g1_ref, b1_ref, g2_ref, b2_ref,
                           mask_ref, o_ref, stk_ref, *,
                           H, W, P, Cp, n_real, eps, alpha):
    """Fused BasicResBlock forward for one sample.

    x_ref:   (1, Cp, P)    input sample, P = D*H*W (NCDHW flattened), padded rows zero
    w*_ref:  (Cp, 27*Cp)   repacked conv taps, column k*Cp + i = W[o, i, kd, kh, kw]
    g*_ref, b*_ref: (Cp, 1) GroupNorm affine params (padded rows zero)
    mask_ref:(27, P)       0/1 boundary masks (padding=1), precomputed on host
    o_ref:   (1, Cp, P)    output sample
    stk_ref: (27*Cp, P)    VMEM scratch holding the stacked rolled+masked taps
    """
    x = x_ref[0]                                         # (Cp, P)

    # Flat-position offset of each tap; tap index k = kd*9 + kh*3 + kw.
    offsets = [od * H * W + oh * W + ow
               for od in (-1, 0, 1) for oh in (-1, 0, 1) for ow in (-1, 0, 1)]

    def conv3x3x3(src, w_ref_):
        """src: (Cp, P) -> (Cp, P) via one stacked-K matmul on the MXU."""
        for k, s in enumerate(offsets):
            if s == 0:
                shifted = src
            else:
                shifted = pltpu.roll(src, shift=(-s) % P, axis=1)
            if k != 13:                                  # center tap needs no mask
                shifted = shifted * mask_ref[pl.ds(k, 1), :]     # (1, P) broadcast
            stk_ref[pl.ds(k * Cp, Cp), :] = shifted
        return jnp.dot(w_ref_[...], stk_ref[...],
                       preferred_element_type=jnp.float32)

    def group_norm(v, g_ref_, b_ref_):
        """GroupNorm(num_groups=1). Padded channel rows of v are exactly zero, so
        full-tile sums equal real-channel sums; divide by the REAL element count."""
        s1 = jnp.sum(v)
        s2 = jnp.sum(v * v)
        mean = s1 / n_real
        var = jnp.maximum(s2 / n_real - mean * mean, 0.0)   # guard cancellation
        inv = lax.rsqrt(var + eps)
        # gamma/beta padded rows are zero -> padded output rows stay zero.
        return (v - mean) * (inv * g_ref_[...]) + b_ref_[...]

    def lrelu(v):
        return jnp.where(v >= 0, v, alpha * v)

    # conv1 -> norm1 -> lrelu
    a1 = lrelu(group_norm(conv3x3x3(x, w1_ref), g1_ref, b1_ref))
    # conv2 -> norm2 -> +residual -> lrelu
    out = group_norm(conv3x3x3(a1, w2_ref), g2_ref, b2_ref) + x
    o_ref[0] = lrelu(out)


# ------------------------------ host helpers ---------------------------------
def pack_conv_weight(w_oidhw, cin_pad, cout_pad):
    """PyTorch (Cout, Cin, 3, 3, 3) -> lane-dense (cout_pad, 27*cin_pad).
    Column index = k*cin_pad + i with tap k = kd*9 + kh*3 + kw; pads are zero."""
    Cout, Cin = w_oidhw.shape[0], w_oidhw.shape[1]
    w = jnp.transpose(w_oidhw.astype(jnp.float32), (0, 2, 3, 4, 1))  # (O,kd,kh,kw,I)
    w = w.reshape(Cout, 27, Cin)
    w = jnp.pad(w, ((0, cout_pad - Cout), (0, 0), (0, cin_pad - Cin)))
    return w.reshape(cout_pad, 27 * cin_pad)


def make_boundary_masks(D, H, W):
    """(27, P) f32 0/1 masks for conv padding=1; grid-invariant, computed once."""
    P = D * H * W
    pos = jnp.arange(P, dtype=jnp.int32)
    d = pos // (H * W)
    h = (pos // W) % H
    w = pos % W
    rows = []
    for od in (-1, 0, 1):
        for oh in (-1, 0, 1):
            for ow in (-1, 0, 1):
                valid = ((d + od >= 0) & (d + od <= D - 1) &
                         (h + oh >= 0) & (h + oh <= H - 1) &
                         (w + ow >= 0) & (w + ow <= W - 1))
                rows.append(valid)
    return jnp.stack(rows).astype(jnp.float32)


# ------------------------------ wrapper ---------------------------------------
def basic_res_block_forward(x_ncdhw, w1, g1, b1, w2, g2, b2, *, alpha, eps=1e-5):
    """Forward pass of BasicResBlock (stride=1, downsample=None)."""
    N, C, D, H, W = x_ncdhw.shape
    Cout = w1.shape[0]
    assert w1.shape[1] == C and w2.shape == (Cout, Cout, 3, 3, 3)
    assert Cout == C, "residual add requires in_planes == planes (stride=1, no downsample)"
    P = D * H * W
    assert P % 128 == 0, "D*H*W must be lane-aligned; pad spatial extent explicitly"

    Cp = max(8, ((C + 7) // 8) * 8)                       # f32 sublane-tile channel pad

    # Lane-dense per-sample activation layout: (Cp, P), padded channels zero.
    x_flat = jnp.zeros((N, Cp, P), jnp.float32)
    x_flat = x_flat.at[:, :C, :].set(x_ncdhw.reshape(N, C, P).astype(jnp.float32))

    w1_mat = pack_conv_weight(w1, Cp, Cp)                 # (Cp, 27*Cp)
    w2_mat = pack_conv_weight(w2, Cp, Cp)

    def pad_affine(v):
        return jnp.zeros((Cp, 1), jnp.float32).at[:C, 0].set(v.astype(jnp.float32))

    g1p, b1p, g2p, b2p = map(pad_affine, (g1, b1, g2, b2))

    masks = make_boundary_masks(D, H, W)                  # (27, P)

    kernel = functools.partial(basic_res_block_kernel, H=H, W=W, P=P, Cp=Cp,
                               n_real=float(C * P), eps=eps, alpha=alpha)

    out = pl.pallas_call(
        kernel,
        out_shape=jax.ShapeDtypeStruct((N, Cp, P), jnp.float32),
        grid_spec=pltpu.PrefetchScalarGridSpec(
            num_scalar_prefetch=0,
            grid=(N,),
            in_specs=[
                pl.BlockSpec((1, Cp, P), lambda n: (n, 0, 0)),
                pl.BlockSpec(w1_mat.shape, lambda n: (0, 0)),
                pl.BlockSpec(w2_mat.shape, lambda n: (0, 0)),
                pl.BlockSpec((Cp, 1), lambda n: (0, 0)),
                pl.BlockSpec((Cp, 1), lambda n: (0, 0)),
                pl.BlockSpec((Cp, 1), lambda n: (0, 0)),
                pl.BlockSpec((Cp, 1), lambda n: (0, 0)),
                pl.BlockSpec(masks.shape, lambda n: (0, 0)),
            ],
            out_specs=pl.BlockSpec((1, Cp, P), lambda n: (n, 0, 0)),
            scratch_shapes=[pltpu.VMEM((27 * Cp, P), jnp.float32)],
        ),
        compiler_params=pltpu.CompilerParams(
            dimension_semantics=("parallel",),            # one sample per TC (megacore)
            vmem_limit_bytes=32 * 1024 * 1024,
        ),
    )(x_flat, w1_mat, w2_mat, g1p, b1p, g2p, b2p, masks)

    return out[:, :C, :].reshape(N, C, D, H, W)


# ------------------------- pure-JAX reference ---------------------------------
def reference_forward(x, w1, g1, b1, w2, g2, b2, *, alpha, eps=1e-5):
    def conv(x_, w_):
        return lax.conv_general_dilated(
            x_, w_, window_strides=(1, 1, 1),
            padding=((1, 1), (1, 1), (1, 1)),
            dimension_numbers=("NCDHW", "OIDHW", "NCDHW"))

    def gn(x_, g_, b_):
        mean = x_.mean(axis=(1, 2, 3, 4), keepdims=True)
        var = ((x_ - mean) ** 2).mean(axis=(1, 2, 3, 4), keepdims=True)
        xn = (x_ - mean) * lax.rsqrt(var + eps)
        return xn * g_.reshape(1, -1, 1, 1, 1) + b_.reshape(1, -1, 1, 1, 1)

    def lrelu(x_):
        return jnp.where(x_ >= 0, x_, alpha * x_)

    out = lrelu(gn(conv(x, w1), g1, b1))
    out = gn(conv(out, w2), g2, b2)
    out = out + x
    return lrelu(out)


# --------------------------------- main ---------------------------------------
if __name__ == "__main__":
    N, C, D, H, W = 2, 4, 8, 8, 8          # in_planes = planes = 4, stride = 1
    planes = C
    alpha = 0.1                            # lrelu_alpha
    # pad_value is unused in BasicResBlock.forward

    key = jax.random.PRNGKey(0)
    k_x, k_w1, k_w2, k_g1, k_b1, k_g2, k_b2 = jax.random.split(key, 7)

    x = jax.random.normal(k_x, (N, C, D, H, W), jnp.float32)

    fan_in = C * 27
    w1 = jax.random.normal(k_w1, (planes, C, 3, 3, 3), jnp.float32) * (2.0 / fan_in) ** 0.5
    w2 = jax.random.normal(k_w2, (planes, planes, 3, 3, 3), jnp.float32) * (2.0 / fan_in) ** 0.5
    g1 = 1.0 + 0.1 * jax.random.normal(k_g1, (planes,), jnp.float32)
    b1 = 0.1 * jax.random.normal(k_b1, (planes,), jnp.float32)
    g2 = 1.0 + 0.1 * jax.random.normal(k_g2, (planes,), jnp.float32)
    b2 = 0.1 * jax.random.normal(k_b2, (planes,), jnp.float32)

    out = basic_res_block_forward(x, w1, g1, b1, w2, g2, b2, alpha=alpha)
    out = jax.block_until_ready(out)

    ref = jax.block_until_ready(reference_forward(x, w1, g1, b1, w2, g2, b2, alpha=alpha))

    assert out.shape == (N, planes, D, H, W)
    max_err = float(jnp.max(jnp.abs(out - ref)))
    if max_err > 1e-3:
        raise AssertionError(f"mismatch vs reference, max abs err = {max_err}")

    print("KERNEL_OK")
</pallas_src>

<mosaic_0001>
module attributes {stable_mosaic.version = 11 : i64} {
  func.func @basic_res_block_kernel(%arg0: i32, %arg1: memref<1x8x512xf32, #tpu.memory_space<vmem>>, %arg2: memref<8x216xf32, #tpu.memory_space<vmem>>, %arg3: memref<8x216xf32, #tpu.memory_space<vmem>>, %arg4: memref<8x1xf32, #tpu.memory_space<vmem>>, %arg5: memref<8x1xf32, #tpu.memory_space<vmem>>, %arg6: memref<8x1xf32, #tpu.memory_space<vmem>>, %arg7: memref<8x1xf32, #tpu.memory_space<vmem>>, %arg8: memref<27x512xf32, #tpu.memory_space<vmem>>, %arg9: memref<1x8x512xf32, #tpu.memory_space<vmem>>, %arg10: memref<216x512xf32, #tpu.memory_space<vmem>>) attributes {dimension_semantics = [#tpu.dimension_semantics<parallel>], iteration_bounds = array<i64: 2>, scalar_prefetch = 0 : i64, scratch_operands = 1 : i64, tpu.core_type = #tpu.core_type<tc>, window_params = [{transform_indices = @transform_0, window_bounds = array<i64: 1, 8, 512>}, {pipeline_mode = #tpu.pipeline_mode<synchronous>, transform_indices = @transform_1, window_bounds = array<i64: 8, 216>}, {pipeline_mode = #tpu.pipeline_mode<synchronous>, transform_indices = @transform_2, window_bounds = array<i64: 8, 216>}, {pipeline_mode = #tpu.pipeline_mode<synchronous>, transform_indices = @transform_3, window_bounds = array<i64: 8, 1>}, {pipeline_mode = #tpu.pipeline_mode<synchronous>, transform_indices = @transform_4, window_bounds = array<i64: 8, 1>}, {pipeline_mode = #tpu.pipeline_mode<synchronous>, transform_indices = @transform_5, window_bounds = array<i64: 8, 1>}, {pipeline_mode = #tpu.pipeline_mode<synchronous>, transform_indices = @transform_6, window_bounds = array<i64: 8, 1>}, {pipeline_mode = #tpu.pipeline_mode<synchronous>, transform_indices = @transform_7, window_bounds = array<i64: 27, 512>}, {transform_indices = @transform_8, window_bounds = array<i64: 1, 8, 512>}]} {
    %c0 = arith.constant 0 : index
    %c0_0 = arith.constant 0 : index
    %c0_1 = arith.constant 0 : index
    %0 = vector.load %arg1[%c0, %c0_0, %c0_1] : memref<1x8x512xf32, #tpu.memory_space<vmem>>, vector<1x8x512xf32>
    %1 = vector.shape_cast %0 : vector<1x8x512xf32> to vector<8x512xf32>
    %c73_i32 = arith.constant 73 : i32
    %2 = tpu.dynamic_rotate %1 by %c73_i32 dim 1 : vector<8x512xf32>, i32 -> vector<8x512xf32>
    %c0_2 = arith.constant 0 : index
    %c0_3 = arith.constant 0 : index
    %3 = vector.load %arg8[%c0_2, %c0_3] : memref<27x512xf32, #tpu.memory_space<vmem>>, vector<1x512xf32>
    %4 = vector.broadcast %3 : vector<1x512xf32> to vector<8x512xf32>
    %5 = arith.mulf %2, %4 : vector<8x512xf32>
    %c0_4 = arith.constant 0 : index
    %c0_5 = arith.constant 0 : index
    %6 = vector.load %arg10[%c0_4, %c0_5] : memref<216x512xf32, #tpu.memory_space<vmem>>, vector<8x512xf32>
    tpu.vector_store %arg10[%c0_4, %c0_5], %5 {strides = array<i32>} : memref<216x512xf32, #tpu.memory_space<vmem>>, vector<8x512xf32>,
    %c72_i32 = arith.constant 72 : i32
    %7 = tpu.dynamic_rotate %1 by %c72_i32 dim 1 : vector<8x512xf32>, i32 -> vector<8x512xf32>
    %c1 = arith.constant 1 : index
    %c0_6 = arith.constant 0 : index
    %8 = vector.load %arg8[%c1, %c0_6] : memref<27x512xf32, #tpu.memory_space<vmem>>, vector<1x512xf32>
    %9 = vector.broadcast %8 : vector<1x512xf32> to vector<8x512xf32>
    %10 = arith.mulf %7, %9 : vector<8x512xf32>
    %c8 = arith.constant 8 : index
    %c0_7 = arith.constant 0 : index
    %11 = vector.load %arg10[%c8, %c0_7] : memref<216x512xf32, #tpu.memory_space<vmem>>, vector<8x512xf32>
    tpu.vector_store %arg10[%c8, %c0_7], %10 {strides = array<i32>} : memref<216x512xf32, #tpu.memory_space<vmem>>, vector<8x512xf32>,
    %c71_i32 = arith.constant 71 : i32
    %12 = tpu.dynamic_rotate %1 by %c71_i32 dim 1 : vector<8x512xf32>, i32 -> vector<8x512xf32>
    %c2 = arith.constant 2 : index
    %c0_8 = arith.constant 0 : index
    %13 = vector.load %arg8[%c2, %c0_8] : memref<27x512xf32, #tpu.memory_space<vmem>>, vector<1x512xf32>
    %14 = vector.broadcast %13 : vector<1x512xf32> to vector<8x512xf32>
    %15 = arith.mulf %12, %14 : vector<8x512xf32>
    %c16 = arith.constant 16 : index
    %c0_9 = arith.constant 0 : index
    %16 = vector.load %arg10[%c16, %c0_9] : memref<216x512xf32, #tpu.memory_space<vmem>>, vector<8x512xf32>
    tpu.vector_store %arg10[%c16, %c0_9], %15 {strides = array<i32>} : memref<216x512xf32, #tpu.memory_space<vmem>>, vector<8x512xf32>,
    %c65_i32 = arith.constant 65 : i32
    %17 = tpu.dynamic_rotate %1 by %c65_i32 dim 1 : vector<8x512xf32>, i32 -> vector<8x512xf32>
    %c3 = arith.constant 3 : index
    %c0_10 = arith.constant 0 : index
    %18 = vector.load %arg8[%c3, %c0_10] : memref<27x512xf32, #tpu.memory_space<vmem>>, vector<1x512xf32>
    %19 = vector.broadcast %18 : vector<1x512xf32> to vector<8x512xf32>
    %20 = arith.mulf %17, %19 : vector<8x512xf32>
    %c24 = arith.constant 24 : index
    %c0_11 = arith.constant 0 : index
    %21 = vector.load %arg10[%c24, %c0_11] : memref<216x512xf32, #tpu.memory_space<vmem>>, vector<8x512xf32>
    tpu.vector_store %arg10[%c24, %c0_11], %20 {strides = array<i32>} : memref<216x512xf32, #tpu.memory_space<vmem>>, vector<8x512xf32>,
    %c64_i32 = arith.constant 64 : i32
    %22 = tpu.dynamic_rotate %1 by %c64_i32 dim 1 : vector<8x512xf32>, i32 -> vector<8x512xf32>
    %c4 = arith.constant 4 : index
    %c0_12 = arith.constant 0 : index
    %23 = vector.load %arg8[%c4, %c0_12] : memref<27x512xf32, #tpu.memory_space<vmem>>, vector<1x512xf32>
    %24 = vector.broadcast %23 : vector<1x512xf32> to vector<8x512xf32>
    %25 = arith.mulf %22, %24 : vector<8x512xf32>
    %c32 = arith.constant 32 : index
    %c0_13 = arith.constant 0 : index
    %26 = vector.load %arg10[%c32, %c0_13] : memref<216x512xf32, #tpu.memory_space<vmem>>, vector<8x512xf32>
    tpu.vector_store %arg10[%c32, %c0_13], %25 {strides = array<i32>} : memref<216x512xf32, #tpu.memory_space<vmem>>, vector<8x512xf32>,
    %c63_i32 = arith.constant 63 : i32
    %27 = tpu.dynamic_rotate %1 by %c63_i32 dim 1 : vector<8x512xf32>, i32 -> vector<8x512xf32>
    %c5 = arith.constant 5 : index
    %c0_14 = arith.constant 0 : index
    %28 = vector.load %arg8[%c5, %c0_14] : memref<27x512xf32, #tpu.memory_space<vmem>>, vector<1x512xf32>
    %29 = vector.broadcast %28 : vector<1x512xf32> to vector<8x512xf32>
    %30 = arith.mulf %27, %29 : vector<8x512xf32>
    %c40 = arith.constant 40 : index
    %c0_15 = arith.constant 0 : index
    %31 = vector.load %arg10[%c40, %c0_15] : memref<216x512xf32, #tpu.memory_space<vmem>>, vector<8x512xf32>
    tpu.vector_store %arg10[%c40, %c0_15], %30 {strides = array<i32>} : memref<216x512xf32, #tpu.memory_space<vmem>>, vector<8x512xf32>,
    %c57_i32 = arith.constant 57 : i32
    %32 = tpu.dynamic_rotate %1 by %c57_i32 dim 1 : vector<8x512xf32>, i32 -> vector<8x512xf32>
    %c6 = arith.constant 6 : index
    %c0_16 = arith.constant 0 : index
    %33 = vector.load %arg8[%c6, %c0_16] : memref<27x512xf32, #tpu.memory_space<vmem>>, vector<1x512xf32>
    %34 = vector.broadcast %33 : vector<1x512xf32> to vector<8x512xf32>
    %35 = arith.mulf %32, %34 : vector<8x512xf32>
    %c48 = arith.constant 48 : index
    %c0_17 = arith.constant 0 : index
    %36 = vector.load %arg10[%c48, %c0_17] : memref<216x512xf32, #tpu.memory_space<vmem>>, vector<8x512xf32>
    tpu.vector_store %arg10[%c48, %c0_17], %35 {strides = array<i32>} : memref<216x512xf32, #tpu.memory_space<vmem>>, vector<8x512xf32>,
    %c56_i32 = arith.constant 56 : i32
    %37 = tpu.dynamic_rotate %1 by %c56_i32 dim 1 : vector<8x512xf32>, i32 -> vector<8x512xf32>
    %c7 = arith.constant 7 : index
    %c0_18 = arith.constant 0 : index
    %38 = vector.load %arg8[%c7, %c0_18] : memref<27x512xf32, #tpu.memory_space<vmem>>, vector<1x512xf32>
    %39 = vector.broadcast %38 : vector<1x512xf32> to vector<8x512xf32>
    %40 = arith.mulf %37, %39 : vector<8x512xf32>
    %c56 = arith.constant 56 : index
    %c0_19 = arith.constant 0 : index
    %41 = vector.load %arg10[%c56, %c0_19] : memref<216x512xf32, #tpu.memory_space<vmem>>, vector<8x512xf32>
    tpu.vector_store %arg10[%c56, %c0_19], %40 {strides = array<i32>} : memref<216x512xf32, #tpu.memory_space<vmem>>, vector<8x512xf32>,
    %c55_i32 = arith.constant 55 : i32
    %42 = tpu.dynamic_rotate %1 by %c55_i32 dim 1 : vector<8x512xf32>, i32 -> vector<8x512xf32>
    %c8_20 = arith.constant 8 : index
    %c0_21 = arith.constant 0 : index
    %43 = vector.load %arg8[%c8_20, %c0_21] : memref<27x512xf32, #tpu.memory_space<vmem>>, vector<1x512xf32>
    %44 = vector.broadcast %43 : vector<1x512xf32> to vector<8x512xf32>
    %45 = arith.mulf %42, %44 : vector<8x512xf32>
    %c64 = arith.constant 64 : index
    %c0_22 = arith.constant 0 : index
    %46 = vector.load %arg10[%c64, %c0_22] : memref<216x512xf32, #tpu.memory_space<vmem>>, vector<8x512xf32>
    tpu.vector_store %arg10[%c64, %c0_22], %45 {strides = array<i32>} : memref<216x512xf32, #tpu.memory_space<vmem>>, vector<8x512xf32>,
    %c9_i32 = arith.constant 9 : i32
    %47 = tpu.dynamic_rotate %1 by %c9_i32 dim 1 : vector<8x512xf32>, i32 -> vector<8x512xf32>
    %c9 = arith.constant 9 : index
    %c0_23 = arith.constant 0 : index
    %48 = vector.load %arg8[%c9, %c0_23] : memref<27x512xf32, #tpu.memory_space<vmem>>, vector<1x512xf32>
    %49 = vector.broadcast %48 : vector<1x512xf32> to vector<8x512xf32>
    %50 = arith.mulf %47, %49 : vector<8x512xf32>
    %c72 = arith.constant 72 : index
    %c0_24 = arith.constant 0 : index
    %51 = vector.load %arg10[%c72, %c0_24] : memref<216x512xf32, #tpu.memory_space<vmem>>, vector<8x512xf32>
    tpu.vector_store %arg10[%c72, %c0_24], %50 {strides = array<i32>} : memref<216x512xf32, #tpu.memory_space<vmem>>, vector<8x512xf32>,
    %c8_i32 = arith.constant 8 : i32
    %52 = tpu.dynamic_rotate %1 by %c8_i32 dim 1 : vector<8x512xf32>, i32 -> vector<8x512xf32>
    %c10 = arith.constant 10 : index
    %c0_25 = arith.constant 0 : index
    %53 = vector.load %arg8[%c10, %c0_25] : memref<27x512xf32, #tpu.memory_space<vmem>>, vector<1x512xf32>
    %54 = vector.broadcast %53 : vector<1x512xf32> to vector<8x512xf32>
    %55 = arith.mulf %52, %54 : vector<8x512xf32>
    %c80 = arith.constant 80 : index
    %c0_26 = arith.constant 0 : index
    %56 = vector.load %arg10[%c80, %c0_26] : memref<216x512xf32, #tpu.memory_space<vmem>>, vector<8x512xf32>
    tpu.vector_store %arg10[%c80, %c0_26], %55 {strides = array<i32>} : memref<216x512xf32, #tpu.memory_space<vmem>>, vector<8x512xf32>,
    %c7_i32 = arith.constant 7 : i32
    %57 = tpu.dynamic_rotate %1 by %c7_i32 dim 1 : vector<8x512xf32>, i32 -> vector<8x512xf32>
    %c11 = arith.constant 11 : index
    %c0_27 = arith.constant 0 : index
    %58 = vector.load %arg8[%c11, %c0_27] : memref<27x512xf32, #tpu.memory_space<vmem>>, vector<1x512xf32>
    %59 = vector.broadcast %58 : vector<1x512xf32> to vector<8x512xf32>
    %60 = arith.mulf %57, %59 : vector<8x512xf32>
    %c88 = arith.constant 88 : index
    %c0_28 = arith.constant 0 : index
    %61 = vector.load %arg10[%c88, %c0_28] : memref<216x512xf32, #tpu.memory_space<vmem>>, vector<8x512xf32>
    tpu.vector_store %arg10[%c88, %c0_28], %60 {strides = array<i32>} : memref<216x512xf32, #tpu.memory_space<vmem>>, vector<8x512xf32>,
    %c1_i32 = arith.constant 1 : i32
    %62 = tpu.dynamic_rotate %1 by %c1_i32 dim 1 : vector<8x512xf32>, i32 -> vector<8x512xf32>
    %c12 = arith.constant 12 : index
    %c0_29 = arith.constant 0 : index
    %63 = vector.load %arg8[%c12, %c0_29] : memref<27x512xf32, #tpu.memory_space<vmem>>, vector<1x512xf32>
    %64 = vector.broadcast %63 : vector<1x512xf32> to vector<8x512xf32>
    %65 = arith.mulf %62, %64 : vector<8x512xf32>
    %c96 = arith.constant 96 : index
    %c0_30 = arith.constant 0 : index
    %66 = vector.load %arg10[%c96, %c0_30] : memref<216x512xf32, #tpu.memory_space<vmem>>, vector<8x512xf32>
    tpu.vector_store %arg10[%c96, %c0_30], %65 {strides = array<i32>} : memref<216x512xf32, #tpu.memory_space<vmem>>, vector<8x512xf32>,
    %c104 = arith.constant 104 : index
    %c0_31 = arith.constant 0 : index
    %67 = vector.load %arg10[%c104, %c0_31] : memref<216x512xf32, #tpu.memory_space<vmem>>, vector<8x512xf32>
    tpu.vector_store %arg10[%c104, %c0_31], %1 {strides = array<i32>} : memref<216x512xf32, #tpu.memory_space<vmem>>, vector<8x512xf32>,
    %c511_i32 = arith.constant 511 : i32
    %68 = tpu.dynamic_rotate %1 by %c511_i32 dim 1 : vector<8x512xf32>, i32 -> vector<8x512xf32>
    %c14 = arith.constant 14 : index
    %c0_32 = arith.constant 0 : index
    %69 = vector.load %arg8[%c14, %c0_32] : memref<27x512xf32, #tpu.memory_space<vmem>>, vector<1x512xf32>
    %70 = vector.broadcast %69 : vector<1x512xf32> to vector<8x512xf32>
    %71 = arith.mulf %68, %70 : vector<8x512xf32>
    %c112 = arith.constant 112 : index
    %c0_33 = arith.constant 0 : index
    %72 = vector.load %arg10[%c112, %c0_33] : memref<216x512xf32, #tpu.memory_space<vmem>>, vector<8x512xf32>
    tpu.vector_store %arg10[%c112, %c0_33], %71 {strides = array<i32>} : memref<216x512xf32, #tpu.memory_space<vmem>>, vector<8x512xf32>,
    %c505_i32 = arith.constant 505 : i32
    %73 = tpu.dynamic_rotate %1 by %c505_i32 dim 1 : vector<8x512xf32>, i32 -> vector<8x512xf32>
    %c15 = arith.constant 15 : index
    %c0_34 = arith.constant 0 : index
    %74 = vector.load %arg8[%c15, %c0_34] : memref<27x512xf32, #tpu.memory_space<vmem>>, vector<1x512xf32>
    %75 = vector.broadcast %74 : vector<1x512xf32> to vector<8x512xf32>
    %76 = arith.mulf %73, %75 : vector<8x512xf32>
    %c120 = arith.constant 120 : index
    %c0_35 = arith.constant 0 : index
    %77 = vector.load %arg10[%c120, %c0_35] : memref<216x512xf32, #tpu.memory_space<vmem>>, vector<8x512xf32>
    tpu.vector_store %arg10[%c120, %c0_35], %76 {strides = array<i32>} : memref<216x512xf32, #tpu.memory_space<vmem>>, vector<8x512xf32>,
    %c504_i32 = arith.constant 504 : i32
    %78 = tpu.dynamic_rotate %1 by %c504_i32 dim 1 : vector<8x512xf32>, i32 -> vector<8x512xf32>
    %c16_36 = arith.constant 16 : index
    %c0_37 = arith.constant 0 : index
    %79 = vector.load %arg8[%c16_36, %c0_37] : memref<27x512xf32, #tpu.memory_space<vmem>>, vector<1x512xf32>
    %80 = vector.broadcast %79 : vector<1x512xf32> to vector<8x512xf32>
    %81 = arith.mulf %78, %80 : vector<8x512xf32>
    %c128 = arith.constant 128 : index
    %c0_38 = arith.constant 0 : index
    %82 = vector.load %arg10[%c128, %c0_38] : memref<216x512xf32, #tpu.memory_space<vmem>>, vector<8x512xf32>
    tpu.vector_store %arg10[%c128, %c0_38], %81 {strides = array<i32>} : memref<216x512xf32, #tpu.memory_space<vmem>>, vector<8x512xf32>,
    %c503_i32 = arith.constant 503 : i32
    %83 = tpu.dynamic_rotate %1 by %c503_i32 dim 1 : vector<8x512xf32>, i32 -> vector<8x512xf32>
    %c17 = arith.constant 17 : index
    %c0_39 = arith.constant 0 : index
    %84 = vector.load %arg8[%c17, %c0_39] : memref<27x512xf32, #tpu.memory_space<vmem>>, vector<1x512xf32>
    %85 = vector.broadcast %84 : vector<1x512xf32> to vector<8x512xf32>
    %86 = arith.mulf %83, %85 : vector<8x512xf32>
    %c136 = arith.constant 136 : index
    %c0_40 = arith.constant 0 : index
    %87 = vector.load %arg10[%c136, %c0_40] : memref<216x512xf32, #tpu.memory_space<vmem>>, vector<8x512xf32>
    tpu.vector_store %arg10[%c136, %c0_40], %86 {strides = array<i32>} : memref<216x512xf32, #tpu.memory_space<vmem>>, vector<8x512xf32>,
    %c457_i32 = arith.constant 457 : i32
    %88 = tpu.dynamic_rotate %1 by %c457_i32 dim 1 : vector<8x512xf32>, i32 -> vector<8x512xf32>
    %c18 = arith.constant 18 : index
    %c0_41 = arith.constant 0 : index
    %89 = vector.load %arg8[%c18, %c0_41] : memref<27x512xf32, #tpu.memory_space<vmem>>, vector<1x512xf32>
    %90 = vector.broadcast %89 : vector<1x512xf32> to vector<8x512xf32>
    %91 = arith.mulf %88, %90 : vector<8x512xf32>
    %c144 = arith.constant 144 : index
    %c0_42 = arith.constant 0 : index
    %92 = vector.load %arg10[%c144, %c0_42] : memref<216x512xf32, #tpu.memory_space<vmem>>, vector<8x512xf32>
    tpu.vector_store %arg10[%c144, %c0_42], %91 {strides = array<i32>} : memref<216x512xf32, #tpu.memory_space<vmem>>, vector<8x512xf32>,
    %c456_i32 = arith.constant 456 : i32
    %93 = tpu.dynamic_rotate %1 by %c456_i32 dim 1 : vector<8x512xf32>, i32 -> vector<8x512xf32>
    %c19 = arith.constant 19 : index
    %c0_43 = arith.constant 0 : index
    %94 = vector.load %arg8[%c19, %c0_43] : memref<27x512xf32, #tpu.memory_space<vmem>>, vector<1x512xf32>
    %95 = vector.broadcast %94 : vector<1x512xf32> to vector<8x512xf32>
    %96 = arith.mulf %93, %95 : vector<8x512xf32>
    %c152 = arith.constant 152 : index
    %c0_44 = arith.constant 0 : index
    %97 = vector.load %arg10[%c152, %c0_44] : memref<216x512xf32, #tpu.memory_space<vmem>>, vector<8x512xf32>
    tpu.vector_store %arg10[%c152, %c0_44], %96 {strides = array<i32>} : memref<216x512xf32, #tpu.memory_space<vmem>>, vector<8x512xf32>,
    %c455_i32 = arith.constant 455 : i32
    %98 = tpu.dynamic_rotate %1 by %c455_i32 dim 1 : vector<8x512xf32>, i32 -> vector<8x512xf32>
    %c20 = arith.constant 20 : index
    %c0_45 = arith.constant 0 : index
    %99 = vector.load %arg8[%c20, %c0_45] : memref<27x512xf32, #tpu.memory_space<vmem>>, vector<1x512xf32>
    %100 = vector.broadcast %99 : vector<1x512xf32> to vector<8x512xf32>
    %101 = arith.mulf %98, %100 : vector<8x512xf32>
    %c160 = arith.constant 160 : index
    %c0_46 = arith.constant 0 : index
    %102 = vector.load %arg10[%c160, %c0_46] : memref<216x512xf32, #tpu.memory_space<vmem>>, vector<8x512xf32>
    tpu.vector_store %arg10[%c160, %c0_46], %101 {strides = array<i32>} : memref<216x512xf32, #tpu.memory_space<vmem>>, vector<8x512xf32>,
    %c449_i32 = arith.constant 449 : i32
    %103 = tpu.dynamic_rotate %1 by %c449_i32 dim 1 : vector<8x512xf32>, i32 -> vector<8x512xf32>
    %c21 = arith.constant 21 : index
    %c0_47 = arith.constant 0 : index
    %104 = vector.load %arg8[%c21, %c0_47] : memref<27x512xf32, #tpu.memory_space<vmem>>, vector<1x512xf32>
    %105 = vector.broadcast %104 : vector<1x512xf32> to vector<8x512xf32>
    %106 = arith.mulf %103, %105 : vector<8x512xf32>
    %c168 = arith.constant 168 : index
    %c0_48 = arith.constant 0 : index
    %107 = vector.load %arg10[%c168, %c0_48] : memref<216x512xf32, #tpu.memory_space<vmem>>, vector<8x512xf32>
    tpu.vector_store %arg10[%c168, %c0_48], %106 {strides = array<i32>} : memref<216x512xf32, #tpu.memory_space<vmem>>, vector<8x512xf32>,
    %c448_i32 = arith.constant 448 : i32
    %108 = tpu.dynamic_rotate %1 by %c448_i32 dim 1 : vector<8x512xf32>, i32 -> vector<8x512xf32>
    %c22 = arith.constant 22 : index
    %c0_49 = arith.constant 0 : index
    %109 = vector.load %arg8[%c22, %c0_49] : memref<27x512xf32, #tpu.memory_space<vmem>>, vector<1x512xf32>
    %110 = vector.broadcast %109 : vector<1x512xf32> to vector<8x512xf32>
    %111 = arith.mulf %108, %110 : vector<8x512xf32>
    %c176 = arith.constant 176 : index
    %c0_50 = arith.constant 0 : index
    %112 = vector.load %arg10[%c176, %c0_50] : memref<216x512xf32, #tpu.memory_space<vmem>>, vector<8x512xf32>
    tpu.vector_store %arg10[%c176, %c0_50], %111 {strides = array<i32>} : memref<216x512xf32, #tpu.memory_space<vmem>>, vector<8x512xf32>,
    %c447_i32 = arith.constant 447 : i32
    %113 = tpu.dynamic_rotate %1 by %c447_i32 dim 1 : vector<8x512xf32>, i32 -> vector<8x512xf32>
    %c23 = arith.constant 23 : index
    %c0_51 = arith.constant 0 : index
    %114 = vector.load %arg8[%c23, %c0_51] : memref<27x512xf32, #tpu.memory_space<vmem>>, vector<1x512xf32>
    %115 = vector.broadcast %114 : vector<1x512xf32> to vector<8x512xf32>
    %116 = arith.mulf %113, %115 : vector<8x512xf32>
    %c184 = arith.constant 184 : index
    %c0_52 = arith.constant 0 : index
    %117 = vector.load %arg10[%c184, %c0_52] : memref<216x512xf32, #tpu.memory_space<vmem>>, vector<8x512xf32>
    tpu.vector_store %arg10[%c184, %c0_52], %116 {strides = array<i32>} : memref<216x512xf32, #tpu.memory_space<vmem>>, vector<8x512xf32>,
    %c441_i32 = arith.constant 441 : i32
    %118 = tpu.dynamic_rotate %1 by %c441_i32 dim 1 : vector<8x512xf32>, i32 -> vector<8x512xf32>
    %c24_53 = arith.constant 24 : index
    %c0_54 = arith.constant 0 : index
    %119 = vector.load %arg8[%c24_53, %c0_54] : memref<27x512xf32, #tpu.memory_space<vmem>>, vector<1x512xf32>
    %120 = vector.broadcast %119 : vector<1x512xf32> to vector<8x512xf32>
    %121 = arith.mulf %118, %120 : vector<8x512xf32>
    %c192 = arith.constant 192 : index
    %c0_55 = arith.constant 0 : index
    %122 = vector.load %arg10[%c192, %c0_55] : memref<216x512xf32, #tpu.memory_space<vmem>>, vector<8x512xf32>
    tpu.vector_store %arg10[%c192, %c0_55], %121 {strides = array<i32>} : memref<216x512xf32, #tpu.memory_space<vmem>>, vector<8x512xf32>,
    %c440_i32 = arith.constant 440 : i32
    %123 = tpu.dynamic_rotate %1 by %c440_i32 dim 1 : vector<8x512xf32>, i32 -> vector<8x512xf32>
    %c25 = arith.constant 25 : index
    %c0_56 = arith.constant 0 : index
    %124 = vector.load %arg8[%c25, %c0_56] : memref<27x512xf32, #tpu.memory_space<vmem>>, vector<1x512xf32>
    %125 = vector.broadcast %124 : vector<1x512xf32> to vector<8x512xf32>
    %126 = arith.mulf %123, %125 : vector<8x512xf32>
    %c200 = arith.constant 200 : index
    %c0_57 = arith.constant 0 : index
    %127 = vector.load %arg10[%c200, %c0_57] : memref<216x512xf32, #tpu.memory_space<vmem>>, vector<8x512xf32>
    tpu.vector_store %arg10[%c200, %c0_57], %126 {strides = array<i32>} : memref<216x512xf32, #tpu.memory_space<vmem>>, vector<8x512xf32>,
    %c439_i32 = arith.constant 439 : i32
    %128 = tpu.dynamic_rotate %1 by %c439_i32 dim 1 : vector<8x512xf32>, i32 -> vector<8x512xf32>
    %c26 = arith.constant 26 : index
    %c0_58 = arith.constant 0 : index
    %129 = vector.load %arg8[%c26, %c0_58] : memref<27x512xf32, #tpu.memory_space<vmem>>, vector<1x512xf32>
    %130 = vector.broadcast %129 : vector<1x512xf32> to vector<8x512xf32>
    %131 = arith.mulf %128, %130 : vector<8x512xf32>
    %c208 = arith.constant 208 : index
    %c0_59 = arith.constant 0 : index
    %132 = vector.load %arg10[%c208, %c0_59] : memref<216x512xf32, #tpu.memory_space<vmem>>, vector<8x512xf32>
    tpu.vector_store %arg10[%c208, %c0_59], %131 {strides = array<i32>} : memref<216x512xf32, #tpu.memory_space<vmem>>, vector<8x512xf32>,
    %c0_60 = arith.constant 0 : index
    %c0_61 = arith.constant 0 : index
    %133 = vector.load %arg2[%c0_60, %c0_61] : memref<8x216xf32, #tpu.memory_space<vmem>>, vector<8x216xf32>
    %c0_62 = arith.constant 0 : index
    %c0_63 = arith.constant 0 : index
    %134 = vector.load %arg10[%c0_62, %c0_63] : memref<216x512xf32, #tpu.memory_space<vmem>>, vector<216x512xf32>
    %cst = arith.constant dense<0.000000e+00> : vector<8x512xf32>
    %135 = tpu.matmul %133, %134, %cst {dimension_numbers = #tpu.dot_dimension_numbers<[1], [0], [0], [1], [0, 0, 1, 1], [], []>} : vector<8x216xf32>, vector<216x512xf32>, vector<8x512xf32> -> vector<8x512xf32>
    %136 = vector.shape_cast %135 : vector<8x512xf32> to vector<1x8x512xf32>
    %cst_64 = arith.constant dense<0.000000e+00> : vector<1xf32>
    %137 = vector.multi_reduction <add>, %136, %cst_64 [1, 2] : vector<1x8x512xf32> to vector<1xf32>
    %138 = vector.shape_cast %137 : vector<1xf32> to vector<1x1x1xf32>
    %139 = vector.extract %138[0, 0, 0] : f32 from vector<1x1x1xf32>
    %140 = arith.mulf %135, %135 : vector<8x512xf32>
    %141 = vector.shape_cast %140 : vector<8x512xf32> to vector<1x8x512xf32>
    %cst_65 = arith.constant dense<0.000000e+00> : vector<1xf32>
    %142 = vector.multi_reduction <add>, %141, %cst_65 [1, 2] : vector<1x8x512xf32> to vector<1xf32>
    %143 = vector.shape_cast %142 : vector<1xf32> to vector<1x1x1xf32>
    %144 = vector.extract %143[0, 0, 0] : f32 from vector<1x1x1xf32>
    %cst_66 = arith.constant 2.048000e+03 : f32
    %145 = arith.divf %139, %cst_66 : f32
    %cst_67 = arith.constant 2.048000e+03 : f32
    %146 = arith.divf %144, %cst_67 : f32
    %147 = arith.mulf %145, %145 : f32
    %148 = arith.subf %146, %147 : f32
    %cst_68 = arith.constant 0.000000e+00 : f32
    %149 = arith.maximumf %148, %cst_68 : f32
    %cst_69 = arith.constant 9.99999974E-6 : f32
    %150 = arith.addf %149, %cst_69 : f32
    %151 = math.rsqrt %150 : f32
    %152 = vector.broadcast %145 : f32 to vector<8x512xf32>
    %153 = arith.subf %135, %152 : vector<8x512xf32>
    %c0_70 = arith.constant 0 : index
    %c0_71 = arith.constant 0 : index
    %154 = vector.load %arg4[%c0_70, %c0_71] : memref<8x1xf32, #tpu.memory_space<vmem>>, vector<8x1xf32>
    %155 = vector.broadcast %151 : f32 to vector<8x1xf32>
    %156 = arith.mulf %155, %154 : vector<8x1xf32>
    %157 = vector.broadcast %156 : vector<8x1xf32> to vector<8x512xf32>
    %158 = arith.mulf %153, %157 : vector<8x512xf32>
    %c0_72 = arith.constant 0 : index
    %c0_73 = arith.constant 0 : index
    %159 = vector.load %arg5[%c0_72, %c0_73] : memref<8x1xf32, #tpu.memory_space<vmem>>, vector<8x1xf32>
    %160 = vector.broadcast %159 : vector<8x1xf32> to vector<8x512xf32>
    %161 = arith.addf %158, %160 : vector<8x512xf32>
    %cst_74 = arith.constant 0.000000e+00 : f32
    %162 = vector.broadcast %cst_74 : f32 to vector<8x512xf32>
    %163 = arith.cmpf oge, %161, %162 : vector<8x512xf32>
    %cst_75 = arith.constant 1.000000e-01 : f32
    %164 = vector.broadcast %cst_75 : f32 to vector<8x512xf32>
    %165 = arith.mulf %164, %161 : vector<8x512xf32>
    %166 = arith.select %163, %161, %165 : vector<8x512xi1>, vector<8x512xf32>
    %c73_i32_76 = arith.constant 73 : i32
    %167 = tpu.dynamic_rotate %166 by %c73_i32_76 dim 1 : vector<8x512xf32>, i32 -> vector<8x512xf32>
    %c0_77 = arith.constant 0 : index
    %c0_78 = arith.constant 0 : index
    %168 = vector.load %arg8[%c0_77, %c0_78] : memref<27x512xf32, #tpu.memory_space<vmem>>, vector<1x512xf32>
    %169 = vector.broadcast %168 : vector<1x512xf32> to vector<8x512xf32>
    %170 = arith.mulf %167, %169 : vector<8x512xf32>
    %c0_79 = arith.constant 0 : index
    %c0_80 = arith.constant 0 : index
    %171 = vector.load %arg10[%c0_79, %c0_80] : memref<216x512xf32, #tpu.memory_space<vmem>>, vector<8x512xf32>
    tpu.vector_store %arg10[%c0_79, %c0_80], %170 {strides = array<i32>} : memref<216x512xf32, #tpu.memory_space<vmem>>, vector<8x512xf32>,
    %c72_i32_81 = arith.constant 72 : i32
    %172 = tpu.dynamic_rotate %166 by %c72_i32_81 dim 1 : vector<8x512xf32>, i32 -> vector<8x512xf32>
    %c1_82 = arith.constant 1 : index
    %c0_83 = arith.constant 0 : index
    %173 = vector.load %arg8[%c1_82, %c0_83] : memref<27x512xf32, #tpu.memory_space<vmem>>, vector<1x512xf32>
    %174 = vector.broadcast %173 : vector<1x512xf32> to vector<8x512xf32>
    %175 = arith.mulf %172, %174 : vector<8x512xf32>
    %c8_84 = arith.constant 8 : index
    %c0_85 = arith.constant 0 : index
    %176 = vector.load %arg10[%c8_84, %c0_85] : memref<216x512xf32, #tpu.memory_space<vmem>>, vector<8x512xf32>
    tpu.vector_store %arg10[%c8_84, %c0_85], %175 {strides = array<i32>} : memref<216x512xf32, #tpu.memory_space<vmem>>, vector<8x512xf32>,
    %c71_i32_86 = arith.constant 71 : i32
    %177 = tpu.dynamic_rotate %166 by %c71_i32_86 dim 1 : vector<8x512xf32>, i32 -> vector<8x512xf32>
    %c2_87 = arith.constant 2 : index
    %c0_88 = arith.constant 0 : index
    %178 = vector.load %arg8[%c2_87, %c0_88] : memref<27x512xf32, #tpu.memory_space<vmem>>, vector<1x512xf32>
    %179 = vector.broadcast %178 : vector<1x512xf32> to vector<8x512xf32>
    %180 = arith.mulf %177, %179 : vector<8x512xf32>
    %c16_89 = arith.constant 16 : index
    %c0_90 = arith.constant 0 : index
    %181 = vector.load %arg10[%c16_89, %c0_90] : memref<216x512xf32, #tpu.memory_space<vmem>>, vector<8x512xf32>
    tpu.vector_store %arg10[%c16_89, %c0_90], %180 {strides = array<i32>} : memref<216x512xf32, #tpu.memory_space<vmem>>, vector<8x512xf32>,
    %c65_i32_91 = arith.constant 65 : i32
    %182 = tpu.dynamic_rotate %166 by %c65_i32_91 dim 1 : vector<8x512xf32>, i32 -> vector<8x512xf32>
    %c3_92 = arith.constant 3 : index
    %c0_93 = arith.constant 0 : index
    %183 = vector.load %arg8[%c3_92, %c0_93] : memref<27x512xf32, #tpu.memory_space<vmem>>, vector<1x512xf32>
    %184 = vector.broadcast %183 : vector<1x512xf32> to vector<8x512xf32>
    %185 = arith.mulf %182, %184 : vector<8x512xf32>
    %c24_94 = arith.constant 24 : index
    %c0_95 = arith.constant 0 : index
    %186 = vector.load %arg10[%c24_94, %c0_95] : memref<216x512xf32, #tpu.memory_space<vmem>>, vector<8x512xf32>
    tpu.vector_store %arg10[%c24_94, %c0_95], %185 {strides = array<i32>} : memref<216x512xf32, #tpu.memory_space<vmem>>, vector<8x512xf32>,
    %c64_i32_96 = arith.constant 64 : i32
    %187 = tpu.dynamic_rotate %166 by %c64_i32_96 dim 1 : vector<8x512xf32>, i32 -> vector<8x512xf32>
    %c4_97 = arith.constant 4 : index
    %c0_98 = arith.constant 0 : index
    %188 = vector.load %arg8[%c4_97, %c0_98] : memref<27x512xf32, #tpu.memory_space<vmem>>, vector<1x512xf32>
    %189 = vector.broadcast %188 : vector<1x512xf32> to vector<8x512xf32>
    %190 = arith.mulf %187, %189 : vector<8x512xf32>
    %c32_99 = arith.constant 32 : index
    %c0_100 = arith.constant 0 : index
    %191 = vector.load %arg10[%c32_99, %c0_100] : memref<216x512xf32, #tpu.memory_space<vmem>>, vector<8x512xf32>
    tpu.vector_store %arg10[%c32_99, %c0_100], %190 {strides = array<i32>} : memref<216x512xf32, #tpu.memory_space<vmem>>, vector<8x512xf32>,
    %c63_i32_101 = arith.constant 63 : i32
    %192 = tpu.dynamic_rotate %166 by %c63_i32_101 dim 1 : vector<8x512xf32>, i32 -> vector<8x512xf32>
    %c5_102 = arith.constant 5 : index
    %c0_103 = arith.constant 0 : index
    %193 = vector.load %arg8[%c5_102, %c0_103] : memref<27x512xf32, #tpu.memory_space<vmem>>, vector<1x512xf32>
    %194 = vector.broadcast %193 : vector<1x512xf32> to vector<8x512xf32>
    %195 = arith.mulf %192, %194 : vector<8x512xf32>
    %c40_104 = arith.constant 40 : index
    %c0_105 = arith.constant 0 : index
    %196 = vector.load %arg10[%c40_104, %c0_105] : memref<216x512xf32, #tpu.memory_space<vmem>>, vector<8x512xf32>
    tpu.vector_store %arg10[%c40_104, %c0_105], %195 {strides = array<i32>} : memref<216x512xf32, #tpu.memory_space<vmem>>, vector<8x512xf32>,
    %c57_i32_106 = arith.constant 57 : i32
    %197 = tpu.dynamic_rotate %166 by %c57_i32_106 dim 1 : vector<8x512xf32>, i32 -> vector<8x512xf32>
    %c6_107 = arith.constant 6 : index
    %c0_108 = arith.constant 0 : index
    %198 = vector.load %arg8[%c6_107, %c0_108] : memref<27x512xf32, #tpu.memory_space<vmem>>, vector<1x512xf32>
    %199 = vector.broadcast %198 : vector<1x512xf32> to vector<8x512xf32>
    %200 = arith.mulf %197, %199 : vector<8x512xf32>
    %c48_109 = arith.constant 48 : index
    %c0_110 = arith.constant 0 : index
    %201 = vector.load %arg10[%c48_109, %c0_110] : memref<216x512xf32, #tpu.memory_space<vmem>>, vector<8x512xf32>
    tpu.vector_store %arg10[%c48_109, %c0_110], %200 {strides = array<i32>} : memref<216x512xf32, #tpu.memory_space<vmem>>, vector<8x512xf32>,
    %c56_i32_111 = arith.constant 56 : i32
    %202 = tpu.dynamic_rotate %166 by %c56_i32_111 dim 1 : vector<8x512xf32>, i32 -> vector<8x512xf32>
    %c7_112 = arith.constant 7 : index
    %c0_113 = arith.constant 0 : index
    %203 = vector.load %arg8[%c7_112, %c0_113] : memref<27x512xf32, #tpu.memory_space<vmem>>, vector<1x512xf32>
    %204 = vector.broadcast %203 : vector<1x512xf32> to vector<8x512xf32>
    %205 = arith.mulf %202, %204 : vector<8x512xf32>
    %c56_114 = arith.constant 56 : index
    %c0_115 = arith.constant 0 : index
    %206 = vector.load %arg10[%c56_114, %c0_115] : memref<216x512xf32, #tpu.memory_space<vmem>>, vector<8x512xf32>
    tpu.vector_store %arg10[%c56_114, %c0_115], %205 {strides = array<i32>} : memref<216x512xf32, #tpu.memory_space<vmem>>, vector<8x512xf32>,
    %c55_i32_116 = arith.constant 55 : i32
    %207 = tpu.dynamic_rotate %166 by %c55_i32_116 dim 1 : vector<8x512xf32>, i32 -> vector<8x512xf32>
    %c8_117 = arith.constant 8 : index
    %c0_118 = arith.constant 0 : index
    %208 = vector.load %arg8[%c8_117, %c0_118] : memref<27x512xf32, #tpu.memory_space<vmem>>, vector<1x512xf32>
    %209 = vector.broadcast %208 : vector<1x512xf32> to vector<8x512xf32>
    %210 = arith.mulf %207, %209 : vector<8x512xf32>
    %c64_119 = arith.constant 64 : index
    %c0_120 = arith.constant 0 : index
    %211 = vector.load %arg10[%c64_119, %c0_120] : memref<216x512xf32, #tpu.memory_space<vmem>>, vector<8x512xf32>
    tpu.vector_store %arg10[%c64_119, %c0_120], %210 {strides = array<i32>} : memref<216x512xf32, #tpu.memory_space<vmem>>, vector<8x512xf32>,
    %c9_i32_121 = arith.constant 9 : i32
    %212 = tpu.dynamic_rotate %166 by %c9_i32_121 dim 1 : vector<8x512xf32>, i32 -> vector<8x512xf32>
    %c9_122 = arith.constant 9 : index
    %c0_123 = arith.constant 0 : index
    %213 = vector.load %arg8[%c9_122, %c0_123] : memref<27x512xf32, #tpu.memory_space<vmem>>, vector<1x512xf32>
    %214 = vector.broadcast %213 : vector<1x512xf32> to vector<8x512xf32>
    %215 = arith.mulf %212, %214 : vector<8x512xf32>
    %c72_124 = arith.constant 72 : index
    %c0_125 = arith.constant 0 : index
    %216 = vector.load %arg10[%c72_124, %c0_125] : memref<216x512xf32, #tpu.memory_space<vmem>>, vector<8x512xf32>
    tpu.vector_store %arg10[%c72_124, %c0_125], %215 {strides = array<i32>} : memref<216x512xf32, #tpu.memory_space<vmem>>, vector<8x512xf32>,
    %c8_i32_126 = arith.constant 8 : i32
    %217 = tpu.dynamic_rotate %166 by %c8_i32_126 dim 1 : vector<8x512xf32>, i32 -> vector<8x512xf32>
    %c10_127 = arith.constant 10 : index
    %c0_128 = arith.constant 0 : index
    %218 = vector.load %arg8[%c10_127, %c0_128] : memref<27x512xf32, #tpu.memory_space<vmem>>, vector<1x512xf32>
    %219 = vector.broadcast %218 : vector<1x512xf32> to vector<8x512xf32>
    %220 = arith.mulf %217, %219 : vector<8x512xf32>
    %c80_129 = arith.constant 80 : index
    %c0_130 = arith.constant 0 : index
    %221 = vector.load %arg10[%c80_129, %c0_130] : memref<216x512xf32, #tpu.memory_space<vmem>>, vector<8x512xf32>
    tpu.vector_store %arg10[%c80_129, %c0_130], %220 {strides = array<i32>} : memref<216x512xf32, #tpu.memory_space<vmem>>, vector<8x512xf32>,
    %c7_i32_131 = arith.constant 7 : i32
    %222 = tpu.dynamic_rotate %166 by %c7_i32_131 dim 1 : vector<8x512xf32>, i32 -> vector<8x512xf32>
    %c11_132 = arith.constant 11 : index
    %c0_133 = arith.constant 0 : index
    %223 = vector.load %arg8[%c11_132, %c0_133] : memref<27x512xf32, #tpu.memory_space<vmem>>, vector<1x512xf32>
    %224 = vector.broadcast %223 : vector<1x512xf32> to vector<8x512xf32>
    %225 = arith.mulf %222, %224 : vector<8x512xf32>
    %c88_134 = arith.constant 88 : index
    %c0_135 = arith.constant 0 : index
    %226 = vector.load %arg10[%c88_134, %c0_135] : memref<216x512xf32, #tpu.memory_space<vmem>>, vector<8x512xf32>
    tpu.vector_store %arg10[%c88_134, %c0_135], %225 {strides = array<i32>} : memref<216x512xf32, #tpu.memory_space<vmem>>, vector<8x512xf32>,
    %c1_i32_136 = arith.constant 1 : i32
    %227 = tpu.dynamic_rotate %166 by %c1_i32_136 dim 1 : vector<8x512xf32>, i32 -> vector<8x512xf32>
    %c12_137 = arith.constant 12 : index
    %c0_138 = arith.constant 0 : index
    %228 = vector.load %arg8[%c12_137, %c0_138] : memref<27x512xf32, #tpu.memory_space<vmem>>, vector<1x512xf32>
    %229 = vector.broadcast %228 : vector<1x512xf32> to vector<8x512xf32>
    %230 = arith.mulf %227, %229 : vector<8x512xf32>
    %c96_139 = arith.constant 96 : index
    %c0_140 = arith.constant 0 : index
    %231 = vector.load %arg10[%c96_139, %c0_140] : memref<216x512xf32, #tpu.memory_space<vmem>>, vector<8x512xf32>
    tpu.vector_store %arg10[%c96_139, %c0_140], %230 {strides = array<i32>} : memref<216x512xf32, #tpu.memory_space<vmem>>, vector<8x512xf32>,
    %c104_141 = arith.constant 104 : index
    %c0_142 = arith.constant 0 : index
    %232 = vector.load %arg10[%c104_141, %c0_142] : memref<216x512xf32, #tpu.memory_space<vmem>>, vector<8x512xf32>
    tpu.vector_store %arg10[%c104_141, %c0_142], %166 {strides = array<i32>} : memref<216x512xf32, #tpu.memory_space<vmem>>, vector<8x512xf32>,
    %c511_i32_143 = arith.constant 511 : i32
    %233 = tpu.dynamic_rotate %166 by %c511_i32_143 dim 1 : vector<8x512xf32>, i32 -> vector<8x512xf32>
    %c14_144 = arith.constant 14 : index
    %c0_145 = arith.constant 0 : index
    %234 = vector.load %arg8[%c14_144, %c0_145] : memref<27x512xf32, #tpu.memory_space<vmem>>, vector<1x512xf32>
    %235 = vector.broadcast %234 : vector<1x512xf32> to vector<8x512xf32>
    %236 = arith.mulf %233, %235 : vector<8x512xf32>
    %c112_146 = arith.constant 112 : index
    %c0_147 = arith.constant 0 : index
    %237 = vector.load %arg10[%c112_146, %c0_147] : memref<216x512xf32, #tpu.memory_space<vmem>>, vector<8x512xf32>
    tpu.vector_store %arg10[%c112_146, %c0_147], %236 {strides = array<i32>} : memref<216x512xf32, #tpu.memory_space<vmem>>, vector<8x512xf32>,
    %c505_i32_148 = arith.constant 505 : i32
    %238 = tpu.dynamic_rotate %166 by %c505_i32_148 dim 1 : vector<8x512xf32>, i32 -> vector<8x512xf32>
    %c15_149 = arith.constant 15 : index
    %c0_150 = arith.constant 0 : index
    %239 = vector.load %arg8[%c15_149, %c0_150] : memref<27x512xf32, #tpu.memory_space<vmem>>, vector<1x512xf32>
    %240 = vector.broadcast %239 : vector<1x512xf32> to vector<8x512xf32>
    %241 = arith.mulf %238, %240 : vector<8x512xf32>
    %c120_151 = arith.constant 120 : index
    %c0_152 = arith.constant 0 : index
    %242 = vector.load %arg10[%c120_151, %c0_152] : memref<216x512xf32, #tpu.memory_space<vmem>>, vector<8x512xf32>
    tpu.vector_store %arg10[%c120_151, %c0_152], %241 {strides = array<i32>} : memref<216x512xf32, #tpu.memory_space<vmem>>, vector<8x512xf32>,
    %c504_i32_153 = arith.constant 504 : i32
    %243 = tpu.dynamic_rotate %166 by %c504_i32_153 dim 1 : vector<8x512xf32>, i32 -> vector<8x512xf32>
    %c16_154 = arith.constant 16 : index
    %c0_155 = arith.constant 0 : index
    %244 = vector.load %arg8[%c16_154, %c0_155] : memref<27x512xf32, #tpu.memory_space<vmem>>, vector<1x512xf32>
    %245 = vector.broadcast %244 : vector<1x512xf32> to vector<8x512xf32>
    %246 = arith.mulf %243, %245 : vector<8x512xf32>
    %c128_156 = arith.constant 128 : index
    %c0_157 = arith.constant 0 : index
    %247 = vector.load %arg10[%c128_156, %c0_157] : memref<216x512xf32, #tpu.memory_space<vmem>>, vector<8x512xf32>
    tpu.vector_store %arg10[%c128_156, %c0_157], %246 {strides = array<i32>} : memref<216x512xf32, #tpu.memory_space<vmem>>, vector<8x512xf32>,
    %c503_i32_158 = arith.constant 503 : i32
    %248 = tpu.dynamic_rotate %166 by %c503_i32_158 dim 1 : vector<8x512xf32>, i32 -> vector<8x512xf32>
    %c17_159 = arith.constant 17 : index
    %c0_160 = arith.constant 0 : index
    %249 = vector.load %arg8[%c17_159, %c0_160] : memref<27x512xf32, #tpu.memory_space<vmem>>, vector<1x512xf32>
    %250 = vector.broadcast %249 : vector<1x512xf32> to vector<8x512xf32>
    %251 = arith.mulf %248, %250 : vector<8x512xf32>
    %c136_161 = arith.constant 136 : index
    %c0_162 = arith.constant 0 : index
    %252 = vector.load %arg10[%c136_161, %c0_162] : memref<216x512xf32, #tpu.memory_space<vmem>>, vector<8x512xf32>
    tpu.vector_store %arg10[%c136_161, %c0_162], %251 {strides = array<i32>} : memref<216x512xf32, #tpu.memory_space<vmem>>, vector<8x512xf32>,
    %c457_i32_163 = arith.constant 457 : i32
    %253 = tpu.dynamic_rotate %166 by %c457_i32_163 dim 1 : vector<8x512xf32>, i32 -> vector<8x512xf32>
    %c18_164 = arith.constant 18 : index
    %c0_165 = arith.constant 0 : index
    %254 = vector.load %arg8[%c18_164, %c0_165] : memref<27x512xf32, #tpu.memory_space<vmem>>, vector<1x512xf32>
    %255 = vector.broadcast %254 : vector<1x512xf32> to vector<8x512xf32>
    %256 = arith.mulf %253, %255 : vector<8x512xf32>
    %c144_166 = arith.constant 144 : index
    %c0_167 = arith.constant 0 : index
    %257 = vector.load %arg10[%c144_166, %c0_167] : memref<216x512xf32, #tpu.memory_space<vmem>>, vector<8x512xf32>
    tpu.vector_store %arg10[%c144_166, %c0_167], %256 {strides = array<i32>} : memref<216x512xf32, #tpu.memory_space<vmem>>, vector<8x512xf32>,
    %c456_i32_168 = arith.constant 456 : i32
    %258 = tpu.dynamic_rotate %166 by %c456_i32_168 dim 1 : vector<8x512xf32>, i32 -> vector<8x512xf32>
    %c19_169 = arith.constant 19 : index
    %c0_170 = arith.constant 0 : index
    %259 = vector.load %arg8[%c19_169, %c0_170] : memref<27x512xf32, #tpu.memory_space<vmem>>, vector<1x512xf32>
    %260 = vector.broadcast %259 : vector<1x512xf32> to vector<8x512xf32>
    %261 = arith.mulf %258, %260 : vector<8x512xf32>
    %c152_171 = arith.constant 152 : index
    %c0_172 = arith.constant 0 : index
    %262 = vector.load %arg10[%c152_171, %c0_172] : memref<216x512xf32, #tpu.memory_space<vmem>>, vector<8x512xf32>
    tpu.vector_store %arg10[%c152_171, %c0_172], %261 {strides = array<i32>} : memref<216x512xf32, #tpu.memory_space<vmem>>, vector<8x512xf32>,
    %c455_i32_173 = arith.constant 455 : i32
    %263 = tpu.dynamic_rotate %166 by %c455_i32_173 dim 1 : vector<8x512xf32>, i32 -> vector<8x512xf32>
    %c20_174 = arith.constant 20 : index
    %c0_175 = arith.constant 0 : index
    %264 = vector.load %arg8[%c20_174, %c0_175] : memref<27x512xf32, #tpu.memory_space<vmem>>, vector<1x512xf32>
    %265 = vector.broadcast %264 : vector<1x512xf32> to vector<8x512xf32>
    %266 = arith.mulf %263, %265 : vector<8x512xf32>
    %c160_176 = arith.constant 160 : index
    %c0_177 = arith.constant 0 : index
    %267 = vector.load %arg10[%c160_176, %c0_177] : memref<216x512xf32, #tpu.memory_space<vmem>>, vector<8x512xf32>
    tpu.vector_store %arg10[%c160_176, %c0_177], %266 {strides = array<i32>} : memref<216x512xf32, #tpu.memory_space<vmem>>, vector<8x512xf32>,
    %c449_i32_178 = arith.constant 449 : i32
    %268 = tpu.dynamic_rotate %166 by %c449_i32_178 dim 1 : vector<8x512xf32>, i32 -> vector<8x512xf32>
    %c21_179 = arith.constant 21 : index
    %c0_180 = arith.constant 0 : index
    %269 = vector.load %arg8[%c21_179, %c0_180] : memref<27x512xf32, #tpu.memory_space<vmem>>, vector<1x512xf32>
    %270 = vector.broadcast %269 : vector<1x512xf32> to vector<8x512xf32>
    %271 = arith.mulf %268, %270 : vector<8x512xf32>
    %c168_181 = arith.constant 168 : index
    %c0_182 = arith.constant 0 : index
    %272 = vector.load %arg10[%c168_181, %c0_182] : memref<216x512xf32, #tpu.memory_space<vmem>>, vector<8x512xf32>
    tpu.vector_store %arg10[%c168_181, %c0_182], %271 {strides = array<i32>} : memref<216x512xf32, #tpu.memory_space<vmem>>, vector<8x512xf32>,
    %c448_i32_183 = arith.constant 448 : i32
    %273 = tpu.dynamic_rotate %166 by %c448_i32_183 dim 1 : vector<8x512xf32>, i32 -> vector<8x512xf32>
    %c22_184 = arith.constant 22 : index
    %c0_185 = arith.constant 0 : index
    %274 = vector.load %arg8[%c22_184, %c0_185] : memref<27x512xf32, #tpu.memory_space<vmem>>, vector<1x512xf32>
    %275 = vector.broadcast %274 : vector<1x512xf32> to vector<8x512xf32>
    %276 = arith.mulf %273, %275 : vector<8x512xf32>
    %c176_186 = arith.constant 176 : index
    %c0_187 = arith.constant 0 : index
    %277 = vector.load %arg10[%c176_186, %c0_187] : memref<216x512xf32, #tpu.memory_space<vmem>>, vector<8x512xf32>
    tpu.vector_store %arg10[%c176_186, %c0_187], %276 {strides = array<i32>} : memref<216x512xf32, #tpu.memory_space<vmem>>, vector<8x512xf32>,
    %c447_i32_188 = arith.constant 447 : i32
    %278 = tpu.dynamic_rotate %166 by %c447_i32_188 dim 1 : vector<8x512xf32>, i32 -> vector<8x512xf32>
    %c23_189 = arith.constant 23 : index
    %c0_190 = arith.constant 0 : index
    %279 = vector.load %arg8[%c23_189, %c0_190] : memref<27x512xf32, #tpu.memory_space<vmem>>, vector<1x512xf32>
    %280 = vector.broadcast %279 : vector<1x512xf32> to vector<8x512xf32>
    %281 = arith.mulf %278, %280 : vector<8x512xf32>
    %c184_191 = arith.constant 184 : index
    %c0_192 = arith.constant 0 : index
    %282 = vector.load %arg10[%c184_191, %c0_192] : memref<216x512xf32, #tpu.memory_space<vmem>>, vector<8x512xf32>
    tpu.vector_store %arg10[%c184_191, %c0_192], %281 {strides = array<i32>} : memref<216x512xf32, #tpu.memory_space<vmem>>, vector<8x512xf32>,
    %c441_i32_193 = arith.constant 441 : i32
    %283 = tpu.dynamic_rotate %166 by %c441_i32_193 dim 1 : vector<8x512xf32>, i32 -> vector<8x512xf32>
    %c24_194 = arith.constant 24 : index
    %c0_195 = arith.constant 0 : index
    %284 = vector.load %arg8[%c24_194, %c0_195] : memref<27x512xf32, #tpu.memory_space<vmem>>, vector<1x512xf32>
    %285 = vector.broadcast %284 : vector<1x512xf32> to vector<8x512xf32>
    %286 = arith.mulf %283, %285 : vector<8x512xf32>
    %c192_196 = arith.constant 192 : index
    %c0_197 = arith.constant 0 : index
    %287 = vector.load %arg10[%c192_196, %c0_197] : memref<216x512xf32, #tpu.memory_space<vmem>>, vector<8x512xf32>
    tpu.vector_store %arg10[%c192_196, %c0_197], %286 {strides = array<i32>} : memref<216x512xf32, #tpu.memory_space<vmem>>, vector<8x512xf32>,
    %c440_i32_198 = arith.constant 440 : i32
    %288 = tpu.dynamic_rotate %166 by %c440_i32_198 dim 1 : vector<8x512xf32>, i32 -> vector<8x512xf32>
    %c25_199 = arith.constant 25 : index
    %c0_200 = arith.constant 0 : index
    %289 = vector.load %arg8[%c25_199, %c0_200] : memref<27x512xf32, #tpu.memory_space<vmem>>, vector<1x512xf32>
    %290 = vector.broadcast %289 : vector<1x512xf32> to vector<8x512xf32>
    %291 = arith.mulf %288, %290 : vector<8x512xf32>
    %c200_201 = arith.constant 200 : index
    %c0_202 = arith.constant 0 : index
    %292 = vector.load %arg10[%c200_201, %c0_202] : memref<216x512xf32, #tpu.memory_space<vmem>>, vector<8x512xf32>
    tpu.vector_store %arg10[%c200_201, %c0_202], %291 {strides = array<i32>} : memref<216x512xf32, #tpu.memory_space<vmem>>, vector<8x512xf32>,
    %c439_i32_203 = arith.constant 439 : i32
    %293 = tpu.dynamic_rotate %166 by %c439_i32_203 dim 1 : vector<8x512xf32>, i32 -> vector<8x512xf32>
    %c26_204 = arith.constant 26 : index
    %c0_205 = arith.constant 0 : index
    %294 = vector.load %arg8[%c26_204, %c0_205] : memref<27x512xf32, #tpu.memory_space<vmem>>, vector<1x512xf32>
    %295 = vector.broadcast %294 : vector<1x512xf32> to vector<8x512xf32>
    %296 = arith.mulf %293, %295 : vector<8x512xf32>
    %c208_206 = arith.constant 208 : index
    %c0_207 = arith.constant 0 : index
    %297 = vector.load %arg10[%c208_206, %c0_207] : memref<216x512xf32, #tpu.memory_space<vmem>>, vector<8x512xf32>
    tpu.vector_store %arg10[%c208_206, %c0_207], %296 {strides = array<i32>} : memref<216x512xf32, #tpu.memory_space<vmem>>, vector<8x512xf32>,
    %c0_208 = arith.constant 0 : index
    %c0_209 = arith.constant 0 : index
    %298 = vector.load %arg3[%c0_208, %c0_209] : memref<8x216xf32, #tpu.memory_space<vmem>>, vector<8x216xf32>
    %c0_210 = arith.constant 0 : index
    %c0_211 = arith.constant 0 : index
    %299 = vector.load %arg10[%c0_210, %c0_211] : memref<216x512xf32, #tpu.memory_space<vmem>>, vector<216x512xf32>
    %cst_212 = arith.constant dense<0.000000e+00> : vector<8x512xf32>
    %300 = tpu.matmul %298, %299, %cst_212 {dimension_numbers = #tpu.dot_dimension_numbers<[1], [0], [0], [1], [0, 0, 1, 1], [], []>} : vector<8x216xf32>, vector<216x512xf32>, vector<8x512xf32> -> vector<8x512xf32>
    %301 = vector.shape_cast %300 : vector<8x512xf32> to vector<1x8x512xf32>
    %cst_213 = arith.constant dense<0.000000e+00> : vector<1xf32>
    %302 = vector.multi_reduction <add>, %301, %cst_213 [1, 2] : vector<1x8x512xf32> to vector<1xf32>
    %303 = vector.shape_cast %302 : vector<1xf32> to vector<1x1x1xf32>
    %304 = vector.extract %303[0, 0, 0] : f32 from vector<1x1x1xf32>
    %305 = arith.mulf %300, %300 : vector<8x512xf32>
    %306 = vector.shape_cast %305 : vector<8x512xf32> to vector<1x8x512xf32>
    %cst_214 = arith.constant dense<0.000000e+00> : vector<1xf32>
    %307 = vector.multi_reduction <add>, %306, %cst_214 [1, 2] : vector<1x8x512xf32> to vector<1xf32>
    %308 = vector.shape_cast %307 : vector<1xf32> to vector<1x1x1xf32>
    %309 = vector.extract %308[0, 0, 0] : f32 from vector<1x1x1xf32>
    %cst_215 = arith.constant 2.048000e+03 : f32
    %310 = arith.divf %304, %cst_215 : f32
    %cst_216 = arith.constant 2.048000e+03 : f32
    %311 = arith.divf %309, %cst_216 : f32
    %312 = arith.mulf %310, %310 : f32
    %313 = arith.subf %311, %312 : f32
    %cst_217 = arith.constant 0.000000e+00 : f32
    %314 = arith.maximumf %313, %cst_217 : f32
    %cst_218 = arith.constant 9.99999974E-6 : f32
    %315 = arith.addf %314, %cst_218 : f32
    %316 = math.rsqrt %315 : f32
    %317 = vector.broadcast %310 : f32 to vector<8x512xf32>
    %318 = arith.subf %300, %317 : vector<8x512xf32>
    %c0_219 = arith.constant 0 : index
    %c0_220 = arith.constant 0 : index
    %319 = vector.load %arg6[%c0_219, %c0_220] : memref<8x1xf32, #tpu.memory_space<vmem>>, vector<8x1xf32>
    %320 = vector.broadcast %316 : f32 to vector<8x1xf32>
    %321 = arith.mulf %320, %319 : vector<8x1xf32>
    %322 = vector.broadcast %321 : vector<8x1xf32> to vector<8x512xf32>
    %323 = arith.mulf %318, %322 : vector<8x512xf32>
    %c0_221 = arith.constant 0 : index
    %c0_222 = arith.constant 0 : index
    %324 = vector.load %arg7[%c0_221, %c0_222] : memref<8x1xf32, #tpu.memory_space<vmem>>, vector<8x1xf32>
    %325 = vector.broadcast %324 : vector<8x1xf32> to vector<8x512xf32>
    %326 = arith.addf %323, %325 : vector<8x512xf32>
    %327 = arith.addf %326, %1 : vector<8x512xf32>
    %cst_223 = arith.constant 0.000000e+00 : f32
    %328 = vector.broadcast %cst_223 : f32 to vector<8x512xf32>
    %329 = arith.cmpf oge, %327, %328 : vector<8x512xf32>
    %cst_224 = arith.constant 1.000000e-01 : f32
    %330 = vector.broadcast %cst_224 : f32 to vector<8x512xf32>
    %331 = arith.mulf %330, %327 : vector<8x512xf32>
    %332 = arith.select %329, %327, %331 : vector<8x512xi1>, vector<8x512xf32>
    %c0_225 = arith.constant 0 : index
    %c0_226 = arith.constant 0 : index
    %c0_227 = arith.constant 0 : index
    %333 = vector.load %arg9[%c0_225, %c0_226, %c0_227] : memref<1x8x512xf32, #tpu.memory_space<vmem>>, vector<1x8x512xf32>
    %334 = vector.shape_cast %333 : vector<1x8x512xf32> to vector<8x512xf32>
    %335 = vector.shape_cast %332 : vector<8x512xf32> to vector<1x8x512xf32>
    tpu.vector_store %arg9[%c0_225, %c0_226, %c0_227], %335 {strides = array<i32>} : memref<1x8x512xf32, #tpu.memory_space<vmem>>, vector<1x8x512xf32>,
    return
  }
  func.func @transform_0(%arg0: i32) -> (i32, i32, i32) {
    %c0_i32 = arith.constant 0 : i32
    %c0_i32_0 = arith.constant 0 : i32
    %c0_i32_1 = arith.constant 0 : i32
    return %arg0, %c0_i32, %c0_i32_0 : i32, i32, i32
  }
  func.func @transform_1(%arg0: i32) -> (i32, i32) {
    %c0_i32 = arith.constant 0 : i32
    %c0_i32_0 = arith.constant 0 : i32
    %c0_i32_1 = arith.constant 0 : i32
    return %c0_i32, %c0_i32_0 : i32, i32
  }
  func.func @transform_2(%arg0: i32) -> (i32, i32) {
    %c0_i32 = arith.constant 0 : i32
    %c0_i32_0 = arith.constant 0 : i32
    %c0_i32_1 = arith.constant 0 : i32
    return %c0_i32, %c0_i32_0 : i32, i32
  }
  func.func @transform_3(%arg0: i32) -> (i32, i32) {
    %c0_i32 = arith.constant 0 : i32
    %c0_i32_0 = arith.constant 0 : i32
    %c0_i32_1 = arith.constant 0 : i32
    return %c0_i32, %c0_i32_0 : i32, i32
  }
  func.func @transform_4(%arg0: i32) -> (i32, i32) {
    %c0_i32 = arith.constant 0 : i32
    %c0_i32_0 = arith.constant 0 : i32
    %c0_i32_1 = arith.constant 0 : i32
    return %c0_i32, %c0_i32_0 : i32, i32
  }
  func.func @transform_5(%arg0: i32) -> (i32, i32) {
    %c0_i32 = arith.constant 0 : i32
    %c0_i32_0 = arith.constant 0 : i32
    %c0_i32_1 = arith.constant 0 : i32
    return %c0_i32, %c0_i32_0 : i32, i32
  }
  func.func @transform_6(%arg0: i32) -> (i32, i32) {
    %c0_i32 = arith.constant 0 : i32
    %c0_i32_0 = arith.constant 0 : i32
    %c0_i32_1 = arith.constant 0 : i32
    return %c0_i32, %c0_i32_0 : i32, i32
  }
  func.func @transform_7(%arg0: i32) -> (i32, i32) {
    %c0_i32 = arith.constant 0 : i32
    %c0_i32_0 = arith.constant 0 : i32
    %c0_i32_1 = arith.constant 0 : i32
    return %c0_i32, %c0_i32_0 : i32, i32
  }
  func.func @transform_8(%arg0: i32) -> (i32, i32, i32) {
    %c0_i32 = arith.constant 0 : i32
    %c0_i32_0 = arith.constant 0 : i32
    %c0_i32_1 = arith.constant 0 : i32
    return %arg0, %c0_i32, %c0_i32_0 : i32, i32, i32
  }
}

</mosaic_0001>

<bundles_post_ra>
// kernel: tpu_custom_call.1
= control target key start
LH: loop header
LB: loop body
LE: loop exit
PB: predicated region body
PF: predicated region fallthrough
CT: control target
= control target key end

     0   :  { %13 = vsyncpa [#allocation4], 0  ;;  %s5203_s0 = inlined_call_operand.hbm [shape: f32[2,8,512], index: 0, kind: input, shape index: {}]   ;;  %s5204_s1 = inlined_call_operand.vmem [shape: f32[8,216], index: 1, kind: input, shape index: {}]   ;;  %s5205_s2 = inlined_call_operand.vmem [shape: f32[8,216], index: 2, kind: input, shape index: {}]   ;;  %s5206_s3 = inlined_call_operand.vmem [shape: f32[8,1], index: 3, kind: input, shape index: {}]   ;;  %s5207_s4 = inlined_call_operand.vmem [shape: f32[8,1], index: 4, kind: input, shape index: {}]   ;;  %s5208_s5 = inlined_call_operand.vmem [shape: f32[8,1], index: 5, kind: input, shape index: {}]   ;;  %s5209_s6 = inlined_call_operand.vmem [shape: f32[8,1], index: 6, kind: input, shape index: {}]   ;;  %s5210_s7 = inlined_call_operand.hbm [shape: f32[27,512], index: 7, kind: input, shape index: {}]   ;;  %s5211_s8 = inlined_call_operand.hbm [shape: f32[2,8,512], index: 8, kind: output, shape index: {}]  }
   0x1   :  { %15 = vsyncpa [#allocation4 + $0x1], 0 }
   0x2   :  { %16 = vsyncpa [#allocation7], 0 }
   0x3   :  { %17 = vsyncpa [#allocation5], 0 }
   0x4   :  { %19 = vsyncpa [#allocation5 + $0x1], 0  ;;  %s3664_s27 = smov 0   ;;  %s3666_s28 = smov 0  }
   0x5   :  { %s3668_s29 = smov 0   ;;  %s3670_s30 = smov 0  }
   0x6 LB: > { %s3685_s9 = sadd.s32 4294967295, %s3593_s30   ;;  %s3135_s10 = sadd.s32 4294967294, %s3593_s30   ;;  %s3593_s30 = sphi %s3670_s30, %s5386_s30   ;;  %s3589_s29 = sphi %s3668_s29, %s5389_s29   ;;  %s3585_s28 = sphi %s3666_s28, %s5388_s28   ;;  %s3581_s27 = sphi %s3664_s27, %s5387_s27  }
   0x7   : > { %p45_p0 = scmp.ne.s32.totalorder %s3585_s28, %s3581_s27  ;;  %p5212_p1 = scmp.eq.s32.totalorder %s3685_s9, 0 }
   0x8   : > { %p222_p3 = scmp.eq.s32.totalorder %s3135_s10, 1  ;;  %p3136_p5 = scmp.ge.s32.totalorder %s3593_s30, 1 }
   0x9   : > { %p3694_p4 = por %p5212_p1, %p45_p0  ;;  %p229_p7 = scmp.lt.s32.totalorder %s3593_s30, 3 }
   0xa   : > { %p3699_p6 = por %p222_p3, %p45_p0  ;;  %s3595_s14 = smov [#allocation6]  }
   0xb   : > { %s5270_s11 = scalar_select %p3694_p4, 1, 0 }
   0xc   : > { %s5271_s12 = scalar_select %p3699_p6, 1, 0 }
   0xd   : > { %p3704_p8 = pnand %p3136_p5, %p229_p7  ;;  %s259_s15 = sshll.u32 %s3595_s14, 4  ;;  %s3708_s15 = int_to_ptr.vmem [resolvable:$true] %s259_s15 }
   0xe   : > { %s3720_s17 = sadd.s32 1, %s3593_s30   ;;  %s32_s18 = sadd.s32 1, %s3589_s29 }
   0xf   : > { %s5272_s13 = scalar_select %p3704_p8, 1, 0 }
  0x10   : > { %p3385_p9 = pneg %p3704_p8  ;;  %5274 = sst [smem:[#allocation12_spill]] %s3720_s17 }
  0x11   : > { %s29_s19 = ssub.s32 %s3593_s30, %s3720_s17  ;;  %s3465_s22 = scalar_lea.hbm %s5210_s7, 2048 }
  0x12   : > { %p3715_p11 = pnand %p3385_p9, %p5212_p1  ;;  %p3466_p12 = scmp.ne.s32.totalorder %s5210_s7, %s3465_s22 }
  0x13   : > { %p3472_p5 = scmp.lt.u32.totalorder %s3465_s22, %s5210_s7 }
  0x14   : > { %p3467_p13 = pneg %p3715_p11 }
  0x16   : > { %p3468_p0 = pnand %p3467_p13, %p3466_p12 }
  0x18   : > { %p3469_p3 = pneg %p3468_p0 }
  0x1a   : > { %p3474_p7 = pnand %p3472_p5, %p3469_p3 }
  0x1c   : > { %3477 = shalt.err (!%p3474_p7)
}
  0x1d   : > { %s3478_s10 = scalar_lea.vmem %s3708_s15, 2048  ;;  %p3486_p2 = scmp.lt.s32.totalorder %s3708_s15, %s3708_s15 }
  0x1e   : > { %p3479_p9 = scmp.ne.s32.totalorder %s3708_s15, %s3478_s10  ;;  %p3487_p6 = scmp.lt.s32.totalorder %s3478_s10, %s3478_s10 }
  0x20   : > { %p3481_p10 = pnand %p3479_p9, %p3467_p13  ;;  %p3488_p4 = por %p3487_p6, %p3486_p2 }
  0x22   : > { %p3482_p1 = pneg %p3481_p10 }
  0x24   : > { %p3489_p8 = pnand %p3488_p4, %p3482_p1 }
  0x26   : > { %3492 = shalt.err (!%p3489_p8)
}
  0x27   : > { %s3596_s14 = smov 512   ;;  %s3597_s20 = smov 32  }
  0x28   : > { %3388 = dma.hbm_to_vmem [thread:$0]  (!%p3715_p11), %s5210_s7, 2048, %s3708_s15, [#allocation7], %s3596_s14, %s3596_s14, %s3597_s20  }
  0x29   : > { %p30_p2 = scmp.eq.s32.totalorder %s29_s19, 0  ;;  %p39_p1 = scmp.ne.s32.totalorder %s3589_s29, %s3585_s28 }
  0x2a   : > { %p40_p4 = scmp.eq.s32.totalorder %s3593_s30, 0  ;;  %p3398_p6 = scmp.lt.s32.totalorder %s3593_s30, 2 }
  0x2b   : > { %s3751_s23 = scalar_select %p30_p2, %s3589_s29, %s32_s18  }
  0x2c   : > { %p41_p8 = por %p40_p4, %p39_p1  ;;  %p5275_p10 = scmp.eq.s32.totalorder %s3685_s9, 1 }
  0x2d   : > { %s273_s25 = sand.u32 1, %s3589_s29   ;;  %s3155_s26 = sshll.u32 %s3593_s30, 9 }
  0x2e   : > { %p3755_p12 = por %p5275_p10, %p39_p1  ;;  %s3139_s10 = sshll.u32 %s273_s25, 5 }
  0x2f   : > { %s3764_s21 = scalar_lea.hbm %s5203_s0, %s3155_s26  ;;  %s277_s15 = scalar_lea.vmem [#allocation3], %s3139_s10 }
  0x30   : > { %s285_s18 = sshll.u32 %s277_s15, 4  ;;  %p3766_p11 = pnand %p3398_p6, %p41_p8  ;;  %s3770_s18 = int_to_ptr.vmem [resolvable:$true] %s285_s18 }
  0x31   : > { %s274_s14 = scalar_lea.sflag [#allocation4], %s273_s25  ;;  %s3493_s20 = scalar_lea.hbm %s3764_s21, 512 }
  0x32   : > { %p3494_p13 = scmp.ne.s32.totalorder %s3764_s21, %s3493_s20  ;;  %p3495_p0 = pneg %p3766_p11 }
  0x33   : > { %s3498_s26 = scalar_lea.hbm %s5203_s0, 1024  ;;  %p3499_p7 = scmp.lt.u32.totalorder %s3764_s21, %s5203_s0 }
  0x34   : > { %p3496_p3 = pnand %p3495_p0, %p3494_p13  ;;  %p3500_p9 = scmp.lt.u32.totalorder %s3498_s26, %s3493_s20 }
  0x35   : > { %p3502_p1 = scmp.lt.u32.totalorder %s3493_s20, %s3764_s21 }
  0x36   : > { %p3497_p5 = pneg %p3496_p3  ;;  %p3501_p2 = por %p3500_p9, %p3499_p7 }
  0x38   : > { %p3503_p4 = por %p3502_p1, %p3501_p2 }
  0x3a   : > { %p3504_p6 = pnand %p3503_p4, %p3497_p5 }
  0x3c   : > { %3507 = shalt.err (!%p3504_p6)
}
  0x3d   : > { %s3508_s25 = scalar_lea.vmem %s3770_s18, 512  ;;  %s3598_s15 = smov [#allocation3]  }
  0x3e   : > { %p3509_p8 = scmp.ne.s32.totalorder %s3770_s18, %s3508_s25  ;;  %s3513_s17 = sshll.u32 %s3598_s15, 4  ;;  %s3514_s17 = int_to_ptr.vmem [resolvable:$false] %s3513_s17 }
  0x3f   : > { %s3515_s22 = scalar_lea.vmem %s3514_s17, 1024  ;;  %p3516_p3 = scmp.lt.s32.totalorder %s3770_s18, %s3514_s17 }
  0x40   : > { %p3511_p10 = pnand %p3509_p8, %p3495_p0  ;;  %p3517_p7 = scmp.lt.s32.totalorder %s3515_s22, %s3508_s25 }
  0x42   : > { %p3512_p13 = pneg %p3511_p10  ;;  %p3518_p9 = por %p3517_p7, %p3516_p3 }
  0x44   : > { %p3519_p2 = pnand %p3518_p9, %p3512_p13 }
  0x46   : > { %3522 = shalt.err (!%p3519_p2)
}
  0x47   : > { %3392 = dma.hbm_to_vmem [thread:$0]  (!%p3766_p11), %s3764_s21, 512, %s3770_s18, %s274_s14  }
  0x48   : > { %p5278_p5 = scmp.ne.s32.totalorder %s5272_s13, 0 }
  0x4a   : > { %294 = sbr.rel (%p5278_p5) target bundleno = 1928 (0x788), region = 52 }
  0x51   : > { %s3800_s20 = sand.u32 1, %s3585_s28   ;;  %p5279_p0 = scmp.ne.s32.totalorder %s5270_s11, 0 }
  0x52   : > { %s5217_s26 = sshll.u32 %s3800_s20, 5  ;;  %s297_s10 = scalar_lea.sflag [#allocation4], %s3800_s20 }
  0x53   : > { %s3806_s16 = scalar_lea.vmem [#allocation3], %s5217_s26 }
  0x54   : > { %3568 = dma.done.wait (%p5279_p0), %s297_s10, 512  }
  0x55   : > { %3570 = vsyncadd (%p5279_p0), %s297_s10, 4294966784  ;;  %p5280_p11 = scmp.eq.s32.totalorder %s3685_s9, 0 }
  0x57   : > { %3572 = dma.done.wait (%p5280_p11), [#allocation7], 2048   ;;  %p5281_p1 = pmov %p5280_p11 }
  0x58   : > { %v3817_v0 = vld [vmem:[%s3806_s16] sm:$0xff]  ;;  %s5253_s13 = smov 72   ;;  %s3600_s21 = smov 73   ;;  %v3824_v1 = vld [vmem:[%s3806_s16 + $0x8] sm:$0xff]  ;;  %v3831_v2 = vld [vmem:[%s3806_s16 + $0x18] sm:$0xff]  ;;  %v349_v4 = vlaneseq  ;;  %vm1483_vm4 = vcmask 719872  }
  0x59   : > { %3574 = vsyncadd (%p5281_p1), [#allocation7], 4294965248  ;;  %386 = vrot.lane.b32.xlu1 %v3817_v0, %s5253_s13  ;;  %341 = vrot.lane.b32.xlu0 %v3817_v0, %s3600_s21  ;;  %v3838_v3 = vld [vmem:[%s3806_s16 + $0x10] sm:$0xff]  ;;  %s3601_s11 = smov 71   ;;  %s5255_s18 = smov 65  }
  0x5a   : > { %s5251_s19 = smov 64   ;;  %s5249_s14 = smov 63   ;;  %v359_v5 = vshrl.u32 %v349_v4, 7  ;;  %v3940_v6 = vand.u32 127, %v349_v4 }
  0x5b   : > { %s5247_s25 = smov 57   ;;  %s5245_s15 = smov 56   ;;  %v3946_v7 = vld [vmem:[#allocation6 + $0x42] ss:$8 sm:$0xf] }
  0x5c   : > { %s5220_s17 = smov 55   ;;  %s5218_s22 = smov 9   ;;  %v3948_v8 = vsub.s32 0, %v359_v5  ;;  %v3950_v9 = vsub.s32 1, %v359_v5  ;;  %v3956_v14 = vsub.s32 3, %v359_v5  ;;  %vm394_vm0 = vcmp.lt.s32.totalorder %v3940_v6, 72 }
  0x5d   : > { %388 = vrot.lane.b32.xlu1 %v3824_v1, %s5253_s13  ;;  %343 = vrot.lane.b32.xlu0 %v3824_v1, %s3600_s21  ;;  %s5243_s10 = smov 8   ;;  %s5222_s26 = smov 7   ;;  %v3952_v10 = vld [vmem:[#allocation6] ss:$8 sm:$0xf]  ;;  %vm351_vm1 = vcmp.lt.s32.totalorder %v3940_v6, 73 }
  0x5e   : > { %v3954_v11 = vld [vmem:[#allocation6 + $0x1] ss:$8 sm:$0xf]  ;;  %v3958_v15 = vld [vmem:[#allocation6 + $0x43] ss:$8 sm:$0xf]  ;;  %v365_v16 = vrot.slane %v3952_v10, %v3950_v9  ;;  %v1100_v18 = vrot.slane %v3946_v7, %v3948_v8  ;;  %v1112_v23 = vrot.slane %v3946_v7, %v3956_v14  ;;  %v361_v26 = vrot.slane %v3952_v10, %v3948_v8 }
  0x5f   : > { %v409_v17 = vrot.slane %v3954_v11, %v3950_v9  ;;  %v1131_v19 = vrot.slane %v3958_v15, %v3948_v8  ;;  %v1143_v22 = vrot.slane %v3958_v15, %v3956_v14  ;;  %v3990_v30 = vsub.s32 2, %v359_v5  ;;  %v4042_v60 = vld [vmem:[#allocation6 + $0x2] ss:$8 sm:$0xf] }
  0x60   : > { %v405_v32 = vrot.slane %v3954_v11, %v3948_v8  ;;  %v1135_v36 = vrot.slane %v3958_v15, %v3950_v9  ;;  %v1104_v37 = vrot.slane %v3946_v7, %v3950_v9  ;;  %v373_v40 = vrot.slane %v3952_v10, %v3956_v14  ;;  %v4044_v61 = vld [vmem:[#allocation6 + $0x44] ss:$8 sm:$0xf] }
  0x61   : > { %392 = vrot.lane.b32.xlu1 %v3831_v2, %s5253_s13  ;;  %347 = vrot.lane.b32.xlu0 %v3831_v2, %s3600_s21  ;;  %v1108_v46 = vrot.slane %v3946_v7, %v3990_v30  ;;  %v369_v47 = vrot.slane %v3952_v10, %v3990_v30  ;;  %v413_v48 = vrot.slane %v3954_v11, %v3990_v30  ;;  %v4050_v10 = vld [vmem:[#allocation6 + $0x3] ss:$8 sm:$0xf]  ;;  %vm438_vm2 = vcmp.lt.s32.totalorder %v3940_v6, 71 }
  0x62   : > { %v417_v51 = vrot.slane %v3954_v11, %v3956_v14  ;;  %v1139_v52 = vrot.slane %v3958_v15, %v3990_v30  ;;  %v4052_v11 = vld [vmem:[#allocation6 + $0x45] ss:$8 sm:$0xf]  ;;  %vm482_vm3 = vcmp.lt.s32.totalorder %v3940_v6, 65  ;;  %vm526_vm5 = vcmp.lt.s32.totalorder %v3940_v6, 64 }
  0x63   : > { %vm570_vm6 = vcmp.lt.s32.totalorder %v3940_v6, 63  ;;  %vm614_vm7 = vcmp.lt.s32.totalorder %v3940_v6, 57  ;;  %vm658_vm8 = vcmp.lt.s32.totalorder %v3940_v6, 56  ;;  %vm702_vm9 = vcmp.lt.s32.totalorder %v3940_v6, 55 }
  0x64   : > { %vm746_vm10 = vcmp.lt.s32.totalorder %v3940_v6, 9  ;;  %vm790_vm11 = vcmp.lt.s32.totalorder %v3940_v6, 8  ;;  %vm834_vm12 = vcmp.lt.s32.totalorder %v3940_v6, 7  ;;  %vm5239_vm13 = vcmp.lt.s32.totalorder %v3940_v6, 1 }
  0x65   : > { %390 = vrot.lane.b32.xlu1 %v3838_v3, %s5253_s13  ;;  %345 = vrot.lane.b32.xlu0 %v3838_v3, %s3600_s21  ;;  %vm5259_vm14 = vcmp.lt.s32.totalorder %v3940_v6, 127  ;;  %vm5240_vm15 = vcmp.lt.s32.totalorder %v3940_v6, 121 }
  0x69   : > { %432 = vrot.lane.b32.xlu1 %v3824_v1, %s3601_s11  ;;  %430 = vrot.lane.b32.xlu0 %v3817_v0, %s3601_s11 }
  0x6d   : > { %476 = vrot.lane.b32.xlu1 %v3824_v1, %s5255_s18  ;;  %474 = vrot.lane.b32.xlu0 %v3817_v0, %s5255_s18 }
  0x71   : > { %480 = vrot.lane.b32.xlu1 %v3831_v2, %s5255_s18  ;;  %436 = vrot.lane.b32.xlu0 %v3831_v2, %s3601_s11 }
  0x75   : > { %478 = vrot.lane.b32.xlu1 %v3838_v3, %s5255_s18  ;;  %434 = vrot.lane.b32.xlu0 %v3838_v3, %s3601_s11  ;;  %s5313_s18 = smov 72  }
  0x79   : > { %520 = vrot.lane.b32.xlu1 %v3824_v1, %s5251_s19  ;;  %518 = vrot.lane.b32.xlu0 %v3817_v0, %s5251_s19 }
  0x7d   : > { %564 = vrot.lane.b32.xlu1 %v3824_v1, %s5249_s14  ;;  %562 = vrot.lane.b32.xlu0 %v3817_v0, %s5249_s14 }
  0x81   : > { %568 = vrot.lane.b32.xlu1 %v3831_v2, %s5249_s14  ;;  %524 = vrot.lane.b32.xlu0 %v3831_v2, %s5251_s19 }
  0x85   : > { %566 = vrot.lane.b32.xlu1 %v3838_v3, %s5249_s14  ;;  %522 = vrot.lane.b32.xlu0 %v3838_v3, %s5251_s19 }
  0x89   : > { %608 = vrot.lane.b32.xlu1 %v3824_v1, %s5247_s25  ;;  %606 = vrot.lane.b32.xlu0 %v3817_v0, %s5247_s25 }
  0x8d   : > { %652 = vrot.lane.b32.xlu1 %v3824_v1, %s5245_s15  ;;  %650 = vrot.lane.b32.xlu0 %v3817_v0, %s5245_s15 }
  0x91   : > { %656 = vrot.lane.b32.xlu1 %v3831_v2, %s5245_s15  ;;  %612 = vrot.lane.b32.xlu0 %v3831_v2, %s5247_s25 }
  0x95   : > { %654 = vrot.lane.b32.xlu1 %v3838_v3, %s5245_s15  ;;  %610 = vrot.lane.b32.xlu0 %v3838_v3, %s5247_s25 }
  0x99   : > { %696 = vrot.lane.b32.xlu1 %v3824_v1, %s5220_s17  ;;  %694 = vrot.lane.b32.xlu0 %v3817_v0, %s5220_s17 }
  0x9d   : > { %740 = vrot.lane.b32.xlu1 %v3824_v1, %s5218_s22  ;;  %738 = vrot.lane.b32.xlu0 %v3817_v0, %s5218_s22 }
  0xa1   : > { %744 = vrot.lane.b32.xlu1 %v3831_v2, %s5218_s22  ;;  %700 = vrot.lane.b32.xlu0 %v3831_v2, %s5220_s17 }
  0xa5   : > { %742 = vrot.lane.b32.xlu1 %v3838_v3, %s5218_s22  ;;  %698 = vrot.lane.b32.xlu0 %v3838_v3, %s5220_s17  ;;  %s5241_s22 = smov 1   ;;  %s5226_s17 = smov 127  }
  0xa9   : > { %784 = vrot.lane.b32.xlu1 %v3824_v1, %s5243_s10  ;;  %782 = vrot.lane.b32.xlu0 %v3817_v0, %s5243_s10 }
  0xad   : > { %828 = vrot.lane.b32.xlu1 %v3824_v1, %s5222_s26  ;;  %826 = vrot.lane.b32.xlu0 %v3817_v0, %s5222_s26 }
  0xb1   : > { %832 = vrot.lane.b32.xlu1 %v3831_v2, %s5222_s26  ;;  %788 = vrot.lane.b32.xlu0 %v3831_v2, %s5243_s10 }
  0xb5   : > { %830 = vrot.lane.b32.xlu1 %v3838_v3, %s5222_s26  ;;  %786 = vrot.lane.b32.xlu0 %v3838_v3, %s5243_s10  ;;  %s5224_s26 = smov 121  }
  0xb9   : > { %872 = vrot.lane.b32.xlu1 %v3824_v1, %s5241_s22  ;;  %870 = vrot.lane.b32.xlu0 %v3817_v0, %s5241_s22 }
  0xbd   : > { %874 = vrot.lane.b32.xlu1 %v3838_v3, %s5241_s22  ;;  %876 = vrot.lane.b32.xlu0 %v3831_v2, %s5241_s22 }
  0xc1   : > { %922 = vrot.lane.b32.xlu1 %v3838_v3, %s5226_s17  ;;  %920 = vrot.lane.b32.xlu0 %v3824_v1, %s5226_s17 }
  0xc5   : > { %966 = vrot.lane.b32.xlu1 %v3838_v3, %s5224_s26  ;;  %964 = vrot.lane.b32.xlu0 %v3824_v1, %s5224_s26 }
  0xc9   : > { %962 = vrot.lane.b32.xlu1 %v3817_v0, %s5224_s26  ;;  %918 = vrot.lane.b32.xlu0 %v3817_v0, %s5226_s17 }
  0xcb   : > { %v387_v12 = vpop.permute.xlu1 %386  ;;  %v342_v13 = vpop.permute.xlu0 %341 }
  0xcd   : > { %968 = vrot.lane.b32.xlu1 %v3831_v2, %s5224_s26  ;;  %924 = vrot.lane.b32.xlu0 %v3831_v2, %s5226_s17  ;;  %s5230_s26 = smov 120   ;;  %s5228_s17 = smov 119  }
  0xcf   : > { %v389_v20 = vpop.permute.xlu1 %388  ;;  %v344_v21 = vpop.permute.xlu0 %343 }
  0xd0   : > { %v354_v24 = vsel %vm351_vm1, %v342_v13, %v344_v21  ;;  %v397_v25 = vsel %vm394_vm0, %v387_v12, %v389_v20 }
  0xd1   : > { %1010 = vrot.lane.b32.xlu1 %v3838_v3, %s5230_s26  ;;  %1008 = vrot.lane.b32.xlu0 %v3824_v1, %s5230_s26  ;;  %v379_v27 = vmul.f32 %v365_v16, %v354_v24  ;;  %v423_v28 = vmul.f32 %v409_v17, %v397_v25  ;;  %v3988_v29 = vmul.f32 %v1100_v18, %v354_v24 }
  0xd2   : > { %v3992_v31 = vmul.f32 %v1131_v19, %v397_v25  ;;  %v453_v18 = vrot.slane %v4042_v60, %v3950_v9  ;;  %v1162_v19 = vrot.slane %v4044_v61, %v3948_v8 }
  0xd3   : > { %v393_v33 = vpop.permute.xlu1 %392  ;;  %v348_v34 = vpop.permute.xlu0 %347  ;;  %v3157_v35 = vpack.c.bf16 %v423_v28, %v379_v27  ;;  %v493_v28 = vrot.slane %v4050_v10, %v3948_v8 }
  0xd4   : > { %v398_v38 = vsel %vm394_vm0, %v393_v33, %v387_v12  ;;  %v355_v39 = vsel %vm351_vm1, %v348_v34, %v342_v13 }
  0xd5   : > { %v4008_v42 = vmul.f32 %v1143_v22, %v398_v38  ;;  %v4010_v43 = vmul.f32 %v1112_v23, %v355_v39  ;;  %1054 = vrot.lane.b32.xlu1 %v3838_v3, %s5228_s17  ;;  %1052 = vrot.lane.b32.xlu0 %v3824_v1, %s5228_s17  ;;  %v378_v44 = vmul.f32 %v361_v26, %v355_v39 }
  0xd6   : > { %3158 = vmatprep.subr.bf16.mxu0 %v3157_v35  ;;  %v422_v45 = vmul.f32 %v405_v32, %v398_v38  ;;  %v497_v22 = vrot.slane %v4050_v10, %v3950_v9  ;;  %v1193_v23 = vrot.slane %v4052_v11, %v3948_v8  ;;  %v1174_v35 = vrot.slane %v4044_v61, %v3956_v14 }
  0xd7   : > { %v391_v49 = vpop.permute.xlu1 %390  ;;  %v346_v50 = vpop.permute.xlu0 %345 }
  0xd8   : > { %v396_v54 = vsel %vm394_vm0, %v389_v20, %v391_v49  ;;  %v353_v55 = vsel %vm351_vm1, %v344_v21, %v346_v50  ;;  %v3159_v56 = vpack.c.bf16 %v422_v45, %v378_v44  ;;  %v352_v57 = vsel %vm351_vm1, %v346_v50, %v348_v34 }
  0xd9   : > { %v4034_v58 = vmul.f32 %v1135_v36, %v396_v54  ;;  %v4036_v59 = vmul.f32 %v1104_v37, %v353_v55  ;;  %1050 = vrot.lane.b32.xlu1 %v3817_v0, %s5228_s17  ;;  %1006 = vrot.lane.b32.xlu0 %v3817_v0, %s5230_s26  ;;  %v381_v62 = vmul.f32 %v373_v40, %v352_v57 }
  0xda   : > { %3160 = vmatpush1.bf16.msra.mxu0 %v3159_v56  ;;  %v395_v63 = vsel %vm394_vm0, %v391_v49, %v393_v33  ;;  %v4048_v4 = vmul.f32 %v1108_v46, %v352_v57  ;;  %v380_v5 = vmul.f32 %v369_v47, %v353_v55  ;;  %v424_v7 = vmul.f32 %v413_v48, %v396_v54 }
  0xdb   : > { %v433_v12 = vpop.permute.xlu1 %432  ;;  %v431_v13 = vpop.permute.xlu0 %430  ;;  %v425_v15 = vmul.f32 %v417_v51, %v395_v63  ;;  %v4055_v16 = vmul.f32 %v1139_v52, %v395_v63  ;;  %v1205_v33 = vrot.slane %v4052_v11, %v3956_v14  ;;  %v449_v34 = vrot.slane %v4042_v60, %v3948_v8  ;;  %v1374_v63 = vld [vmem:[%s5204_s1 + $0x8] sm:$0xff] }
  0xdc   : > { %v3211_v20 = vpack.c.bf16 %v424_v7, %v380_v5  ;;  %v441_v24 = vsel %vm438_vm2, %v431_v13, %v433_v12  ;;  %v501_v40 = vrot.slane %v4050_v10, %v3990_v30  ;;  %v505_v47 = vrot.slane %v4050_v10, %v3956_v14  ;;  %3146 = vmatprep.mubr.msk.f32.mxu0 %vm1483_vm4, %v1374_v63 }
  0xdd   : > { %1056 = vrot.lane.b32.xlu1 %v3831_v2, %s5228_s17  ;;  %1012 = vrot.lane.b32.xlu0 %v3831_v2, %s5230_s26  ;;  %v3209_v21 = vpack.c.bf16 %v425_v15, %v381_v62  ;;  %v467_v36 = vmul.f32 %v453_v18, %v441_v24  ;;  %v4086_v37 = vmul.f32 %v1162_v19, %v441_v24  ;;  %s3617_s17 = smov 0.0  }
  0xde   : > { %v1197_v48 = vrot.slane %v4052_v11, %v3950_v9  ;;  %v1201_v52 = vrot.slane %v4052_v11, %v3990_v30  ;;  %v457_v54 = vrot.slane %v4042_v60, %v3990_v30  ;;  %v461_v5 = vrot.slane %v4042_v60, %v3956_v14  ;;  %3147 = vmatprep.mubr.msk.f32.mxu1 %vm1483_vm4, %v1374_v63 }
  0xdf   : > { %3210 = vmatprep.subr.bf16.mxu1 %v3209_v21  ;;  %v477_v26 = vpop.permute.xlu1 %476  ;;  %v475_v27 = vpop.permute.xlu0 %474  ;;  %v1166_v7 = vrot.slane %v4044_v61, %v3950_v9  ;;  %v1170_v10 = vrot.slane %v4044_v61, %v3990_v30  ;;  %v4131_v21 = vld [vmem:[#allocation6 + $0x4] ss:$8 sm:$0xf] }
  0xe0   : > { %3212 = vmatpush1.bf16.msra.mxu1 %v3211_v20  ;;  %v485_v32 = vsel %vm482_vm3, %v475_v27, %v477_v26 }
  0xe1   : > { %v511_v38 = vmul.f32 %v497_v22, %v485_v32  ;;  %v4088_v39 = vmul.f32 %v1193_v23, %v485_v32 }
  0xe3   : > { %v481_v44 = vpop.permute.xlu1 %480  ;;  %v437_v45 = vpop.permute.xlu0 %436  ;;  %v3161_v46 = vpack.c.bf16 %v511_v38, %v467_v36  ;;  %v1250_v36 = vld [vmem:[#allocation6 + $0x47] ss:$8 sm:$0xf]  ;;  %v541_v38 = vrot.slane %v4131_v21, %v3950_v9 }
  0xe4   : > { %v486_v50 = vsel %vm482_vm3, %v481_v44, %v475_v27  ;;  %v442_v51 = vsel %vm438_vm2, %v437_v45, %v431_v13 }
  0xe5   : > { %v510_v55 = vmul.f32 %v493_v28, %v486_v50  ;;  %v4106_v56 = vmul.f32 %v1205_v33, %v486_v50  ;;  %v466_v57 = vmul.f32 %v449_v34, %v442_v51  ;;  %v4108_v62 = vmul.f32 %v1174_v35, %v442_v51  ;;  %3162 = vmatprep.subr.bf16.mxu0 %v3161_v46  ;;  %v4137_v28 = vld [vmem:[#allocation6 + $0x46] ss:$8 sm:$0xf]  ;;  %v576_v35 = vld [vmem:[#allocation6 + $0x5] ss:$8 sm:$0xf] }
  0xe6   : > { %v1255_v50 = vrot.slane %v1250_v36, %v3948_v8  ;;  %v1312_v51 = vld [vmem:[#allocation6 + $0x61] ss:$8 sm:$0xf] }
  0xe7   : > { %v479_v11 = vpop.permute.xlu1 %478  ;;  %v435_v13 = vpop.permute.xlu0 %434  ;;  %v3163_v15 = vpack.c.bf16 %v510_v55, %v466_v57  ;;  %v581_v57 = vrot.slane %v576_v35, %v3948_v8 }
  0xe8   : > { %v483_v60 = vsel %vm482_vm3, %v479_v11, %v481_v44  ;;  %v484_v19 = vsel %vm482_vm3, %v477_v26, %v479_v11  ;;  %v439_v61 = vsel %vm438_vm2, %v435_v13, %v437_v45  ;;  %v440_v20 = vsel %vm438_vm2, %v433_v12, %v435_v13 }
  0xe9   : > { %v512_v22 = vmul.f32 %v501_v40, %v484_v19  ;;  %v513_v23 = vmul.f32 %v505_v47, %v483_v60  ;;  %v4133_v24 = vmul.f32 %v1197_v48, %v484_v19  ;;  %v4135_v27 = vmul.f32 %v1201_v52, %v483_v60  ;;  %3164 = vmatpush1.bf16.msra.mxu0 %v3163_v15 }
  0xea   : > { %v468_v32 = vmul.f32 %v457_v54, %v440_v20  ;;  %v469_v33 = vmul.f32 %v461_v5, %v439_v61  ;;  %v4139_v26 = vmul.f32 %v1166_v7, %v440_v20  ;;  %v4141_v34 = vmul.f32 %v1170_v10, %v439_v61 }
  0xeb   : > { %v521_v12 = vpop.permute.xlu1 %520  ;;  %v519_v40 = vpop.permute.xlu0 %518  ;;  %v1224_v44 = vrot.slane %v4137_v28, %v3948_v8  ;;  %v585_v48 = vrot.slane %v576_v35, %v3950_v9  ;;  %v1267_v5 = vrot.slane %v1250_v36, %v3956_v14  ;;  %v537_v7 = vrot.slane %v4131_v21, %v3948_v8 }
  0xec   : > { %v3213_v45 = vpack.c.bf16 %v513_v23, %v469_v33  ;;  %v3215_v46 = vpack.c.bf16 %v512_v22, %v468_v32  ;;  %v529_v52 = vsel %vm526_vm5, %v519_v40, %v521_v12  ;;  %v1236_v10 = vrot.slane %v4137_v28, %v3956_v14 }
  0xed   : > { %v555_v11 = vmul.f32 %v541_v38, %v529_v52  ;;  %v4165_v13 = vmul.f32 %v1224_v44, %v529_v52  ;;  %v589_v22 = vrot.slane %v576_v35, %v3990_v30  ;;  %v593_v23 = vrot.slane %v576_v35, %v3956_v14 }
  0xee   : > { %3214 = vmatprep.subr.bf16.mxu1 %v3213_v45  ;;  %v1259_v44 = vrot.slane %v1250_v36, %v3950_v9  ;;  %v1263_v45 = vrot.slane %v1250_v36, %v3990_v30  ;;  %v545_v35 = vrot.slane %v4131_v21, %v3990_v30 }
  0xef   : > { %3216 = vmatpush1.bf16.msra.mxu1 %v3215_v46  ;;  %v565_v54 = vpop.permute.xlu1 %564  ;;  %v563_v55 = vpop.permute.xlu0 %562 }
  0xf0   : > { %v573_v63 = vsel %vm570_vm6, %v563_v55, %v565_v54 }
  0xf1   : > { %v599_v15 = vmul.f32 %v585_v48, %v573_v63  ;;  %v4167_v60 = vmul.f32 %v1255_v50, %v573_v63  ;;  %v1232_v63 = vrot.slane %v4137_v28, %v3990_v30 }
  0xf3   : > { %v569_v19 = vpop.permute.xlu1 %568  ;;  %v525_v61 = vpop.permute.xlu0 %524  ;;  %v3165_v20 = vpack.c.bf16 %v599_v15, %v555_v11 }
  0xf4   : > { %v574_v33 = vsel %vm570_vm6, %v569_v19, %v563_v55  ;;  %v530_v38 = vsel %vm526_vm5, %v525_v61, %v519_v40  ;;  %v549_v55 = vrot.slane %v4131_v21, %v3956_v14  ;;  %v1228_v40 = vrot.slane %v4137_v28, %v3950_v9 }
  0xf5   : > { %v598_v46 = vmul.f32 %v581_v57, %v574_v33  ;;  %v4179_v48 = vmul.f32 %v1267_v5, %v574_v33  ;;  %v554_v50 = vmul.f32 %v537_v7, %v530_v38  ;;  %v4181_v52 = vmul.f32 %v1236_v10, %v530_v38  ;;  %3166 = vmatprep.subr.bf16.mxu0 %v3165_v20  ;;  %v4201_v20 = vld [vmem:[#allocation6 + $0x6] ss:$8 sm:$0xf] }
  0xf7   : > { %v567_v36 = vpop.permute.xlu1 %566  ;;  %v523_v57 = vpop.permute.xlu0 %522  ;;  %v3167_v5 = vpack.c.bf16 %v598_v46, %v554_v50  ;;  %v4207_v50 = vld [vmem:[#allocation6 + $0x60] ss:$8 sm:$0xf] }
  0xf8   : > { %v571_v10 = vsel %vm570_vm6, %v567_v36, %v569_v19  ;;  %v572_v11 = vsel %vm570_vm6, %v565_v54, %v567_v36  ;;  %v527_v21 = vsel %vm526_vm5, %v523_v57, %v525_v61  ;;  %v528_v15 = vsel %vm526_vm5, %v521_v12, %v523_v57  ;;  %v664_v61 = vld [vmem:[#allocation6 + $0x7] ss:$8 sm:$0xf] }
  0xf9   : > { %v600_v28 = vmul.f32 %v589_v22, %v572_v11  ;;  %v601_v33 = vmul.f32 %v593_v23, %v571_v10  ;;  %v4203_v38 = vmul.f32 %v1259_v44, %v572_v11  ;;  %v4205_v46 = vmul.f32 %v1263_v45, %v571_v10  ;;  %3168 = vmatpush1.bf16.msra.mxu0 %v3167_v5 }
  0xfa   : > { %v556_v19 = vmul.f32 %v545_v35, %v528_v15  ;;  %v557_v7 = vmul.f32 %v549_v55, %v527_v21  ;;  %v4209_v54 = vmul.f32 %v1228_v40, %v528_v15  ;;  %v4211_v36 = vmul.f32 %v1232_v63, %v527_v21 }
  0xfb   : > { %v609_v12 = vpop.permute.xlu1 %608  ;;  %v629_v22 = vrot.slane %v4201_v20, %v3950_v9  ;;  %v607_v23 = vpop.permute.xlu0 %606  ;;  %v1286_v44 = vrot.slane %v4207_v50, %v3948_v8  ;;  %v673_v55 = vrot.slane %v664_v61, %v3950_v9  ;;  %v1317_v40 = vrot.slane %v1312_v51, %v3948_v8 }
  0xfc   : > { %v3217_v45 = vpack.c.bf16 %v601_v33, %v557_v7  ;;  %v3219_v57 = vpack.c.bf16 %v600_v28, %v556_v19  ;;  %v617_v5 = vsel %vm614_vm7, %v607_v23, %v609_v12  ;;  %v669_v11 = vrot.slane %v664_v61, %v3948_v8 }
  0xfd   : > { %v1329_v15 = vrot.slane %v1312_v51, %v3956_v14  ;;  %v625_v28 = vrot.slane %v4201_v20, %v3948_v8  ;;  %v1298_v33 = vrot.slane %v4207_v50, %v3956_v14  ;;  %v643_v19 = vmul.f32 %v629_v22, %v617_v5 }
  0xfe   : > { %3218 = vmatprep.subr.bf16.mxu1 %v3217_v45  ;;  %v4235_v63 = vmul.f32 %v1286_v44, %v617_v5  ;;  %v677_v35 = vrot.slane %v664_v61, %v3990_v30  ;;  %v681_v49 = vrot.slane %v664_v61, %v3956_v14  ;;  %v1321_v44 = vrot.slane %v1312_v51, %v3950_v9 }
  0xff   : > { %3220 = vmatpush1.bf16.msra.mxu1 %v3219_v57  ;;  %v653_v10 = vpop.permute.xlu1 %652  ;;  %v651_v7 = vpop.permute.xlu0 %650  ;;  %v633_v61 = vrot.slane %v4201_v20, %v3990_v30 }
 0x100   : > { %v661_v21 = vsel %vm658_vm8, %v651_v7, %v653_v10 }
 0x101   : > { %v687_v45 = vmul.f32 %v673_v55, %v661_v21  ;;  %v4237_v57 = vmul.f32 %v1317_v40, %v661_v21  ;;  %v1325_v55 = vrot.slane %v1312_v51, %v3990_v30 }
 0x103   : > { %v657_v32 = vpop.permute.xlu1 %656  ;;  %v613_v18 = vpop.permute.xlu0 %612  ;;  %v3169_v25 = vpack.c.bf16 %v687_v45, %v643_v19  ;;  %v1294_v45 = vrot.slane %v4207_v50, %v3990_v30 }
 0x104   : > { %v662_v47 = vsel %vm658_vm8, %v657_v32, %v651_v7  ;;  %v618_v22 = vsel %vm614_vm7, %v613_v18, %v607_v23  ;;  %v637_v7 = vrot.slane %v4201_v20, %v3956_v14  ;;  %v1290_v23 = vrot.slane %v4207_v50, %v3950_v9 }
 0x105   : > { %v686_v40 = vmul.f32 %v669_v11, %v662_v47  ;;  %v4249_v5 = vmul.f32 %v1329_v15, %v662_v47  ;;  %v642_v21 = vmul.f32 %v625_v28, %v618_v22  ;;  %v4251_v19 = vmul.f32 %v1298_v33, %v618_v22  ;;  %3170 = vmatprep.subr.bf16.mxu0 %v3169_v25 }
 0x107   : > { %5282 = vst [vmem:[#allocation13_spill] sm:$0xff] %v4249_v5  ;;  %5283 = vst [vmem:[#allocation14_spill] sm:$0xff] %v4251_v19  ;;  %v655_v51 = vpop.permute.xlu1 %654  ;;  %v611_v11 = vpop.permute.xlu0 %610  ;;  %v3171_v47 = vpack.c.bf16 %v686_v40, %v642_v21 }
 0x108   : > { %v659_v25 = vsel %vm658_vm8, %v655_v51, %v657_v32  ;;  %v660_v28 = vsel %vm658_vm8, %v653_v10, %v655_v51  ;;  %v615_v20 = vsel %vm614_vm7, %v611_v11, %v613_v18  ;;  %v616_v33 = vsel %vm614_vm7, %v609_v12, %v611_v11  ;;  %v708_v10 = vld [vmem:[#allocation6 + $0x20] ss:$8 sm:$0xf]  ;;  %v752_v51 = vld [vmem:[#allocation6 + $0x21] ss:$8 sm:$0xf] }
 0x109   : > { %v688_v22 = vmul.f32 %v677_v35, %v660_v28  ;;  %v689_v50 = vmul.f32 %v681_v49, %v659_v25  ;;  %v4271_v53 = vmul.f32 %v1321_v44, %v660_v28  ;;  %v4273_v40 = vmul.f32 %v1325_v55, %v659_v25  ;;  %3172 = vmatpush1.bf16.msra.mxu0 %v3171_v47 }
 0x10a   : > { %v644_v21 = vmul.f32 %v633_v61, %v616_v33  ;;  %v645_v15 = vmul.f32 %v637_v7, %v615_v20  ;;  %v4275_v41 = vmul.f32 %v1290_v23, %v616_v33  ;;  %v4277_v32 = vmul.f32 %v1294_v45, %v615_v20 }
 0x10b   : > { %5284 = vst [vmem:[#allocation15_spill] sm:$0xff] %v4273_v40  ;;  %v697_v17 = vpop.permute.xlu1 %696  ;;  %v695_v18 = vpop.permute.xlu0 %694  ;;  %v717_v44 = vrot.slane %v708_v10, %v3950_v9  ;;  %v761_v55 = vrot.slane %v752_v51, %v3950_v9  ;;  %v757_v25 = vrot.slane %v752_v51, %v3948_v8  ;;  %v713_v28 = vrot.slane %v708_v10, %v3948_v8  ;;  %v884_v40 = vld [vmem:[#allocation6 + $0x24] ss:$8 sm:$0xf] }
 0x10c   : > { %5285 = vst [vmem:[#allocation16_spill] sm:$0xff] %v4277_v32  ;;  %v3221_v12 = vpack.c.bf16 %v689_v50, %v645_v15  ;;  %v3223_v35 = vpack.c.bf16 %v688_v22, %v644_v21  ;;  %v4289_v7 = vsel %vm702_vm9, %v695_v18, %v697_v17  ;;  %v725_v61 = vrot.slane %v708_v10, %v3956_v14 }
 0x10d   : > { %5286 = vst [vmem:[#allocation17_spill] sm:$0xff] %v4289_v7  ;;  %v731_v47 = vmul.f32 %v717_v44, %v4289_v7 }
 0x10e   : > { %3222 = vmatprep.subr.bf16.mxu1 %v3221_v12  ;;  %v765_v12 = vrot.slane %v752_v51, %v3990_v30 }
 0x10f   : > { %3224 = vmatpush1.bf16.msra.mxu1 %v3223_v35  ;;  %v741_v23 = vpop.permute.xlu1 %740  ;;  %v739_v45 = vpop.permute.xlu0 %738  ;;  %v769_v35 = vrot.slane %v752_v51, %v3956_v14 }
 0x110   : > { %v749_v11 = vsel %vm746_vm10, %v739_v45, %v741_v23 }
 0x111   : > { %v775_v15 = vmul.f32 %v761_v55, %v749_v11  ;;  %v721_v11 = vrot.slane %v708_v10, %v3990_v30 }
 0x113   : > { %v745_v20 = vpop.permute.xlu1 %744  ;;  %v701_v33 = vpop.permute.xlu0 %700  ;;  %v3173_v22 = vpack.c.bf16 %v775_v15, %v731_v47 }
 0x114   : > { %v750_v50 = vsel %vm746_vm10, %v745_v20, %v739_v45  ;;  %v4300_v21 = vsel %vm702_vm9, %v701_v33, %v695_v18 }
 0x115   : > { %5287 = vst [vmem:[#allocation18_spill] sm:$0xff] %v4300_v21  ;;  %v774_v44 = vmul.f32 %v757_v25, %v750_v50  ;;  %v730_v55 = vmul.f32 %v713_v28, %v4300_v21  ;;  %3174 = vmatprep.subr.bf16.mxu0 %v3173_v22 }
 0x117   : > { %v743_v47 = vpop.permute.xlu1 %742  ;;  %v699_v15 = vpop.permute.xlu0 %698  ;;  %v3175_v49 = vpack.c.bf16 %v774_v44, %v730_v55  ;;  %v796_v44 = vld [vmem:[#allocation6 + $0x22] ss:$8 sm:$0xf] }
 0x118   : > { %v747_v45 = vsel %vm746_vm10, %v743_v47, %v745_v20  ;;  %v748_v18 = vsel %vm746_vm10, %v741_v23, %v743_v47  ;;  %v4313_v51 = vsel %vm702_vm9, %v699_v15, %v701_v33  ;;  %v4317_v25 = vsel %vm702_vm9, %v697_v17, %v699_v15  ;;  %v840_v20 = vld [vmem:[#allocation6 + $0x23] ss:$8 sm:$0xf] }
 0x119   : > { %5288 = vst [vmem:[#allocation19_spill] sm:$0xff] %v4313_v51  ;;  %v776_v28 = vmul.f32 %v765_v12, %v748_v18  ;;  %v777_v22 = vmul.f32 %v769_v35, %v747_v45  ;;  %v732_v10 = vmul.f32 %v721_v11, %v4317_v25  ;;  %v733_v50 = vmul.f32 %v725_v61, %v4313_v51 }
 0x11a   : > { %3176 = vmatpush1.bf16.msra.mxu0 %v3175_v49  ;;  %v805_v32 = vrot.slane %v796_v44, %v3950_v9  ;;  %v849_v17 = vrot.slane %v840_v20, %v3950_v9  ;;  %v845_v45 = vrot.slane %v840_v20, %v3948_v8  ;;  %v801_v18 = vrot.slane %v796_v44, %v3948_v8 }
 0x11b   : > { %v785_v55 = vpop.permute.xlu1 %784  ;;  %v783_v23 = vpop.permute.xlu0 %782  ;;  %v3225_v47 = vpack.c.bf16 %v777_v22, %v733_v50  ;;  %v3227_v33 = vpack.c.bf16 %v776_v28, %v732_v10  ;;  %v857_v51 = vrot.slane %v840_v20, %v3956_v14 }
 0x11c   : > { %v793_v12 = vsel %vm790_vm11, %v783_v23, %v785_v55 }
 0x11d   : > { %3226 = vmatprep.subr.bf16.mxu1 %v3225_v47  ;;  %v819_v11 = vmul.f32 %v805_v32, %v793_v12  ;;  %v809_v12 = vrot.slane %v796_v44, %v3990_v30 }
 0x11e   : > { %3228 = vmatpush1.bf16.msra.mxu1 %v3227_v33  ;;  %v853_v33 = vrot.slane %v840_v20, %v3990_v30 }
 0x11f   : > { %v829_v49 = vpop.permute.xlu1 %828  ;;  %v827_v61 = vpop.permute.xlu0 %826 }
 0x120   : > { %v837_v35 = vsel %vm834_vm12, %v827_v61, %v829_v49 }
 0x121   : > { %v863_v15 = vmul.f32 %v849_v17, %v837_v35  ;;  %v813_v35 = vrot.slane %v796_v44, %v3956_v14 }
 0x123   : > { %v833_v28 = vpop.permute.xlu1 %832  ;;  %v789_v22 = vpop.permute.xlu0 %788  ;;  %v3177_v10 = vpack.c.bf16 %v863_v15, %v819_v11 }
 0x124   : > { %v838_v50 = vsel %vm834_vm12, %v833_v28, %v827_v61  ;;  %v794_v47 = vsel %vm790_vm11, %v789_v22, %v783_v23  ;;  %v893_v61 = vrot.slane %v884_v40, %v3950_v9 }
 0x125   : > { %v862_v32 = vmul.f32 %v845_v45, %v838_v50  ;;  %v818_v17 = vmul.f32 %v801_v18, %v794_v47  ;;  %3178 = vmatprep.subr.bf16.mxu0 %v3177_v10 }
 0x127   : > { %v831_v21 = vpop.permute.xlu1 %830  ;;  %v787_v11 = vpop.permute.xlu0 %786  ;;  %v3179_v15 = vpack.c.bf16 %v862_v32, %v818_v17 }
 0x128   : > { %v835_v23 = vsel %vm834_vm12, %v831_v21, %v833_v28  ;;  %v836_v20 = vsel %vm834_vm12, %v829_v49, %v831_v21  ;;  %v791_v45 = vsel %vm790_vm11, %v787_v11, %v789_v22  ;;  %v792_v18 = vsel %vm790_vm11, %v785_v55, %v787_v11 }
 0x129   : > { %v864_v44 = vmul.f32 %v853_v33, %v836_v20  ;;  %v865_v10 = vmul.f32 %v857_v51, %v835_v23  ;;  %v820_v50 = vmul.f32 %v809_v12, %v792_v18  ;;  %v821_v47 = vmul.f32 %v813_v35, %v791_v45  ;;  %3180 = vmatpush1.bf16.msra.mxu0 %v3179_v15  ;;  %v932_v23 = vld [vmem:[#allocation6 + $0x26] ss:$8 sm:$0xf] }
 0x12a   : > { %v897_v21 = vrot.slane %v884_v40, %v3990_v30  ;;  %v889_v49 = vrot.slane %v884_v40, %v3948_v8  ;;  %v901_v55 = vrot.slane %v884_v40, %v3956_v14  ;;  %v976_v40 = vld [vmem:[#allocation6 + $0x27] ss:$8 sm:$0xf]  ;;  %v941_v18 = vrot.slane %v932_v23, %v3950_v9 }
 0x12b   : > { %v873_v32 = vpop.permute.xlu1 %872  ;;  %v871_v17 = vpop.permute.xlu0 %870  ;;  %v3229_v7 = vpack.c.bf16 %v865_v10, %v821_v47  ;;  %v3231_v19 = vpack.c.bf16 %v864_v44, %v820_v50  ;;  %v985_v44 = vrot.slane %v976_v40, %v3950_v9 }
 0x12c   : > { %v881_v28 = vsel %vm5239_vm13, %v871_v17, %v873_v32 }
 0x12d   : > { %v907_v5 = vmul.f32 %v893_v61, %v881_v28  ;;  %3230 = vmatprep.subr.bf16.mxu1 %v3229_v7 }
 0x12e   : > { %3232 = vmatpush1.bf16.msra.mxu1 %v3231_v19 }
 0x12f   : > { %v875_v51 = vpop.permute.xlu1 %874  ;;  %v877_v22 = vpop.permute.xlu0 %876  ;;  %v3181_v33 = vpack.c.bf16 %v3824_v1, %v907_v5 }
 0x130   : > { %v880_v12 = vsel %vm5239_vm13, %v873_v32, %v875_v51  ;;  %v879_v35 = vsel %vm5239_vm13, %v875_v51, %v877_v22  ;;  %v882_v7 = vsel %vm5239_vm13, %v877_v22, %v871_v17  ;;  %v937_v17 = vrot.slane %v932_v23, %v3948_v8 }
 0x131   : > { %v908_v11 = vmul.f32 %v897_v21, %v880_v12  ;;  %v906_v15 = vmul.f32 %v889_v49, %v882_v7  ;;  %v909_v61 = vmul.f32 %v901_v55, %v879_v35  ;;  %3182 = vmatprep.subr.bf16.mxu0 %v3181_v33  ;;  %v989_v22 = vrot.slane %v976_v40, %v3990_v30 }
 0x132   : > { %v993_v33 = vrot.slane %v976_v40, %v3956_v14  ;;  %v945_v7 = vrot.slane %v932_v23, %v3990_v30  ;;  %vm5258_vm13 = vcmp.lt.s32.totalorder %v3940_v6, 120 }
 0x133   : > { %v923_v19 = vpop.permute.xlu1 %922  ;;  %v921_v20 = vpop.permute.xlu0 %920  ;;  %v3183_v1 = vpack.c.bf16 %v3817_v0, %v906_v15  ;;  %v3233_v5 = vpack.c.bf16 %v3831_v2, %v909_v61  ;;  %v3235_v45 = vpack.c.bf16 %v3838_v3, %v908_v11  ;;  %v981_v3 = vrot.slane %v976_v40, %v3948_v8 }
 0x134   : > { %v928_v10 = vsel %vm5259_vm14, %v921_v20, %v923_v19  ;;  %v949_v11 = vrot.slane %v932_v23, %v3956_v14  ;;  %v1020_v23 = vld [vmem:[#allocation6 + $0x40] ss:$8 sm:$0xf] }
 0x135   : > { %3184 = vmatpush1.bf16.msra.mxu0 %v3183_v1  ;;  %3234 = vmatprep.subr.bf16.mxu1 %v3233_v5  ;;  %v955_v2 = vmul.f32 %v941_v18, %v928_v10 }
 0x136   : > { %3236 = vmatpush1.bf16.msra.mxu1 %v3235_v45 }
 0x137   : > { %v967_v50 = vpop.permute.xlu1 %966  ;;  %v965_v47 = vpop.permute.xlu0 %964 }
 0x138   : > { %v972_v0 = vsel %vm5240_vm15, %v965_v47, %v967_v50 }
 0x139   : > { %v999_v32 = vmul.f32 %v985_v44, %v972_v0  ;;  %v1064_v0 = vld [vmem:[#allocation6 + $0x41] ss:$8 sm:$0xf] }
 0x13b   : > { %v963_v28 = vpop.permute.xlu1 %962  ;;  %v919_v21 = vpop.permute.xlu0 %918  ;;  %v3185_v49 = vpack.c.bf16 %v999_v32, %v955_v2 }
 0x13c   : > { %v973_v55 = vsel %vm5240_vm15, %v963_v28, %v965_v47  ;;  %v929_v51 = vsel %vm5259_vm14, %v919_v21, %v921_v20 }
 0x13d   : > { %v998_v12 = vmul.f32 %v981_v3, %v973_v55  ;;  %v954_v35 = vmul.f32 %v937_v17, %v929_v51  ;;  %3186 = vmatprep.subr.bf16.mxu0 %v3185_v49  ;;  %v1029_v17 = vrot.slane %v1020_v23, %v3950_v9 }
 0x13f   : > { %v969_v15 = vpop.permute.xlu1 %968  ;;  %v925_v61 = vpop.permute.xlu0 %924  ;;  %v3187_v1 = vpack.c.bf16 %v998_v12, %v954_v35  ;;  %v1025_v12 = vrot.slane %v1020_v23, %v3948_v8 }
 0x140   : > { %v971_v5 = vsel %vm5240_vm15, %v967_v50, %v969_v15  ;;  %v974_v20 = vsel %vm5240_vm15, %v969_v15, %v963_v28  ;;  %v927_v45 = vsel %vm5259_vm14, %v923_v19, %v925_v61  ;;  %v930_v40 = vsel %vm5259_vm14, %v925_v61, %v919_v21 }
 0x141   : > { %v1000_v18 = vmul.f32 %v989_v22, %v971_v5  ;;  %v1001_v44 = vmul.f32 %v993_v33, %v974_v20  ;;  %v956_v10 = vmul.f32 %v945_v7, %v927_v45  ;;  %v957_v47 = vmul.f32 %v949_v11, %v930_v40  ;;  %3188 = vmatpush1.bf16.msra.mxu0 %v3187_v1 }
 0x142   : > { %vm5257_vm15 = vcmp.lt.s32.totalorder %v3940_v6, 119  ;;  %v1073_v19 = vrot.slane %v1064_v0, %v3950_v9  ;;  %v1069_v33 = vrot.slane %v1064_v0, %v3948_v8  ;;  %v1077_v1 = vrot.slane %v1064_v0, %v3990_v30 }
 0x143   : > { %v1011_v2 = vpop.permute.xlu1 %1010  ;;  %v1009_v50 = vpop.permute.xlu0 %1008  ;;  %v3237_v32 = vpack.c.bf16 %v1001_v44, %v957_v47  ;;  %v3239_v3 = vpack.c.bf16 %v1000_v18, %v956_v10  ;;  %v1081_v5 = vrot.slane %v1064_v0, %v3956_v14  ;;  %v1033_v40 = vrot.slane %v1020_v23, %v3990_v30 }
 0x144   : > { %v1016_v28 = vsel %vm5258_vm13, %v1009_v50, %v1011_v2  ;;  %v1037_v18 = vrot.slane %v1020_v23, %v3956_v14  ;;  %v5289_v23 = vpack.c.bf16 %v4034_v58, %v4036_v59  ;;  %v5293_v58 = vpack.c.bf16 %v4088_v39, %v4086_v37 }
 0x145   : > { %3238 = vmatprep.subr.bf16.mxu1 %v3237_v32  ;;  %v1043_v51 = vmul.f32 %v1029_v17, %v1016_v28  ;;  %v5294_v59 = vpack.c.bf16 %v4203_v38, %v4209_v54  ;;  %v5298_v37 = vpack.c.bf16 %v4271_v53, %v4275_v41  ;;  %v5299_v39 = vpack.c.bf16 %v4135_v27, %v4141_v34  ;;  %v5303_v53 = vld [vmem:[#allocation13_spill] sm:$0xff]  ;;  %v5304_v27 = vld [vmem:[#allocation14_spill] sm:$0xff] }
 0x146   : > { %3240 = vmatpush1.bf16.msra.mxu1 %v3239_v3  ;;  %v5302_v41 = vpack.c.bf16 %v4205_v46, %v4211_v36  ;;  %v5305_v34 = vpack.c.bf16 %v5303_v53, %v5304_v27  ;;  %v5307_v38 = vld [vmem:[#allocation18_spill] sm:$0xff]  ;;  %v5311_v46 = vld [vmem:[#allocation19_spill] sm:$0xff] }
 0x147   : > { %v1055_v21 = vpop.permute.xlu1 %1054  ;;  %v1053_v49 = vpop.permute.xlu0 %1052 }
 0x148   : > { %v1060_v55 = vsel %vm5257_vm15, %v1053_v49, %v1055_v21 }
 0x149   : > { %v1087_v22 = vmul.f32 %v1073_v19, %v1060_v55 }
 0x14b   : > { %v1051_v35 = vpop.permute.xlu1 %1050  ;;  %v1007_v7 = vpop.permute.xlu0 %1006  ;;  %v3189_v11 = vpack.c.bf16 %v1087_v22, %v1043_v51  ;;  %v5290_v51 = vpack.c.bf16 %v3992_v31, %v3988_v29  ;;  %v5292_v22 = vpack.c.bf16 %v4008_v42, %v4010_v43  ;;  %v5295_v29 = vpack.c.bf16 %v4055_v16, %v4048_v4 }
 0x14c   : > { %v1061_v15 = vsel %vm5257_vm15, %v1051_v35, %v1053_v49  ;;  %v1017_v61 = vsel %vm5258_vm13, %v1007_v7, %v1009_v50  ;;  %v5296_v31 = vpack.c.bf16 %v4106_v56, %v4108_v62  ;;  %v5297_v43 = vpack.c.bf16 %v4167_v60, %v4165_v13  ;;  %v5306_v13 = vld [vmem:[#allocation17_spill] sm:$0xff] }
 0x14d   : > { %v1086_v20 = vmul.f32 %v1069_v33, %v1061_v15  ;;  %v1042_v45 = vmul.f32 %v1025_v12, %v1017_v61  ;;  %3190 = vmatprep.subr.bf16.mxu0 %v3189_v11  ;;  %v5300_v4 = vpack.c.bf16 %v4179_v48, %v4181_v52  ;;  %v5301_v62 = vpack.c.bf16 %v4237_v57, %v4235_v63  ;;  %v1373_v48 = vld [vmem:[%s5204_s1] sm:$0xff]  ;;  %v5308_v63 = vld [vmem:[#allocation15_spill] sm:$0xff]  ;;  %v5309_v57 = vld [vmem:[#allocation16_spill] sm:$0xff] }
 0x14f   : > { %v1057_v44 = vpop.permute.xlu1 %1056  ;;  %v1013_v10 = vpop.permute.xlu0 %1012  ;;  %v3191_v47 = vpack.c.bf16 %v1086_v20, %v1042_v45 }
 0x150   : > { %v1059_v32 = vsel %vm5257_vm15, %v1055_v21, %v1057_v44  ;;  %v1062_v50 = vsel %vm5257_vm15, %v1057_v44, %v1051_v35  ;;  %v1015_v3 = vsel %vm5258_vm13, %v1011_v2, %v1013_v10  ;;  %v1018_v0 = vsel %vm5258_vm13, %v1013_v10, %v1007_v7 }
 0x151   : > { %v1088_v17 = vmul.f32 %v1077_v1, %v1059_v32  ;;  %v1089_v19 = vmul.f32 %v1081_v5, %v1062_v50  ;;  %v1044_v28 = vmul.f32 %v1033_v40, %v1015_v3  ;;  %v1045_v49 = vmul.f32 %v1037_v18, %v1018_v0  ;;  %3192 = vmatpush1.bf16.msra.mxu0 %v3191_v47 }
 0x152   : > { %3194 = vmatprep.subr.bf16.mxu0 %v5289_v23  ;;  %v5291_v2 = vpack.c.bf16 %v4133_v24, %v4139_v26  ;;  %v1343_v24 = vld [vmem:[#allocation6 + $0x62] ss:$8 sm:$0xf] }
 0x153   : > { %v3241_v55 = vpack.c.bf16 %v1089_v19, %v1045_v49  ;;  %v3243_v21 = vpack.c.bf16 %v1088_v17, %v1044_v28  ;;  %v1352_v42 = vrot.slane %v1343_v24, %v3950_v9  ;;  %v1348_v16 = vrot.slane %v1343_v24, %v3948_v8 }
 0x154   : > { %v1360_v26 = vrot.slane %v1343_v24, %v3956_v14  ;;  %v1356_v52 = vrot.slane %v1343_v24, %v3990_v30 }
 0x155   : > { %3196 = vmatpush1.bf16.msra.mxu0 %v5290_v51  ;;  %3242 = vmatprep.subr.bf16.mxu1 %v3241_v55  ;;  %v1366_v56 = vmul.f32 %v1352_v42, %v4317_v25  ;;  %v1365_v60 = vmul.f32 %v1348_v16, %v5306_v13  ;;  %v5310_v25 = vpack.c.bf16 %v5308_v63, %v5309_v57  ;;  %v3616_v55 = vmov 0  }
 0x156   : > { %3198 = vmatprep.subr.bf16.mxu0 %v5291_v2  ;;  %3244 = vmatpush1.bf16.msra.mxu1 %v3243_v21  ;;  %v1368_v54 = vmul.f32 %v1360_v26, %v5307_v38  ;;  %v1367_v36 = vmul.f32 %v1356_v52, %v5311_v46  ;;  %v1687_v21 = vld [vmem:[%s5207_s4] sm:$0xff] }
 0x157   : > { %3246 = vmatprep.subr.bf16.mxu1 %v5292_v22  ;;  %3456 = vset.pattern.permute.xlu0 %v3616_v55 }
 0x158   : > { %3455 = vset.pattern.permute.xlu1 %v3616_v55 }
 0x159   : > { %3200 = vmatpush1.bf16.msra.mxu0 %v5293_v58 }
 0x15a   : > { %3202 = vmatprep.subr.bf16.mxu0 %v5294_v59  ;;  %3248 = vmatpush1.bf16.msra.mxu1 %v5295_v29 }
 0x15b   : > { %3250 = vmatprep.subr.bf16.mxu1 %v5296_v31 }
 0x15d   : > { %3204 = vmatpush1.bf16.msra.mxu0 %v5297_v43 }
 0x15e   : > { %3206 = vmatprep.subr.bf16.mxu0 %v5298_v37  ;;  %3252 = vmatpush1.bf16.msra.mxu1 %v5299_v39  ;;  %v1675_v37 = vld [vmem:[%s5206_s3] sm:$0xff] }
 0x15f   : > { %3254 = vmatprep.subr.bf16.mxu1 %v5300_v4 }
 0x161   : > { %3208 = vmatpush1.bf16.msra.mxu0 %v5301_v62 }
 0x162   : > { %1539 = vmatprep.subr.mxu0 %v1366_v56  ;;  %3256 = vmatpush1.bf16.msra.mxu1 %v5302_v41 }
 0x163   : > { %3258 = vmatprep.subr.bf16.mxu1 %v5305_v34 }
 0x165   : > { %1540 = vmatpush1.msra.mxu0 %v1365_v60 }
 0x166   : > { %3260 = vmatpush1.bf16.msra.mxu1 %v5310_v25  ;;  %1552 = vmatmul.mubr.f32.vlgmr.msra.gmra.mrb[0].mxu0 %v1373_v48 }
 0x167   : > { %1610 = vmatprep.subr.mxu1 %v1368_v54 }
 0x16a   : > { %1611 = vmatpush1.msra.mxu1 %v1367_v36 }
 0x16b   : > { %1623 = vmatmul.mubr.f32.vlgmr.msra.gmra.mrb[0].mxu1 %v1373_v48 }
 0x239   : > { %v4475_v33 = vpop.f32.mrb[0].mxu0 }
 0x23a   : > { %v1641_v12 = vmul.f32 %v4475_v33, %v4475_v33  ;;  %v1555_v35 = vpop.f32.mrb[1].mxu0 }
 0x23b   : > { %v1629_v7 = vadd.f32 %v1555_v35, %v4475_v33  ;;  %v1642_v11 = vmul.f32 %v1555_v35, %v1555_v35 }
 0x23d   : > { %v1645_v15 = vadd.f32 %v1642_v11, %v1641_v12  ;;  %v2427_v11 = vld [vmem:[#allocation6 + $0x42] ss:$8 sm:$0xf] }
 0x23e   : > { %v1624_v61 = vpop.f32.mrb[0].mxu1 }
 0x23f   : > { %v1643_v1 = vmul.f32 %v1624_v61, %v1624_v61  ;;  %v4480_v5 = vpop.f32.mrb[1].mxu1  ;;  %v1630_v20 = vadd.f32 %v1629_v7, %v1624_v61  ;;  %v1721_v7 = vld [vmem:[#allocation6] ss:$8 sm:$0xf] }
 0x240   : > { %v1644_v45 = vmul.f32 %v4480_v5, %v4480_v5  ;;  %v1726_v55 = vrot.slane %v1721_v7, %v3948_v8 }
 0x241   : > { %v1631_v40 = vadd.f32 %v1630_v20, %v4480_v5  ;;  %v1646_v18 = vadd.f32 %v1645_v15, %v1643_v1  ;;  %v1763_v15 = vld [vmem:[#allocation6 + $0x1] ss:$8 sm:$0xf]  ;;  %v1730_v20 = vrot.slane %v1721_v7, %v3950_v9 }
 0x243   : > { %1632 = vadd.xlane.f32.xlu0 %v1631_v40  ;;  %v1647_v44 = vadd.f32 %v1646_v18, %v1644_v45  ;;  %v2432_v45 = vrot.slane %v2427_v11, %v3948_v8  ;;  %v1772_v40 = vrot.slane %v1763_v15, %v3950_v9 }
 0x245   : > { %1648 = vadd.xlane.f32.xlu1 %v1647_v44 }
 0x256   : > { %1690 = vperm.xlu1 %3455, %v1687_v21   ;;  %v2444_v21 = vrot.slane %v2427_v11, %v3956_v14 }
 0x2d0   : > { %v1633_v10 = vpop.xlane.xlu0 %1632 }
 0x2d1   : > { %v1634_v47 = vrot.slane %v1633_v10, 4 }
 0x2d2   : > { %v1649_v32 = vpop.xlane.xlu1 %1648 }
 0x2d3   : > { %v1635_v50 = vadd.f32 %v1634_v47, %v1633_v10  ;;  %v1650_v3 = vrot.slane %v1649_v32, 4 }
 0x2d5   : > { %v1636_v0 = vrot.slane %v1635_v50, 2  ;;  %v1651_v17 = vadd.f32 %v1650_v3, %v1649_v32 }
 0x2d6   : > { %v1691_v56 = vpop.permute.xlu1 %1690 }
 0x2d7   : > { %v1652_v19 = vrot.slane %v1651_v17, 2  ;;  %v1637_v28 = vadd.f32 %v1636_v0, %v1635_v50 }
 0x2d9   : > { %v1638_v49 = vrot.slane %v1637_v28, 1  ;;  %v1653_v23 = vadd.f32 %v1652_v19, %v1651_v17 }
 0x2db   : > { %v1639_v51 = vadd.f32 %v1638_v49, %v1637_v28  ;;  %v1654_v2 = vrot.slane %v1653_v23, 1 }
 0x2dd   : > { %3365 = vpush %v1639_v51  ;;  %v1655_v22 = vadd.f32 %v1654_v2, %v1653_v23  ;;  %v1768_v51 = vrot.slane %v1763_v15, %v3948_v8 }
 0x2df   : > { %3367 = vpush %v1655_v22  ;;  %v1734_v22 = vrot.slane %v1721_v7, %v3990_v30 }
 0x30e   : > { %s3366_s22 = spop %3365 }
 0x30f   : > { %s1659_s10 = smul.f32 0.00048828125, %s3366_s22  ;;  %s5321_s22 = smov 7  }
 0x310   : > { %s3368_s15 = spop %3367 }
 0x311   : > { %s1663_s25 = smul.f32 %s1659_s10, %s1659_s10  ;;  %v1670_v58 = vstv %s1659_s10 }
 0x312   : > { %v1671_v59 = vsub.f32 %v4475_v33, %v1670_v58  ;;  %v1672_v29 = vsub.f32 %v1555_v35, %v1670_v58  ;;  %v1673_v31 = vsub.f32 %v1624_v61, %v1670_v58  ;;  %v1674_v24 = vsub.f32 %v4480_v5, %v1670_v58  ;;  %s1662_s14 = smul.f32 0.00048828125, %s3368_s15  ;;  %s5319_s15 = smov 9   ;;  %v2457_v61 = vld [vmem:[#allocation6 + $0x43] ss:$8 sm:$0xf] }
 0x313   : > { %v2462_v18 = vrot.slane %v2457_v61, %v3948_v8  ;;  %v2474_v2 = vrot.slane %v2457_v61, %v3956_v14  ;;  %v2436_v58 = vrot.slane %v2427_v11, %v3950_v9 }
 0x314   : > { %s1664_s26 = ssub.f32 %s1662_s14, %s1663_s25  ;;  %s5315_s14 = smov 63  }
 0x315   : > { %s5317_s25 = smov 56  }
 0x316   : > { %s1665_s19 = smax.f32 %s3617_s17, %s1664_s26  ;;  %s5320_s26 = smov 8  }
 0x317   : > { %s1666_s13 = sadd.f32 1e-05, %s1665_s19  ;;  %s5314_s19 = smov 64  }
 0x319   : > { %v1667_v42 = vstv %s1666_s13  ;;  %s5312_s13 = smov 65  }
 0x31a   : > { %3457 = vrsqrt.f32 %v1667_v42 }
 0x324   : > { %v3458_v43 = vpop.eup %3457 }
 0x325   : > { %3369 = vpush %v3458_v43  ;;  %v1776_v43 = vrot.slane %v1763_v15, %v3990_v30 }
 0x356   : > { %s3370_s10 = spop %3369 }
 0x357   : > { %v1676_v39 = vstv %s3370_s10  ;;  %s5322_s10 = smov 1  }
 0x358   : > { %v1677_v4 = vmul.f32 %v1676_v39, %v1675_v37  ;;  %v1780_v37 = vrot.slane %v1763_v15, %v3956_v14  ;;  %v2466_v39 = vrot.slane %v2457_v61, %v3950_v9 }
 0x35a   : > { %1680 = vperm.xlu0 %3456, %v1677_v4  }
 0x3d9   : > { %v1681_v16 = vpop.permute.xlu0 %1680 }
 0x3da   : > { %v1683_v62 = vmul.f32 %v1681_v16, %v1671_v59  ;;  %v1684_v26 = vmul.f32 %v1681_v16, %v1672_v29  ;;  %v1685_v41 = vmul.f32 %v1681_v16, %v1673_v31  ;;  %v1686_v48 = vmul.f32 %v1681_v16, %v1674_v24 }
 0x3db   : > { %v1738_v59 = vrot.slane %v1721_v7, %v3956_v14  ;;  %v2440_v31 = vrot.slane %v2427_v11, %v3990_v30 }
 0x3dc   : > { %v1693_v53 = vadd.f32 %v1691_v56, %v1683_v62  ;;  %v1695_v27 = vadd.f32 %v1691_v56, %v1685_v41  ;;  %v1694_v34 = vadd.f32 %v1691_v56, %v1684_v26  ;;  %v1696_v63 = vadd.f32 %v1691_v56, %v1686_v48 }
 0x3dd   : > { %v2470_v62 = vrot.slane %v2457_v61, %v3990_v30 }
 0x3de   : > { %vm1697_vm15 = vcmp.ge.f32.partialorder %v1693_v53, 0.0  ;;  %vm1699_vm13 = vcmp.ge.f32.partialorder %v1695_v27, 0.0  ;;  %v1701_v13 = vmul.f32 0.1, %v1693_v53  ;;  %v1703_v60 = vmul.f32 0.1, %v1695_v27 }
 0x3df   : > { %v1702_v52 = vmul.f32 0.1, %v1694_v34  ;;  %vm1698_vm14 = vcmp.ge.f32.partialorder %v1694_v34, 0.0  ;;  %v1704_v25 = vmul.f32 0.1, %v1696_v63 }
 0x3e0   : > { %v4494_v38 = vsel %vm1697_vm15, %v1693_v53, %v1701_v13  ;;  %v4496_v54 = vsel %vm1699_vm13, %v1695_v27, %v1703_v60  ;;  %vm1700_vm15 = vcmp.ge.f32.partialorder %v1696_v63, 0.0  ;;  %vm5350_vm13 = vcmp.lt.s32.totalorder %v3940_v6, 119 }
 0x3e1   : > { %1713 = vrot.lane.b32.xlu0 %v4496_v54, %s3600_s21  ;;  %1709 = vrot.lane.b32.xlu1 %v4494_v38, %s3600_s21  ;;  %v4502_v57 = vsel %vm1698_vm14, %v1694_v34, %v1702_v52  ;;  %v4512_v46 = vsel %vm1700_vm15, %v1696_v63, %v1704_v25  ;;  %vm5352_vm15 = vmmov %vm5350_vm13 }
 0x3e5   : > { %1793 = vrot.lane.b32.xlu0 %v4494_v38, %s3601_s11  ;;  %1711 = vrot.lane.b32.xlu1 %v4502_v57, %s3600_s21 }
 0x3e9   : > { %1835 = vrot.lane.b32.xlu0 %v4494_v38, %s5312_s13  ;;  %1751 = vrot.lane.b32.xlu1 %v4494_v38, %s5313_s18 }
 0x3ed   : > { %1799 = vrot.lane.b32.xlu0 %v4512_v46, %s3601_s11  ;;  %1753 = vrot.lane.b32.xlu1 %v4502_v57, %s5313_s18 }
 0x3f1   : > { %1797 = vrot.lane.b32.xlu0 %v4496_v54, %s3601_s11  ;;  %1715 = vrot.lane.b32.xlu1 %v4512_v46, %s3600_s21  ;;  %s5316_s21 = smov 57  }
 0x3f5   : > { %1877 = vrot.lane.b32.xlu0 %v4494_v38, %s5314_s19  ;;  %1757 = vrot.lane.b32.xlu1 %v4512_v46, %s5313_s18 }
 0x3f9   : > { %1919 = vrot.lane.b32.xlu0 %v4494_v38, %s5315_s14  ;;  %1755 = vrot.lane.b32.xlu1 %v4496_v54, %s5313_s18  ;;  %s5324_s18 = smov 121  }
 0x3fd   : > { %1883 = vrot.lane.b32.xlu0 %v4512_v46, %s5314_s19  ;;  %1795 = vrot.lane.b32.xlu1 %v4502_v57, %s3601_s11  ;;  %s5318_s11 = smov 55  }
 0x401   : > { %1881 = vrot.lane.b32.xlu0 %v4496_v54, %s5314_s19  ;;  %1837 = vrot.lane.b32.xlu1 %v4502_v57, %s5312_s13 }
 0x405   : > { %1961 = vrot.lane.b32.xlu0 %v4494_v38, %s5316_s21  ;;  %1841 = vrot.lane.b32.xlu1 %v4512_v46, %s5312_s13 }
 0x409   : > { %2003 = vrot.lane.b32.xlu0 %v4494_v38, %s5317_s25  ;;  %1839 = vrot.lane.b32.xlu1 %v4496_v54, %s5312_s13  ;;  %s5323_s13 = smov 127  }
 0x40d   : > { %1967 = vrot.lane.b32.xlu0 %v4512_v46, %s5316_s21  ;;  %1879 = vrot.lane.b32.xlu1 %v4502_v57, %s5314_s19  ;;  %s5325_s19 = smov 120  }
 0x411   : > { %1965 = vrot.lane.b32.xlu0 %v4496_v54, %s5316_s21  ;;  %1921 = vrot.lane.b32.xlu1 %v4502_v57, %s5315_s14 }
 0x415   : > { %2045 = vrot.lane.b32.xlu0 %v4494_v38, %s5318_s11  ;;  %1925 = vrot.lane.b32.xlu1 %v4512_v46, %s5315_s14 }
 0x419   : > { %2087 = vrot.lane.b32.xlu0 %v4494_v38, %s5319_s15  ;;  %1923 = vrot.lane.b32.xlu1 %v4496_v54, %s5315_s14  ;;  %s5326_s14 = smov 119  }
 0x41d   : > { %2051 = vrot.lane.b32.xlu0 %v4512_v46, %s5318_s11  ;;  %1963 = vrot.lane.b32.xlu1 %v4502_v57, %s5316_s21 }
 0x421   : > { %2049 = vrot.lane.b32.xlu0 %v4496_v54, %s5318_s11  ;;  %2005 = vrot.lane.b32.xlu1 %v4502_v57, %s5317_s25 }
 0x425   : > { %2129 = vrot.lane.b32.xlu0 %v4494_v38, %s5320_s26  ;;  %2009 = vrot.lane.b32.xlu1 %v4512_v46, %s5317_s25 }
 0x429   : > { %2171 = vrot.lane.b32.xlu0 %v4494_v38, %s5321_s22  ;;  %2007 = vrot.lane.b32.xlu1 %v4496_v54, %s5317_s25 }
 0x42d   : > { %2135 = vrot.lane.b32.xlu0 %v4512_v46, %s5320_s26  ;;  %2047 = vrot.lane.b32.xlu1 %v4502_v57, %s5318_s11 }
 0x431   : > { %2133 = vrot.lane.b32.xlu0 %v4496_v54, %s5320_s26  ;;  %2089 = vrot.lane.b32.xlu1 %v4502_v57, %s5319_s15 }
 0x435   : > { %2213 = vrot.lane.b32.xlu0 %v4494_v38, %s5322_s10  ;;  %2093 = vrot.lane.b32.xlu1 %v4512_v46, %s5319_s15 }
 0x439   : > { %2219 = vrot.lane.b32.xlu0 %v4512_v46, %s5322_s10  ;;  %2091 = vrot.lane.b32.xlu1 %v4496_v54, %s5319_s15 }
 0x43d   : > { %2261 = vrot.lane.b32.xlu0 %v4502_v57, %s5323_s13  ;;  %2131 = vrot.lane.b32.xlu1 %v4502_v57, %s5320_s26 }
 0x441   : > { %2303 = vrot.lane.b32.xlu0 %v4502_v57, %s5324_s18  ;;  %2173 = vrot.lane.b32.xlu1 %v4502_v57, %s5321_s22 }
 0x445   : > { %2259 = vrot.lane.b32.xlu0 %v4494_v38, %s5323_s13  ;;  %2177 = vrot.lane.b32.xlu1 %v4512_v46, %s5321_s22 }
 0x449   : > { %2265 = vrot.lane.b32.xlu0 %v4512_v46, %s5323_s13  ;;  %2175 = vrot.lane.b32.xlu1 %v4496_v54, %s5321_s22 }
 0x44d   : > { %2345 = vrot.lane.b32.xlu0 %v4502_v57, %s5325_s19  ;;  %2215 = vrot.lane.b32.xlu1 %v4502_v57, %s5322_s10 }
 0x451   : > { %2387 = vrot.lane.b32.xlu0 %v4502_v57, %s5326_s14  ;;  %2217 = vrot.lane.b32.xlu1 %v4496_v54, %s5322_s10 }
 0x453   : > { %v1714_v36 = vpop.permute.xlu0 %1713  ;;  %v1710_v33 = vpop.permute.xlu1 %1709 }
 0x455   : > { %2343 = vrot.lane.b32.xlu0 %v4494_v38, %s5325_s19  ;;  %2263 = vrot.lane.b32.xlu1 %v4496_v54, %s5323_s13 }
 0x457   : > { %v4622_v12 = vpop.permute.xlu0 %1793  ;;  %v1712_v35 = vpop.permute.xlu1 %1711 }
 0x458   : > { %v1719_v44 = vsel %vm351_vm1, %v1710_v33, %v1712_v35  ;;  %v1718_v4 = vsel %vm351_vm1, %v1712_v35, %v1714_v36 }
 0x459   : > { %2349 = vrot.lane.b32.xlu0 %v4512_v46, %s5325_s19  ;;  %2305 = vrot.lane.b32.xlu1 %v4496_v54, %s5324_s18  ;;  %v1744_v50 = vmul.f32 %v1730_v20, %v1719_v44  ;;  %v4642_v3 = vmul.f32 %v2432_v45, %v1719_v44  ;;  %v1745_v34 = vmul.f32 %v1734_v22, %v1718_v4  ;;  %v4702_v20 = vld [vmem:[#allocation6 + $0x45] ss:$8 sm:$0xf] }
 0x45a   : > { %v4682_v13 = vmul.f32 %v2436_v58, %v1718_v4 }
 0x45b   : > { %v4628_v1 = vpop.permute.xlu0 %1835  ;;  %v1752_v5 = vpop.permute.xlu1 %1751 }
 0x45d   : > { %2301 = vrot.lane.b32.xlu1 %v4494_v38, %s5324_s18 }
 0x45f   : > { %v4638_v10 = vpop.permute.xlu0 %1799  ;;  %v1754_v47 = vpop.permute.xlu1 %1753 }
 0x460   : > { %v1761_v32 = vsel %vm394_vm0, %v1752_v5, %v1754_v47 }
 0x461   : > { %v1786_v0 = vmul.f32 %v1772_v40, %v1761_v32  ;;  %v4644_v17 = vmul.f32 %v2462_v18, %v1761_v32  ;;  %2307 = vrot.lane.b32.xlu1 %v4512_v46, %s5324_s18 }
 0x463   : > { %v4650_v28 = vpop.permute.xlu0 %1797  ;;  %v1716_v49 = vpop.permute.xlu1 %1715  ;;  %v3261_v23 = vpack.c.bf16 %v1786_v0, %v1744_v50  ;;  %v1805_v50 = vld [vmem:[#allocation6 + $0x2] ss:$8 sm:$0xf]  ;;  %v2487_v0 = vld [vmem:[#allocation6 + $0x44] ss:$8 sm:$0xf] }
 0x464   : > { %v1720_v29 = vsel %vm351_vm1, %v1716_v49, %v1710_v33  ;;  %v1717_v16 = vsel %vm351_vm1, %v1714_v36, %v1716_v49  ;;  %v1814_v49 = vrot.slane %v1805_v50, %v3950_v9  ;;  %v2504_v22 = vrot.slane %v2487_v0, %v3956_v14 }
 0x465   : > { %3262 = vmatprep.subr.bf16.mxu0 %v3261_v23  ;;  %2347 = vrot.lane.b32.xlu1 %v4496_v54, %s5325_s19  ;;  %v1743_v26 = vmul.f32 %v1726_v55, %v1720_v29  ;;  %v4676_v41 = vmul.f32 %v2444_v21, %v1720_v29  ;;  %v1746_v25 = vmul.f32 %v1738_v59, %v1717_v16 }
 0x466   : > { %v4688_v36 = vmul.f32 %v2440_v31, %v1717_v16  ;;  %v2492_v23 = vrot.slane %v2487_v0, %v3948_v8  ;;  %v2522_v21 = vrot.slane %v4702_v20, %v3948_v8  ;;  %v1822_v58 = vrot.slane %v1805_v50, %v3956_v14 }
 0x467   : > { %v4664_v24 = vpop.permute.xlu0 %1877  ;;  %v1758_v42 = vpop.permute.xlu1 %1757  ;;  %v1804_v31 = vsel %vm438_vm2, %v4638_v10, %v4622_v12 }
 0x468   : > { %v1762_v56 = vsel %vm394_vm0, %v1758_v42, %v1752_v5  ;;  %v4700_v5 = vld [vmem:[#allocation6 + $0x3] ss:$8 sm:$0xf] }
 0x469   : > { %v1785_v53 = vmul.f32 %v1768_v51, %v1762_v56  ;;  %v4678_v27 = vmul.f32 %v2474_v2, %v1762_v56  ;;  %2389 = vrot.lane.b32.xlu1 %v4496_v54, %s5326_s14  ;;  %v1856_v55 = vrot.slane %v4700_v5, %v3950_v9  ;;  %v1810_v2 = vrot.slane %v1805_v50, %v3948_v8 }
 0x46b   : > { %v3263_v60 = vpack.c.bf16 %v1785_v53, %v1743_v26  ;;  %v4684_v48 = vpop.permute.xlu0 %1919  ;;  %v1756_v52 = vpop.permute.xlu1 %1755  ;;  %v2496_v26 = vrot.slane %v2487_v0, %v3950_v9  ;;  %v1860_v53 = vrot.slane %v4700_v5, %v3990_v30 }
 0x46c   : > { %v1759_v33 = vsel %vm394_vm0, %v1756_v52, %v1758_v42  ;;  %v1760_v35 = vsel %vm394_vm0, %v1754_v47, %v1756_v52  ;;  %vm5337_vm0 = vcmp.lt.s32.totalorder %v3940_v6, 1 }
 0x46d   : > { %v1787_v7 = vmul.f32 %v1776_v43, %v1760_v35  ;;  %v1788_v11 = vmul.f32 %v1780_v37, %v1759_v33  ;;  %v4694_v15 = vmul.f32 %v2466_v39, %v1760_v35  ;;  %v4696_v61 = vmul.f32 %v2470_v62, %v1759_v33  ;;  %3264 = vmatpush1.bf16.msra.mxu0 %v3263_v60  ;;  %vm5338_vm1 = vmmov %vm5337_vm0 }
 0x46e   : > { %2385 = vrot.lane.b32.xlu1 %v4494_v38, %s5326_s14  ;;  %v1852_v43 = vrot.slane %v4700_v5, %v3948_v8  ;;  %v2534_v37 = vrot.slane %v4702_v20, %v3956_v14  ;;  %v2500_v62 = vrot.slane %v2487_v0, %v3990_v30  ;;  %v1864_v35 = vrot.slane %v4700_v5, %v3956_v14 }
 0x46f   : > { %v3315_v45 = vpack.c.bf16 %v1787_v7, %v1745_v34  ;;  %v4706_v18 = vpop.permute.xlu0 %1883  ;;  %v1796_v44 = vpop.permute.xlu1 %1795  ;;  %v3313_v47 = vpack.c.bf16 %v1788_v11, %v1746_v25  ;;  %v1801_v34 = vsel %vm438_vm2, %v4650_v28, %v4638_v10  ;;  %v1827_v7 = vmul.f32 %v1810_v2, %v1804_v31 }
 0x470   : > { %v1803_v51 = vsel %vm438_vm2, %v4622_v12, %v1796_v44  ;;  %v1818_v12 = vrot.slane %v1805_v50, %v3990_v30  ;;  %v2530_v10 = vrot.slane %v4702_v20, %v3990_v30  ;;  %v1802_v50 = vsel %vm438_vm2, %v1796_v44, %v4650_v28  ;;  %vm5339_vm2 = vmmov %vm5337_vm0 }
 0x471   : > { %3314 = vmatprep.subr.bf16.mxu1 %v3313_v47  ;;  %v1828_v39 = vmul.f32 %v1814_v49, %v1803_v51  ;;  %v4737_v4 = vmul.f32 %v2492_v23, %v1803_v51  ;;  %v4763_v47 = vmul.f32 %v2504_v22, %v1804_v31  ;;  %v1830_v5 = vmul.f32 %v1822_v58, %v1801_v34 }
 0x472   : > { %2391 = vrot.lane.b32.xlu1 %v4512_v46, %s5326_s14  ;;  %3316 = vmatpush1.bf16.msra.mxu1 %v3315_v45  ;;  %v2526_v45 = vrot.slane %v4702_v20, %v3950_v9  ;;  %v4773_v23 = vmul.f32 %v2500_v62, %v1801_v34  ;;  %v1829_v28 = vmul.f32 %v1818_v12, %v1802_v50 }
 0x473   : > { %v4724_v59 = vpop.permute.xlu0 %1881  ;;  %v1838_v29 = vpop.permute.xlu1 %1837  ;;  %v4781_v44 = vmul.f32 %v2496_v26, %v1802_v50 }
 0x474   : > { %v1845_v42 = vsel %vm482_vm3, %v4628_v1, %v1838_v29  ;;  %5327 = vst [vmem:[#allocation13_spill] sm:$0xff] %v4773_v23 }
 0x475   : > { %v1870_v16 = vmul.f32 %v1856_v55, %v1845_v42  ;;  %v4739_v56 = vmul.f32 %v2522_v21, %v1845_v42 }
 0x477   : > { %v4752_v52 = vpop.permute.xlu0 %1961  ;;  %v1842_v25 = vpop.permute.xlu1 %1841  ;;  %v3265_v33 = vpack.c.bf16 %v1870_v16, %v1828_v39  ;;  %v2577_v39 = vld [vmem:[#allocation6 + $0x47] ss:$8 sm:$0xf] }
 0x478   : > { %v1846_v11 = vsel %vm482_vm3, %v1842_v25, %v4628_v1  ;;  %v2698_v1 = vld [vmem:[%s5205_s2 + $0x8] sm:$0xff] }
 0x479   : > { %v1869_v0 = vmul.f32 %v1852_v43, %v1846_v11  ;;  %v4768_v49 = vmul.f32 %v2534_v37, %v1846_v11  ;;  %3266 = vmatprep.subr.bf16.mxu0 %v3265_v33  ;;  %3148 = vmatprep.mubr.msk.f32.mxu0 %vm1483_vm4, %v2698_v1  ;;  %v1931_v37 = vld [vmem:[#allocation6 + $0x5] ss:$8 sm:$0xf]  ;;  %v2582_v11 = vrot.slane %v2577_v39, %v3948_v8 }
 0x47a   : > { %3149 = vmatprep.mubr.msk.f32.mxu1 %vm1483_vm4, %v2698_v1  ;;  %v1944_v51 = vrot.slane %v1931_v37, %v3990_v30  ;;  %vm5341_vm4 = vcmp.lt.s32.totalorder %v3940_v6, 127 }
 0x47b   : > { %v3267_v55 = vpack.c.bf16 %v1869_v0, %v1827_v7  ;;  %v4775_v21 = vpop.permute.xlu0 %2003  ;;  %v1840_v20 = vpop.permute.xlu1 %1839  ;;  %v1940_v7 = vrot.slane %v1931_v37, %v3950_v9 }
 0x47c   : > { %v1843_v2 = vsel %vm482_vm3, %v1840_v20, %v1842_v25  ;;  %v1844_v22 = vsel %vm482_vm3, %v1838_v29, %v1840_v20  ;;  %v2547_v25 = vld [vmem:[#allocation6 + $0x46] ss:$8 sm:$0xf]  ;;  %vm5340_vm3 = vmmov %vm5337_vm0 }
 0x47d   : > { %v1871_v58 = vmul.f32 %v1860_v53, %v1844_v22  ;;  %v1872_v31 = vmul.f32 %v1864_v35, %v1843_v2  ;;  %v4787_v42 = vmul.f32 %v2526_v45, %v1844_v22  ;;  %v4789_v43 = vmul.f32 %v2530_v10, %v1843_v2  ;;  %3268 = vmatpush1.bf16.msra.mxu0 %v3267_v55  ;;  %v1889_v53 = vld [vmem:[#allocation6 + $0x4] ss:$8 sm:$0xf] }
 0x47e   : > { %v1898_v33 = vrot.slane %v1889_v53, %v3950_v9  ;;  %v2552_v35 = vrot.slane %v2547_v25, %v3948_v8  ;;  %v1894_v10 = vrot.slane %v1889_v53, %v3948_v8  ;;  %v2564_v50 = vrot.slane %v2547_v25, %v3956_v14 }
 0x47f   : > { %v3319_v16 = vpack.c.bf16 %v1871_v58, %v1829_v28  ;;  %v4793_v12 = vpop.permute.xlu0 %1967  ;;  %v1880_v26 = vpop.permute.xlu1 %1879  ;;  %v3317_v34 = vpack.c.bf16 %v1872_v31, %v1830_v5  ;;  %v1906_v0 = vrot.slane %v1889_v53, %v3956_v14  ;;  %v1888_v55 = vsel %vm526_vm5, %v4706_v18, %v4664_v24 }
 0x480   : > { %v1887_v45 = vsel %vm526_vm5, %v4664_v24, %v1880_v26  ;;  %v1936_v28 = vrot.slane %v1931_v37, %v3948_v8  ;;  %v2594_v2 = vrot.slane %v2577_v39, %v3956_v14  ;;  %v1902_v62 = vrot.slane %v1889_v53, %v3990_v30 }
 0x481   : > { %3318 = vmatprep.subr.bf16.mxu1 %v3317_v34  ;;  %v1912_v22 = vmul.f32 %v1898_v33, %v1887_v45  ;;  %v4818_v58 = vmul.f32 %v2552_v35, %v1887_v45  ;;  %v2560_v34 = vrot.slane %v2547_v25, %v3990_v30  ;;  %v2556_v24 = vrot.slane %v2547_v25, %v3950_v9 }
 0x482   : > { %3320 = vmatpush1.bf16.msra.mxu1 %v3319_v16  ;;  %v1948_v35 = vrot.slane %v1931_v37, %v3956_v14  ;;  %v1885_v53 = vsel %vm526_vm5, %v4724_v59, %v4706_v18  ;;  %v2590_v45 = vrot.slane %v2577_v39, %v3990_v30  ;;  %v1886_v37 = vsel %vm526_vm5, %v1880_v26, %v4724_v59 }
 0x483   : > { %v4807_v5 = vpop.permute.xlu0 %1965  ;;  %v1922_v1 = vpop.permute.xlu1 %1921  ;;  %v4847_v40 = vmul.f32 %v2560_v34, %v1885_v53  ;;  %v2015_v34 = vld [vmem:[#allocation6 + $0x7] ss:$8 sm:$0xf]  ;;  %vm5342_vm5 = vcmp.lt.s32.totalorder %v3940_v6, 121 }
 0x484   : > { %v1929_v20 = vsel %vm570_vm6, %v4684_v48, %v1922_v1 }
 0x485   : > { %v1954_v31 = vmul.f32 %v1940_v7, %v1929_v20  ;;  %v4820_v16 = vmul.f32 %v2582_v11, %v1929_v20  ;;  %v2586_v7 = vrot.slane %v2577_v39, %v3950_v9  ;;  %v1911_v11 = vmul.f32 %v1894_v10, %v1888_v55  ;;  %5330 = vst [vmem:[#allocation18_spill] sm:$0xff] %v4847_v40 }
 0x486   : > { %v4840_v20 = vmul.f32 %v2564_v50, %v1888_v55  ;;  %v1914_v10 = vmul.f32 %v1906_v0, %v1885_v53  ;;  %v1913_v39 = vmul.f32 %v1902_v62, %v1886_v37  ;;  %v4853_v50 = vmul.f32 %v2556_v24, %v1886_v37 }
 0x487   : > { %v4828_v60 = vpop.permute.xlu0 %2045  ;;  %v1926_v63 = vpop.permute.xlu1 %1925  ;;  %v3269_v33 = vpack.c.bf16 %v1954_v31, %v1912_v22 }
 0x488   : > { %v1930_v25 = vsel %vm570_vm6, %v1926_v63, %v4684_v48  ;;  %5328 = vst [vmem:[#allocation14_spill] sm:$0xff] %v4840_v20 }
 0x489   : > { %v1953_v22 = vmul.f32 %v1936_v28, %v1930_v25  ;;  %v4845_v31 = vmul.f32 %v2594_v2, %v1930_v25  ;;  %3270 = vmatprep.subr.bf16.mxu0 %v3269_v33  ;;  %v2637_v33 = vld [vmem:[#allocation6 + $0x61] ss:$8 sm:$0xf]  ;;  %v2024_v25 = vrot.slane %v2015_v34, %v3950_v9 }
 0x48b   : > { %5329 = vst [vmem:[#allocation17_spill] sm:$0xff] %v4845_v31  ;;  %v3271_v18 = vpack.c.bf16 %v1953_v22, %v1911_v11  ;;  %v4849_v29 = vpop.permute.xlu0 %2087  ;;  %v1924_v19 = vpop.permute.xlu1 %1923 }
 0x48c   : > { %v1927_v59 = vsel %vm570_vm6, %v1924_v19, %v1926_v63  ;;  %v1928_v26 = vsel %vm570_vm6, %v1922_v1, %v1924_v19  ;;  %v2607_v1 = vld [vmem:[#allocation6 + $0x60] ss:$8 sm:$0xf]  ;;  %vm5343_vm6 = vmmov %vm5341_vm4 }
 0x48d   : > { %v1955_v55 = vmul.f32 %v1944_v51, %v1928_v26  ;;  %v1956_v0 = vmul.f32 %v1948_v35, %v1927_v59  ;;  %v4859_v28 = vmul.f32 %v2586_v7, %v1928_v26  ;;  %v4861_v2 = vmul.f32 %v2590_v45, %v1927_v59  ;;  %3272 = vmatpush1.bf16.msra.mxu0 %v3271_v18  ;;  %v1973_v51 = vld [vmem:[#allocation6 + $0x6] ss:$8 sm:$0xf] }
 0x48e   : > { %v1982_v35 = vrot.slane %v1973_v51, %v3950_v9  ;;  %v2612_v7 = vrot.slane %v2607_v1, %v3948_v8  ;;  %v2642_v45 = vrot.slane %v2637_v33, %v3948_v8  ;;  %v1978_v22 = vrot.slane %v1973_v51, %v3948_v8 }
 0x48f   : > { %5331 = vst [vmem:[#allocation15_spill] sm:$0xff] %v4861_v2  ;;  %v3323_v11 = vpack.c.bf16 %v1955_v55, %v1913_v39  ;;  %v4865_v24 = vpop.permute.xlu0 %2051  ;;  %v1964_v53 = vpop.permute.xlu1 %1963  ;;  %v3321_v63 = vpack.c.bf16 %v1956_v0, %v1914_v10  ;;  %v2624_v10 = vrot.slane %v2607_v1, %v3956_v14  ;;  %v1990_v18 = vrot.slane %v1973_v51, %v3956_v14 }
 0x490   : > { %v1971_v37 = vsel %vm614_vm7, %v4752_v52, %v1964_v53  ;;  %v1972_v26 = vsel %vm614_vm7, %v4793_v12, %v4752_v52  ;;  %v2020_v0 = vrot.slane %v2015_v34, %v3948_v8  ;;  %v2620_v32 = vrot.slane %v2607_v1, %v3990_v30 }
 0x491   : > { %3322 = vmatprep.subr.bf16.mxu1 %v3321_v63  ;;  %v1996_v63 = vmul.f32 %v1982_v35, %v1971_v37  ;;  %v4890_v62 = vmul.f32 %v2612_v7, %v1971_v37  ;;  %v1986_v40 = vrot.slane %v1973_v51, %v3990_v30  ;;  %v2616_v52 = vrot.slane %v2607_v1, %v3950_v9 }
 0x492   : > { %3324 = vmatpush1.bf16.msra.mxu1 %v3323_v11  ;;  %v2654_v11 = vrot.slane %v2637_v33, %v3956_v14  ;;  %v2028_v2 = vrot.slane %v2015_v34, %v3990_v30  ;;  %v2032_v7 = vrot.slane %v2015_v34, %v3956_v14  ;;  %v1969_v51 = vsel %vm614_vm7, %v4807_v5, %v4793_v12 }
 0x493   : > { %v4879_v39 = vpop.permute.xlu0 %2049  ;;  %v2006_v59 = vpop.permute.xlu1 %2005  ;;  %5332 = vst [vmem:[#allocation16_spill] sm:$0xff] %v4890_v62  ;;  %v2650_v37 = vrot.slane %v2637_v33, %v3990_v30  ;;  %v4919_v20 = vmul.f32 %v2620_v32, %v1969_v51 }
 0x494   : > { %v2013_v55 = vsel %vm658_vm8, %v4775_v21, %v2006_v59 }
 0x495   : > { %v2038_v48 = vmul.f32 %v2024_v25, %v2013_v55  ;;  %v4892_v19 = vmul.f32 %v2642_v45, %v2013_v55  ;;  %v2646_v25 = vrot.slane %v2637_v33, %v3950_v9  ;;  %v1995_v45 = vmul.f32 %v1978_v22, %v1972_v26  ;;  %5334 = vst [vmem:[#allocation20_spill] sm:$0xff] %v4919_v20 }
 0x496   : > { %v4912_v55 = vmul.f32 %v2624_v10, %v1972_v26  ;;  %v1998_v22 = vmul.f32 %v1990_v18, %v1969_v51 }
 0x497   : > { %5333 = vst [vmem:[#allocation19_spill] sm:$0xff] %v4892_v19  ;;  %v4900_v31 = vpop.permute.xlu0 %2129  ;;  %v2010_v23 = vpop.permute.xlu1 %2009  ;;  %v3273_v35 = vpack.c.bf16 %v2038_v48, %v1996_v63  ;;  %v1970_v48 = vsel %vm614_vm7, %v1964_v53, %v4807_v5  ;;  %vm5344_vm7 = vmmov %vm5342_vm5 }
 0x498   : > { %v2014_v1 = vsel %vm658_vm8, %v2010_v23, %v4775_v21  ;;  %v1997_v33 = vmul.f32 %v1986_v40, %v1970_v48  ;;  %v4925_v10 = vmul.f32 %v2616_v52, %v1970_v48  ;;  %v2183_v40 = vld [vmem:[#allocation6 + $0x23] ss:$8 sm:$0xf] }
 0x499   : > { %v2037_v34 = vmul.f32 %v2020_v0, %v2014_v1  ;;  %v4917_v63 = vmul.f32 %v2654_v11, %v2014_v1  ;;  %3274 = vmatprep.subr.bf16.mxu0 %v3273_v35  ;;  %v2099_v11 = vld [vmem:[#allocation6 + $0x21] ss:$8 sm:$0xf] }
 0x49b   : > { %v3275_v12 = vpack.c.bf16 %v2037_v34, %v1995_v45  ;;  %v4921_v62 = vpop.permute.xlu0 %2171  ;;  %v2008_v19 = vpop.permute.xlu1 %2007 }
 0x49c   : > { %v2011_v5 = vsel %vm658_vm8, %v2008_v19, %v2010_v23  ;;  %v2012_v53 = vsel %vm658_vm8, %v2006_v59, %v2008_v19  ;;  %v2057_v19 = vld [vmem:[#allocation6 + $0x20] ss:$8 sm:$0xf]  ;;  %v2108_v59 = vrot.slane %v2099_v11, %v3950_v9  ;;  %v2141_v23 = vld [vmem:[#allocation6 + $0x22] ss:$8 sm:$0xf]  ;;  %vm5345_vm8 = vmmov %vm5341_vm4 }
 0x49d   : > { %v2039_v26 = vmul.f32 %v2028_v2, %v2012_v53  ;;  %v2040_v18 = vmul.f32 %v2032_v7, %v2011_v5  ;;  %v4931_v32 = vmul.f32 %v2646_v25, %v2012_v53  ;;  %v4933_v0 = vmul.f32 %v2650_v37, %v2011_v5  ;;  %3276 = vmatpush1.bf16.msra.mxu0 %v3275_v12 }
 0x49e   : > { %v2066_v2 = vrot.slane %v2057_v19, %v3950_v9  ;;  %v2062_v48 = vrot.slane %v2057_v19, %v3948_v8  ;;  %v2104_v12 = vrot.slane %v2099_v11, %v3948_v8 }
 0x49f   : > { %5335 = vst [vmem:[#allocation21_spill] sm:$0xff] %v4933_v0  ;;  %v3327_v35 = vpack.c.bf16 %v2039_v26, %v1997_v33  ;;  %v4937_v52 = vpop.permute.xlu0 %2135  ;;  %v2048_v45 = vpop.permute.xlu1 %2047  ;;  %v3325_v51 = vpack.c.bf16 %v2040_v18, %v1998_v22  ;;  %v4958_v33 = vsel %vm702_vm9, %v4865_v24, %v4828_v60  ;;  %v2074_v26 = vrot.slane %v2057_v19, %v3956_v14 }
 0x4a0   : > { %v4946_v7 = vsel %vm702_vm9, %v4828_v60, %v2048_v45  ;;  %v2070_v18 = vrot.slane %v2057_v19, %v3990_v30  ;;  %v4972_v60 = vsel %vm702_vm9, %v4879_v39, %v4865_v24  ;;  %v4977_v19 = vsel %vm702_vm9, %v2048_v45, %v4879_v39  ;;  %vm5346_vm9 = vmmov %vm5341_vm4 }
 0x4a1   : > { %3326 = vmatprep.subr.bf16.mxu1 %v3325_v51  ;;  %v2080_v34 = vmul.f32 %v2066_v2, %v4946_v7  ;;  %v2079_v51 = vmul.f32 %v2062_v48, %v4958_v33  ;;  %5336 = vst [vmem:[#allocation22_spill] sm:$0xff] %v4972_v60 }
 0x4a2   : > { %3328 = vmatpush1.bf16.msra.mxu1 %v3327_v35 }
 0x4a3   : > { %v2090_v25 = vpop.permute.xlu1 %2089  ;;  %v2134_v1 = vpop.permute.xlu0 %2133 }
 0x4a4   : > { %v2097_v37 = vsel %vm746_vm10, %v4849_v29, %v2090_v25 }
 0x4a5   : > { %v2122_v22 = vmul.f32 %v2108_v59, %v2097_v37  ;;  %v2112_v59 = vrot.slane %v2099_v11, %v3990_v30  ;;  %v2116_v37 = vrot.slane %v2099_v11, %v3956_v14 }
 0x4a7   : > { %v2094_v5 = vpop.permute.xlu1 %2093  ;;  %v3277_v53 = vpack.c.bf16 %v2122_v22, %v2080_v34 }
 0x4a8   : > { %v2098_v35 = vsel %vm746_vm10, %v2094_v5, %v4849_v29  ;;  %v2214_v29 = vpop.permute.xlu0 %2213 }
 0x4a9   : > { %v2121_v2 = vmul.f32 %v2104_v12, %v2098_v35  ;;  %3278 = vmatprep.subr.bf16.mxu0 %v3277_v53  ;;  %v2082_v12 = vmul.f32 %v2074_v26, %v4972_v60  ;;  %v2081_v53 = vmul.f32 %v2070_v18, %v4977_v19 }
 0x4ab   : > { %v3279_v34 = vpack.c.bf16 %v2121_v2, %v2079_v51  ;;  %v2092_v48 = vpop.permute.xlu1 %2091  ;;  %v2150_v2 = vrot.slane %v2141_v23, %v3950_v9 }
 0x4ac   : > { %v2095_v22 = vsel %vm746_vm10, %v2092_v48, %v2094_v5  ;;  %v2096_v11 = vsel %vm746_vm10, %v2090_v25, %v2092_v48  ;;  %v2220_v51 = vpop.permute.xlu0 %2219  ;;  %v2192_v5 = vrot.slane %v2183_v40, %v3950_v9  ;;  %v2188_v48 = vrot.slane %v2183_v40, %v3948_v8  ;;  %vm5347_vm10 = vmmov %vm5342_vm5 }
 0x4ad   : > { %v2123_v24 = vmul.f32 %v2112_v59, %v2096_v11  ;;  %v2124_v35 = vmul.f32 %v2116_v37, %v2095_v22  ;;  %3280 = vmatpush1.bf16.msra.mxu0 %v3279_v34  ;;  %v2146_v59 = vrot.slane %v2141_v23, %v3948_v8  ;;  %v2140_v22 = vsel %vm790_vm11, %v4937_v52, %v4900_v31 }
 0x4af   : > { %v3331_v21 = vpack.c.bf16 %v2123_v24, %v2081_v53  ;;  %v2132_v39 = vpop.permute.xlu1 %2131  ;;  %v3329_v45 = vpack.c.bf16 %v2124_v35, %v2082_v12  ;;  %v2158_v53 = vrot.slane %v2141_v23, %v3956_v14  ;;  %v2225_v24 = vld [vmem:[#allocation6 + $0x24] ss:$8 sm:$0xf]  ;;  %v2154_v35 = vrot.slane %v2141_v23, %v3990_v30 }
 0x4b0   : > { %v2139_v25 = vsel %vm790_vm11, %v4900_v31, %v2132_v39  ;;  %v4999_v11 = vpop.permute.xlu0 %2261  ;;  %v2137_v31 = vsel %vm790_vm11, %v2134_v1, %v4937_v52  ;;  %v2230_v23 = vrot.slane %v2225_v24, %v3948_v8  ;;  %v2234_v52 = vrot.slane %v2225_v24, %v3950_v9 }
 0x4b1   : > { %3330 = vmatprep.subr.bf16.mxu1 %v3329_v45  ;;  %v2164_v37 = vmul.f32 %v2150_v2, %v2139_v25  ;;  %v2196_v2 = vrot.slane %v2183_v40, %v3990_v30  ;;  %v2166_v20 = vmul.f32 %v2158_v53, %v2137_v31 }
 0x4b2   : > { %3332 = vmatpush1.bf16.msra.mxu1 %v3331_v21 }
 0x4b3   : > { %v2174_v26 = vpop.permute.xlu1 %2173 }
 0x4b4   : > { %v2181_v18 = vsel %vm834_vm12, %v4921_v62, %v2174_v26 }
 0x4b5   : > { %v2206_v34 = vmul.f32 %v2192_v5, %v2181_v18  ;;  %v2163_v5 = vmul.f32 %v2146_v59, %v2140_v22  ;;  %v2200_v18 = vrot.slane %v2183_v40, %v3956_v14  ;;  %v2224_v40 = vsel %vm5337_vm0, %v2220_v51, %v2214_v29 }
 0x4b6   : > { %v2247_v53 = vmul.f32 %v2230_v23, %v2224_v40 }
 0x4b7   : > { %v2178_v12 = vpop.permute.xlu1 %2177  ;;  %v3281_v21 = vpack.c.bf16 %v2206_v34, %v2164_v37  ;;  %v2138_v37 = vsel %vm790_vm11, %v2132_v39, %v2134_v1  ;;  %vm5348_vm11 = vmmov %vm5342_vm5 }
 0x4b8   : > { %v2182_v45 = vsel %vm834_vm12, %v2178_v12, %v4921_v62  ;;  %v2304_v62 = vpop.permute.xlu0 %2303 }
 0x4b9   : > { %v2205_v25 = vmul.f32 %v2188_v48, %v2182_v45  ;;  %3282 = vmatprep.subr.bf16.mxu0 %v3281_v21  ;;  %v2165_v48 = vmul.f32 %v2154_v35, %v2138_v37 }
 0x4bb   : > { %v3283_v34 = vpack.c.bf16 %v2205_v25, %v2163_v5  ;;  %v2176_v60 = vpop.permute.xlu1 %2175 }
 0x4bc   : > { %v2179_v59 = vsel %vm834_vm12, %v2176_v60, %v2178_v12  ;;  %v2180_v22 = vsel %vm834_vm12, %v2174_v26, %v2176_v60  ;;  %v2238_v60 = vrot.slane %v2225_v24, %v3990_v30  ;;  %v2242_v26 = vrot.slane %v2225_v24, %v3956_v14  ;;  %v2260_v25 = vpop.permute.xlu0 %2259 }
 0x4bd   : > { %v2207_v21 = vmul.f32 %v2196_v2, %v2180_v22  ;;  %v2208_v1 = vmul.f32 %v2200_v18, %v2179_v59  ;;  %3284 = vmatpush1.bf16.msra.mxu0 %v3283_v34  ;;  %v3287_v2 = vpack.c.bf16 %v4494_v38, %v2247_v53  ;;  %v2313_v59 = vld [vmem:[#allocation6 + $0x27] ss:$8 sm:$0xf]  ;;  %vm5349_vm12 = vcmp.lt.s32.totalorder %v3940_v6, 120 }
 0x4be   : > { %vm5351_vm14 = vmmov %vm5349_vm12  ;;  %v5359_v6 = vpack.c.bf16 %v4787_v42, %v4781_v44  ;;  %v5364_v44 = vpack.c.bf16 %v4768_v49, %v4763_v47 }
 0x4bf   : > { %v3335_v39 = vpack.c.bf16 %v2207_v21, %v2165_v48  ;;  %v2216_v45 = vpop.permute.xlu1 %2215  ;;  %v3333_v5 = vpack.c.bf16 %v2208_v1, %v2166_v20  ;;  %v2318_v1 = vrot.slane %v2313_v59, %v3948_v8  ;;  %vm5353_vm0 = vmmov %vm5349_vm12 }
 0x4c0   : > { %v2223_v31 = vsel %vm5338_vm1, %v2214_v29, %v2216_v45  ;;  %v2266_v22 = vpop.permute.xlu0 %2265  ;;  %vm5354_vm1 = vmmov %vm5353_vm0 }
 0x4c1   : > { %v2248_v12 = vmul.f32 %v2234_v52, %v2223_v31  ;;  %3334 = vmatprep.subr.bf16.mxu1 %v3333_v5 }
 0x4c2   : > { %3336 = vmatpush1.bf16.msra.mxu1 %v3335_v39  ;;  %v2269_v39 = vsel %vm5343_vm6, %v2260_v25, %v4999_v11 }
 0x4c3   : > { %v2218_v0 = vpop.permute.xlu1 %2217  ;;  %v3285_v35 = vpack.c.bf16 %v4502_v57, %v2248_v12  ;;  %v2271_v57 = vld [vmem:[#allocation6 + $0x26] ss:$8 sm:$0xf] }
 0x4c4   : > { %v2221_v20 = vsel %vm5339_vm2, %v2218_v0, %v2220_v51  ;;  %v2222_v18 = vsel %vm5340_vm3, %v2216_v45, %v2218_v0  ;;  %v2280_v38 = vrot.slane %v2271_v57, %v3950_v9  ;;  %v2322_v51 = vrot.slane %v2313_v59, %v3950_v9  ;;  %vm5355_vm2 = vmmov %vm5350_vm13 }
 0x4c5   : > { %v2249_v29 = vmul.f32 %v2238_v60, %v2222_v18  ;;  %v2250_v37 = vmul.f32 %v2242_v26, %v2221_v20  ;;  %3286 = vmatprep.subr.bf16.mxu0 %v3285_v35  ;;  %v2276_v40 = vrot.slane %v2271_v57, %v3948_v8  ;;  %v2288_v53 = vrot.slane %v2271_v57, %v3956_v14  ;;  %vm5356_vm3 = vmmov %vm5355_vm2 }
 0x4c6   : > { %3288 = vmatpush1.bf16.msra.mxu0 %v3287_v2  ;;  %v2284_v31 = vrot.slane %v2271_v57, %v3990_v30  ;;  %v2326_v35 = vrot.slane %v2313_v59, %v3990_v30  ;;  %v2330_v2 = vrot.slane %v2313_v59, %v3956_v14  ;;  %v2270_v20 = vsel %vm5345_vm8, %v2266_v22, %v2260_v25  ;;  %v2397_v59 = vld [vmem:[#allocation6 + $0x41] ss:$8 sm:$0xf] }
 0x4c7   : > { %v3339_v23 = vpack.c.bf16 %v4496_v54, %v2249_v29  ;;  %v2264_v24 = vpop.permute.xlu1 %2263  ;;  %v3337_v34 = vpack.c.bf16 %v4512_v46, %v2250_v37  ;;  %v2346_v46 = vpop.permute.xlu0 %2345  ;;  %v2293_v60 = vmul.f32 %v2276_v40, %v2269_v39  ;;  %v2355_v40 = vld [vmem:[#allocation6 + $0x40] ss:$8 sm:$0xf] }
 0x4c8   : > { %v2268_v0 = vsel %vm5341_vm4, %v4999_v11, %v2264_v24  ;;  %v2267_v11 = vsel %vm5346_vm9, %v2264_v24, %v2266_v22  ;;  %v2364_v22 = vrot.slane %v2355_v40, %v3950_v9  ;;  %v2360_v39 = vrot.slane %v2355_v40, %v3948_v8 }
 0x4c9   : > { %3338 = vmatprep.subr.bf16.mxu1 %v3337_v34  ;;  %v2294_v48 = vmul.f32 %v2280_v38, %v2268_v0  ;;  %v2296_v34 = vmul.f32 %v2288_v53, %v2270_v20  ;;  %v2295_v57 = vmul.f32 %v2284_v31, %v2267_v11  ;;  %v2402_v53 = vrot.slane %v2397_v59, %v3948_v8 }
 0x4ca   : > { %3340 = vmatpush1.bf16.msra.mxu1 %v3339_v23 }
 0x4cb   : > { %v2306_v52 = vpop.permute.xlu1 %2305  ;;  %v2388_v18 = vpop.permute.xlu0 %2387 }
 0x4cc   : > { %v2310_v54 = vsel %vm5342_vm5, %v2304_v62, %v2306_v52 }
 0x4cd   : > { %v2336_v21 = vmul.f32 %v2322_v51, %v2310_v54 }
 0x4cf   : > { %v2302_v45 = vpop.permute.xlu1 %2301  ;;  %v3289_v5 = vpack.c.bf16 %v2336_v21, %v2294_v48  ;;  %v2344_v24 = vpop.permute.xlu0 %2343  ;;  %v2406_v48 = vrot.slane %v2397_v59, %v3950_v9 }
 0x4d0   : > { %v2311_v12 = vsel %vm5344_vm7, %v2302_v45, %v2304_v62  ;;  %v2353_v31 = vsel %vm5351_vm14, %v2344_v24, %v2346_v46 }
 0x4d1   : > { %v2335_v26 = vmul.f32 %v2318_v1, %v2311_v12  ;;  %3290 = vmatprep.subr.bf16.mxu0 %v3289_v5  ;;  %v2377_v11 = vmul.f32 %v2360_v39, %v2353_v31  ;;  %v5380_v39 = vld [vmem:[#allocation20_spill] sm:$0xff] }
 0x4d3   : > { %v3291_v29 = vpack.c.bf16 %v2335_v26, %v2293_v60  ;;  %v2308_v37 = vpop.permute.xlu1 %2307  ;;  %v2350_v12 = vpop.permute.xlu0 %2349 }
 0x4d4   : > { %v2309_v23 = vsel %vm5347_vm10, %v2306_v52, %v2308_v37  ;;  %v2312_v62 = vsel %vm5348_vm11, %v2308_v37, %v2302_v45  ;;  %v2410_v37 = vrot.slane %v2397_v59, %v3990_v30 }
 0x4d5   : > { %v2337_v38 = vmul.f32 %v2326_v35, %v2309_v23  ;;  %v2338_v51 = vmul.f32 %v2330_v2, %v2312_v62  ;;  %3292 = vmatpush1.bf16.msra.mxu0 %v3291_v29  ;;  %v2372_v35 = vrot.slane %v2355_v40, %v3956_v14  ;;  %v2368_v2 = vrot.slane %v2355_v40, %v3990_v30 }
 0x4d6   : > { %v2414_v23 = vrot.slane %v2397_v59, %v3956_v14  ;;  %v5357_v59 = vpack.c.bf16 %v4694_v15, %v4682_v13  ;;  %v5361_v13 = vpack.c.bf16 %v4739_v56, %v4737_v4  ;;  %v5362_v15 = vpack.c.bf16 %v4859_v28, %v4853_v50  ;;  %v5367_v56 = vld [vmem:[#allocation13_spill] sm:$0xff]  ;;  %v5370_v50 = vld [vmem:[#allocation14_spill] sm:$0xff] }
 0x4d7   : > { %v3343_v0 = vpack.c.bf16 %v2337_v38, %v2295_v57  ;;  %v2348_v25 = vpop.permute.xlu1 %2347  ;;  %v3341_v54 = vpack.c.bf16 %v2338_v51, %v2296_v34  ;;  %v5366_v4 = vpack.c.bf16 %v4931_v32, %v4925_v10  ;;  %v5368_v42 = vpack.c.bf16 %v4789_v43, %v5367_v56  ;;  %v5375_v10 = vld [vmem:[#allocation15_spill] sm:$0xff]  ;;  %v5376_v32 = vld [vmem:[#allocation18_spill] sm:$0xff] }
 0x4d8   : > { %v2352_v52 = vsel %vm5349_vm12, %v2346_v46, %v2348_v25  ;;  %v2354_v46 = vsel %vm5353_vm0, %v2350_v12, %v2344_v24  ;;  %v2351_v62 = vsel %vm5354_vm1, %v2348_v25, %v2350_v12  ;;  %v5358_v25 = vpack.c.bf16 %v4644_v17, %v4642_v3  ;;  %v2667_v17 = vld [vmem:[#allocation6 + $0x62] ss:$8 sm:$0xf] }
 0x4d9   : > { %3342 = vmatprep.subr.bf16.mxu1 %v3341_v54  ;;  %v2378_v45 = vmul.f32 %v2364_v22, %v2352_v52  ;;  %v2380_v51 = vmul.f32 %v2372_v35, %v2354_v46  ;;  %v5363_v3 = vpack.c.bf16 %v4696_v61, %v4688_v36  ;;  %v2672_v36 = vrot.slane %v2667_v17, %v3948_v8  ;;  %v5369_v61 = vld [vmem:[#allocation17_spill] sm:$0xff] }
 0x4da   : > { %3344 = vmatpush1.bf16.msra.mxu1 %v3343_v0  ;;  %v2379_v0 = vmul.f32 %v2368_v2, %v2351_v62  ;;  %v5371_v47 = vpack.c.bf16 %v5369_v61, %v5370_v50  ;;  %v2684_v49 = vrot.slane %v2667_v17, %v3956_v14  ;;  %v5377_v52 = vpack.c.bf16 %v5375_v10, %v5376_v32  ;;  %v3462_v10 = vld [vmem:[%s3806_s16 + $0x8] sm:$0xff] }
 0x4db   : > { %v2390_v21 = vpop.permute.xlu1 %2389  ;;  %v2689_v43 = vmul.f32 %v2672_v36, %v4946_v7  ;;  %v5378_v8 = vpack.c.bf16 %v4917_v63, %v4912_v55  ;;  %v2680_v14 = vrot.slane %v2667_v17, %v3990_v30  ;;  %v5382_v7 = vld [vmem:[#allocation22_spill] sm:$0xff] }
 0x4dc   : > { %v2394_v1 = vsel %vm5350_vm13, %v2388_v18, %v2390_v21 }
 0x4dd   : > { %v2420_v5 = vmul.f32 %v2406_v48, %v2394_v1  ;;  %v5360_v48 = vpack.c.bf16 %v4678_v27, %v4676_v41  ;;  %v2676_v41 = vrot.slane %v2667_v17, %v3950_v9  ;;  %v5365_v27 = vpack.c.bf16 %v4820_v16, %v4818_v58  ;;  %v5372_v58 = vld [vmem:[#allocation19_spill] sm:$0xff]  ;;  %v5373_v16 = vld [vmem:[#allocation16_spill] sm:$0xff]  ;;  %v5379_v1 = vld [vmem:[#allocation21_spill] sm:$0xff] }
 0x4de   : > { %v5374_v28 = vpack.c.bf16 %v5372_v58, %v5373_v16  ;;  %v3461_v16 = vld [vmem:[%s3806_s16] sm:$0xff] }
 0x4df   : > { %v3293_v26 = vpack.c.bf16 %v2420_v5, %v2378_v45  ;;  %v2690_v9 = vmul.f32 %v2676_v41, %v4977_v19  ;;  %v2697_v19 = vld [vmem:[%s5205_s2] sm:$0xff]  ;;  %v5381_v45 = vpack.c.bf16 %v5379_v1, %v5380_v39  ;;  %v2691_v5 = vmul.f32 %v2680_v14, %v5382_v7 }
 0x4e0   : > { %v2386_v60 = vpop.permute.xlu1 %2385 }
 0x4e1   : > { %v2395_v20 = vsel %vm5352_vm15, %v2386_v60, %v2388_v18  ;;  %3294 = vmatprep.subr.bf16.mxu0 %v3293_v26 }
 0x4e2   : > { %v2419_v29 = vmul.f32 %v2402_v53, %v2395_v20 }
 0x4e4   : > { %v3295_v34 = vpack.c.bf16 %v2419_v29, %v2377_v11  ;;  %v2392_v57 = vpop.permute.xlu1 %2391 }
 0x4e5   : > { %v2393_v38 = vsel %vm5355_vm2, %v2390_v21, %v2392_v57  ;;  %v2396_v18 = vsel %vm5356_vm3, %v2392_v57, %v2386_v60  ;;  %v2692_v21 = vmul.f32 %v2684_v49, %v4958_v33 }
 0x4e6   : > { %v2421_v54 = vmul.f32 %v2410_v37, %v2393_v38  ;;  %v2422_v40 = vmul.f32 %v2414_v23, %v2396_v18  ;;  %3296 = vmatpush1.bf16.msra.mxu0 %v3295_v34  ;;  %v3010_v37 = vld [vmem:[%s5209_s6] sm:$0xff] }
 0x4e7   : > { %3298 = vmatprep.subr.bf16.mxu0 %v5357_v59 }
 0x4e8   : > { %v3347_v24 = vpack.c.bf16 %v2421_v54, %v2379_v0  ;;  %v3345_v22 = vpack.c.bf16 %v2422_v40, %v2380_v51 }
 0x4ea   : > { %3300 = vmatpush1.bf16.msra.mxu0 %v5358_v25  ;;  %3346 = vmatprep.subr.bf16.mxu1 %v3345_v22 }
 0x4eb   : > { %3302 = vmatprep.subr.bf16.mxu0 %v5359_v6  ;;  %3348 = vmatpush1.bf16.msra.mxu1 %v3347_v24 }
 0x4ec   : > { %3350 = vmatprep.subr.bf16.mxu1 %v5360_v48 }
 0x4ee   : > { %3304 = vmatpush1.bf16.msra.mxu0 %v5361_v13 }
 0x4ef   : > { %3306 = vmatprep.subr.bf16.mxu0 %v5362_v15  ;;  %3352 = vmatpush1.bf16.msra.mxu1 %v5363_v3 }
 0x4f0   : > { %3354 = vmatprep.subr.bf16.mxu1 %v5364_v44  ;;  %v2998_v44 = vld [vmem:[%s5208_s5] sm:$0xff] }
 0x4f2   : > { %3308 = vmatpush1.bf16.msra.mxu0 %v5365_v27 }
 0x4f3   : > { %3310 = vmatprep.subr.bf16.mxu0 %v5366_v4  ;;  %3356 = vmatpush1.bf16.msra.mxu1 %v5368_v42 }
 0x4f4   : > { %3358 = vmatprep.subr.bf16.mxu1 %v5371_v47 }
 0x4f6   : > { %3312 = vmatpush1.bf16.msra.mxu0 %v5374_v28 }
 0x4f7   : > { %2862 = vmatprep.subr.mxu0 %v2690_v9  ;;  %3360 = vmatpush1.bf16.msra.mxu1 %v5377_v52  ;;  %v3463_v52 = vld [vmem:[%s3806_s16 + $0x10] sm:$0xff] }
 0x4f8   : > { %3362 = vmatprep.subr.bf16.mxu1 %v5378_v8  ;;  %v3464_v8 = vld [vmem:[%s3806_s16 + $0x18] sm:$0xff] }
 0x4fa   : > { %2863 = vmatpush1.msra.mxu0 %v2689_v43 }
 0x4fb   : > { %3364 = vmatpush1.bf16.msra.mxu1 %v5381_v45  ;;  %2875 = vmatmul.mubr.f32.vlgmr.msra.gmra.mrb[2].mxu0 %v2697_v19 }
 0x4fc   : > { %2933 = vmatprep.subr.mxu1 %v2692_v21 }
 0x4ff   : > { %2934 = vmatpush1.msra.mxu1 %v2691_v5 }
 0x500   : > { %2946 = vmatmul.mubr.f32.vlgmr.msra.gmra.mrb[2].mxu1 %v2697_v19 }
 0x5ce   : > { %v2876_v55 = vpop.f32.mrb[2].mxu0 }
 0x5cf   : > { %v2964_v63 = vmul.f32 %v2876_v55, %v2876_v55  ;;  %v2878_v53 = vpop.f32.mrb[3].mxu0 }
 0x5d0   : > { %v2952_v31 = vadd.f32 %v2878_v53, %v2876_v55  ;;  %v2965_v12 = vmul.f32 %v2878_v53, %v2878_v53 }
 0x5d2   : > { %v2968_v60 = vadd.f32 %v2965_v12, %v2964_v63 }
 0x5d3   : > { %v2947_v30 = vpop.f32.mrb[2].mxu1 }
 0x5d4   : > { %v2953_v26 = vadd.f32 %v2952_v31, %v2947_v30  ;;  %v2966_v33 = vmul.f32 %v2947_v30, %v2947_v30  ;;  %v2949_v35 = vpop.f32.mrb[3].mxu1 }
 0x5d5   : > { %v2967_v2 = vmul.f32 %v2949_v35, %v2949_v35 }
 0x5d6   : > { %v2969_v20 = vadd.f32 %v2968_v60, %v2966_v33  ;;  %v2954_v11 = vadd.f32 %v2953_v26, %v2949_v35 }
 0x5d8   : > { %v2970_v29 = vadd.f32 %v2969_v20, %v2967_v2  ;;  %2955 = vadd.xlane.f32.xlu0 %v2954_v11 }
 0x5da   : > { %2971 = vadd.xlane.f32.xlu1 %v2970_v29 }
 0x5eb   : > { %3013 = vperm.xlu1 %3455, %v3010_v37  }
 0x665   : > { %v2956_v23 = vpop.xlane.xlu0 %2955 }
 0x666   : > { %v2957_v46 = vrot.slane %v2956_v23, 4 }
 0x667   : > { %v2972_v62 = vpop.xlane.xlu1 %2971 }
 0x668   : > { %v2958_v34 = vadd.f32 %v2957_v46, %v2956_v23  ;;  %v2973_v57 = vrot.slane %v2972_v62, 4 }
 0x66a   : > { %v2959_v38 = vrot.slane %v2958_v34, 2  ;;  %v2974_v18 = vadd.f32 %v2973_v57, %v2972_v62 }
 0x66b   : > { %v3014_v50 = vpop.permute.xlu1 %3013 }
 0x66c   : > { %v2975_v51 = vrot.slane %v2974_v18, 2  ;;  %v2960_v0 = vadd.f32 %v2959_v38, %v2958_v34 }
 0x66e   : > { %v2961_v54 = vrot.slane %v2960_v0, 1  ;;  %v2976_v40 = vadd.f32 %v2975_v51, %v2974_v18 }
 0x670   : > { %v2962_v59 = vadd.f32 %v2961_v54, %v2960_v0  ;;  %v2977_v24 = vrot.slane %v2976_v40, 1 }
 0x672   : > { %3371 = vpush %v2962_v59  ;;  %v2978_v22 = vadd.f32 %v2977_v24, %v2976_v40 }
 0x674   : > { %3373 = vpush %v2978_v22 }
 0x6a3   : > { %s3372_s10 = spop %3371 }
 0x6a4   : > { %s2982_s13 = smul.f32 0.00048828125, %s3372_s10  ;;  %s5383_s10 = sshll.u32 %s3800_s20, 5 }
 0x6a5   : > { %s3374_s18 = spop %3373 }
 0x6a6   : > { %s2986_s19 = smul.f32 %s2982_s13, %s2982_s13  ;;  %v2993_v25 = vstv %s2982_s13  ;;  %s336_s13 = scalar_lea.vmem [#allocation8], %s5383_s10 }
 0x6a7   : > { %s2985_s14 = smul.f32 0.00048828125, %s3374_s18  ;;  %v2994_v6 = vsub.f32 %v2876_v55, %v2993_v25  ;;  %v2995_v48 = vsub.f32 %v2878_v53, %v2993_v25  ;;  %v2996_v13 = vsub.f32 %v2947_v30, %v2993_v25  ;;  %v2997_v15 = vsub.f32 %v2949_v35, %v2993_v25  ;;  %s3055_s18 = sshll.u32 %s336_s13, 4  ;;  %s5161_s18 = int_to_ptr.vmem [resolvable:$true] %s3055_s18 }
 0x6a9   : > { %s2987_s21 = ssub.f32 %s2985_s14, %s2986_s19 }
 0x6ab   : > { %s2988_s25 = smax.f32 %s3617_s17, %s2987_s21  ;;  %s3156_s17 = sshll.u32 %s3685_s9, 9 }
 0x6ac   : > { %s2989_s11 = sadd.f32 1e-05, %s2988_s25  ;;  %s5159_s14 = scalar_lea.hbm %s5211_s8, %s3156_s17 }
 0x6ad   : > { %s3041_s9 = scalar_lea.sflag [#allocation5], %s3800_s20  ;;  %s3523_s21 = scalar_lea.vmem %s5161_s18, 512 }
 0x6ae   : > { %v2990_v3 = vstv %s2989_s11  ;;  %p3524_p4 = scmp.ne.s32.totalorder %s5161_s18, %s3523_s21  ;;  %s3618_s25 = smov [#allocation8]  }
 0x6af   : > { %3459 = vrsqrt.f32 %v2990_v3  ;;  %s3527_s11 = sshll.u32 %s3618_s25, 4  ;;  %s3528_s11 = int_to_ptr.vmem [resolvable:$false] %s3527_s11 }
 0x6b0   : > { %p3525_p6 = pnand %p3524_p4, %p3755_p12  ;;  %s3529_s15 = scalar_lea.vmem %s3528_s11, 1024 }
 0x6b1   : > { %p3530_p10 = scmp.lt.s32.totalorder %s5161_s18, %s3528_s11  ;;  %p3531_p13 = scmp.lt.s32.totalorder %s3529_s15, %s3523_s21 }
 0x6b2   : > { %p3526_p8 = pneg %p3525_p6 }
 0x6b3   : > { %p3532_p3 = por %p3531_p13, %p3530_p10 }
 0x6b5   : > { %p3533_p7 = pnand %p3532_p3, %p3526_p8 }
 0x6b9   : > { %v3460_v17 = vpop.eup %3459 }
 0x6ba   : > { %3375 = vpush %v3460_v17 }
 0x6eb   : > { %s3376_s22 = spop %3375 }
 0x6ec   : > { %v2999_v41 = vstv %s3376_s22 }
 0x6ed   : > { %v3000_v27 = vmul.f32 %v2999_v41, %v2998_v44 }
 0x6ef   : > { %3003 = vperm.xlu0 %3456, %v3000_v27  }
 0x76e   : > { %v3004_v4 = vpop.permute.xlu0 %3003 }
 0x76f   : > { %v3006_v56 = vmul.f32 %v3004_v4, %v2994_v6  ;;  %v3007_v42 = vmul.f32 %v3004_v4, %v2995_v48  ;;  %v3008_v36 = vmul.f32 %v3004_v4, %v2996_v13  ;;  %v3009_v61 = vmul.f32 %v3004_v4, %v2997_v15 }
 0x771   : > { %v3016_v47 = vadd.f32 %v3014_v50, %v3006_v56  ;;  %v3017_v9 = vadd.f32 %v3014_v50, %v3007_v42  ;;  %v3018_v49 = vadd.f32 %v3014_v50, %v3008_v36  ;;  %v3019_v58 = vadd.f32 %v3014_v50, %v3009_v61 }
 0x773   : > { %v3020_v28 = vadd.f32 %v3461_v16, %v3016_v47  ;;  %v3021_v32 = vadd.f32 %v3462_v10, %v3017_v9  ;;  %v3022_v43 = vadd.f32 %v3463_v52, %v3018_v49  ;;  %v3023_v19 = vadd.f32 %v3464_v8, %v3019_v58 }
 0x775   : > { %vm3024_vm4 = vcmp.ge.f32.partialorder %v3020_v28, 0.0  ;;  %vm3025_vm5 = vcmp.ge.f32.partialorder %v3021_v32, 0.0  ;;  %vm3026_vm6 = vcmp.ge.f32.partialorder %v3022_v43, 0.0  ;;  %vm3027_vm7 = vcmp.ge.f32.partialorder %v3023_v19, 0.0 }
 0x776   : > { %v3028_v14 = vmul.f32 0.1, %v3020_v28  ;;  %v3029_v21 = vmul.f32 0.1, %v3021_v32  ;;  %v3030_v1 = vmul.f32 0.1, %v3022_v43 }
 0x777   : > { %v3031_v39 = vmul.f32 0.1, %v3023_v19 }
 0x778   : > { %v3032_v45 = vsel %vm3024_vm4, %v3020_v28, %v3028_v14  ;;  %v3033_v7 = vsel %vm3025_vm5, %v3021_v32, %v3029_v21  ;;  %v3034_v5 = vsel %vm3026_vm6, %v3022_v43, %v3030_v1 }
 0x779   : > { %v3035_v55 = vsel %vm3027_vm7, %v3023_v19, %v3031_v39  ;;  %3036 = vst [vmem:[%s336_s13] sm:$0xff] %v3032_v45  ;;  %3037 = vst [vmem:[%s336_s13 + $0x8] sm:$0xff] %v3033_v7 }
 0x77a   : > { %3038 = vst [vmem:[%s336_s13 + $0x10] sm:$0xff] %v3034_v5  ;;  %3039 = vst [vmem:[%s336_s13 + $0x18] sm:$0xff] %v3035_v55 }
 0x77b   : > { %3536 = shalt.err (!%p3533_p7)
}
 0x77c   : > { %s3537_s20 = scalar_lea.hbm %s5159_s14, 512  ;;  %s3541_s17 = scalar_lea.hbm %s5211_s8, 1024 }
 0x77d   : > { %p3538_p9 = scmp.ne.s32.totalorder %s5159_s14, %s3537_s20  ;;  %p3542_p0 = scmp.lt.u32.totalorder %s5159_s14, %s5211_s8 }
 0x77e   : > { %p3543_p11 = scmp.lt.u32.totalorder %s3541_s17, %s3537_s20  ;;  %p3545_p4 = scmp.lt.u32.totalorder %s3537_s20, %s5159_s14 }
 0x77f   : > { %p3539_p2 = pnand %p3538_p9, %p3755_p12 }
 0x780   : > { %p3544_p1 = por %p3543_p11, %p3542_p0 }
 0x781   : > { %p3540_p5 = pneg %p3539_p2 }
 0x782   : > { %p3546_p6 = por %p3545_p4, %p3544_p1 }
 0x784   : > { %p3547_p8 = pnand %p3546_p6, %p3540_p5 }
 0x786   : > { %3550 = shalt.err (!%p3547_p8)
}
 0x787   : > { %3383 = dma.vmem_to_hbm [thread:$0]  (%p3755_p12), %s5161_s18, 512, %s5159_s14, %s3041_s9  }
 0x788 PF: > { %s3067_s19 = sand.u32 1, %s3581_s27   ;;  %p5384_p10 = scmp.ne.s32.totalorder %s5271_s12, 0 }
 0x789   : > { %p5385_p13 = scmp.ge.s32.totalorder %s3593_s30, 2  ;;  %s3068_s16 = scalar_lea.sflag [#allocation5], %s3067_s19 }
 0x78b   : > { %p3394_p3 = pnand %p5385_p13, %p5384_p10 }
 0x78d   : > { %3576 = dma.done.wait (!%p3394_p3), %s3068_s16, 512  }
 0x78e   : > { %3578 = vsyncadd (!%p3394_p3), %s3068_s16, 4294966784  ;;  %s5386_s30 = sld [smem:[#allocation12_spill]]  ;;  %s5387_s27 = smov %s3585_s28 }
 0x78f   : > { %s5388_s28 = smov %s3589_s29  ;;  %s5389_s29 = smov %s3751_s23 }
 0x794   : > { %p22_p7 = scmp.ge.s32.totalorder %s5386_s30, 4  }
 0x796   :  { %24 = sbr.rel (!%p22_p7) target bundleno = 6 (0x6), region = 126 }
 0x79d   :  { %3073 = vsyncpa [#allocation4], 1 }
 0x79e   :  { %3075 = vsyncpa [#allocation4 + $0x1], 1 }
 0x79f   :  { %3076 = vsyncpa [#allocation7], 1 }
 0x7a0   :  { %3077 = vsyncpa [#allocation5], 1 }
 0x7a1   :  { %3079 = vsyncpa [#allocation5 + $0x1], 1 }

</bundles_post_ra>
